<compile_context>
chip_gen: v6e
topology: v6e:2x2x1
jax: 0.10.0
libtpu: 0.0.40
codegen_flags: <defaults>
</compile_context>

<pallas_src>
import functools

import jax
import jax.numpy as jnp
from jax import lax
from jax.experimental import pallas as pl
from jax.experimental.pallas import tpu as pltpu


def _sigmoid(x):
    # Explicit logistic so kernel and reference use identical math.
    return 1.0 / (1.0 + jnp.exp(-x))


def lstm_model_kernel(wbig_ref, g0b_ref, b1_ref, fcw_ref, fcb_ref,
                      out_ref, h1_buf, *, num_steps, hidden_pad):
    hp = hidden_pad
    f32 = jnp.float32

    def gates_to_hc(gates, c):
        # PyTorch nn.LSTMCell gate order (i, f, g, o); each gate is one
        # vreg-aligned 128-lane block.
        i = _sigmoid(gates[:, 0 * hp:1 * hp])
        f = _sigmoid(gates[:, 1 * hp:2 * hp])
        g = jnp.tanh(gates[:, 2 * hp:3 * hp])
        o = _sigmoid(gates[:, 3 * hp:4 * hp])
        c_new = f * c + i * g
        h_new = o * jnp.tanh(c_new)
        return h_new, c_new

    def step(carry):
        g0_rec, c0, h1, c1 = carry
        # cell 0: its input path is a constant folded into g0b; only the carried
        # recurrent gate contribution (from last step's fused matmul) remains.
        h0, c0 = gates_to_hc(g0_rec + g0b_ref[...], c0)
        # ONE fused matmul: h0 occupies lanes [0,H), h1 lanes [H,2H) -> VPU add.
        z = h0 + h1
        # TODO(synk): keep wbig resident in MXU staging registers via
        # pltpu.matmul_push_rhs / matmul_acc_lhs (per-generation staging
        # capacity dependent) instead of re-streaming it every step.
        big = jnp.dot(z, wbig_ref[...], preferred_element_type=f32)
        g0_rec_next = big[:, :4 * hp]                       # cell-0 gates @ t+1
        h1, c1 = gates_to_hc(big[:, 4 * hp:] + b1_ref[...], c1)  # cell-1 @ t
        return (g0_rec_next, c0, h1, c1), h1

    def run_steps(carry, n):                                # n is static
        rows = []
        for _ in range(n):
            carry, h1 = step(carry)
            rows.append(h1)
        return carry, rows

    def store_rows(rows, start):
        tile = rows[0] if len(rows) == 1 else jnp.concatenate(rows, axis=0)
        h1_buf[pl.ds(start, len(rows)), :] = tile

    BLK = 8                 # sublane-aligned writeback granularity
    FULL_UNROLL_MAX = 64    # straight-line code up to this many steps
    ITER_STEPS = 16         # steps per fori_loop back edge beyond that

    zeros_h = jnp.zeros((1, hp), f32)
    carry = (jnp.zeros((1, 4 * hp), f32), zeros_h, zeros_h, zeros_h)

    t = 0
    if num_steps > FULL_UNROLL_MAX:
        n_iters = num_steps // ITER_STEPS

        def body(it, carry):
            for b in range(ITER_STEPS // BLK):
                carry, rows = run_steps(carry, BLK)
                start = pl.multiple_of(it * ITER_STEPS + b * BLK, BLK)
                store_rows(rows, start)
            return carry

        carry = lax.fori_loop(0, n_iters, body, carry)
        t = n_iters * ITER_STEPS

    while t < num_steps:                                    # static tail / small T
        n = min(BLK, num_steps - t)
        carry, rows = run_steps(carry, n)
        store_rows(rows, t)
        t += n

    # Rows >= num_steps of h1_buf are intentionally left uninitialized: rows are
    # independent in the fc matmul and the wrapper slices the pad rows off.
    act = jnp.maximum(h1_buf[...], 0.0)
    out_ref[...] = (jnp.dot(act, fcw_ref[...], preferred_element_type=f32)
                    + fcb_ref[...])


def _place_gate_matrix(w_t, h, hp, row_off, lane_off, n_rows):
    """(in_dim, 4*h) with gate g at cols [g*h,(g+1)*h)  ->  (n_rows, 4*hp) with
    gate g's live block at rows [row_off, row_off+in_dim) and lanes
    [g*hp+lane_off, g*hp+lane_off+h); everything else zero."""
    in_dim = w_t.shape[0]
    w4 = jnp.asarray(w_t, jnp.float32).reshape(in_dim, 4, h)
    out = jnp.zeros((n_rows, 4, hp), jnp.float32)
    out = out.at[row_off:row_off + in_dim, :, lane_off:lane_off + h].set(w4)
    return out.reshape(n_rows, 4 * hp)


def _place_gate_vector(b, h, hp, lane_off):
    b4 = jnp.asarray(b, jnp.float32).reshape(1, 4, h)
    out = jnp.zeros((1, 4, hp), jnp.float32)
    out = out.at[:, :, lane_off:lane_off + h].set(b4)
    return out.reshape(1, 4 * hp)


def lstm_model_forward(batch, params):
    """batch: [T, 1, input_dim]  ->  [T, output_dim]  (autonomous mode)."""
    T, _, input_dim = batch.shape
    assert input_dim == 1, "fused kernel exploits the input_dim == 1 degeneracy"
    # TODO(synk): general input_dim > 1 path (non-degenerate LayerNorm + shifted
    # autonomous feedback window) is not implemented in this fused kernel.

    (gamma, beta,
     w_ih0, w_hh0, b_ih0, b_hh0,
     w_ih1, w_hh1, b_ih1, b_hh1,
     fc_w, fc_b) = [jnp.asarray(p, jnp.float32) for p in params]
    del gamma  # multiplied by an exactly-zero normalized value; has no effect.

    H = w_hh0.shape[1]
    output_dim = fc_w.shape[0]
    HP = 128                                   # one vreg of lanes
    assert 2 * H <= HP, "lane-packed fused matmul needs 2*hidden_size <= 128"
    # TODO(synk): hidden_size > 64 needs the K = 2*HP concat packing instead.
    OUTP = 128 * ((output_dim + 127) // 128)   # lane-dense output slab
    T_pad = 8 * ((T + 7) // 8)

    # LayerNorm over a single feature is identically beta -> the cell-0 input
    # contribution is a constant folded into its gate bias; the per-step input
    # read, LayerNorm and prediction feedback all disappear from the kernel.
    xn_const = beta.reshape(1, input_dim)
    g0_bias = xn_const @ w_ih0.T + (b_ih0 + b_hh0).reshape(1, 4 * H)

    # Fused block weight matrix (HP, 8*HP):
    #   columns [0, 4*HP):    cell-0 gates (live lanes at offset 0 per gate)
    #   columns [4*HP, 8*HP): cell-1 gates (live lanes at offset H per gate)
    #   rows [0, H) multiply h0 ; rows [H, 2H) multiply h1 ; rest zero.
    w_cell0 = _place_gate_matrix(w_hh0.T, H, HP, row_off=0, lane_off=0, n_rows=HP)
    w_cell1 = (_place_gate_matrix(w_ih1.T, H, HP, row_off=0, lane_off=H, n_rows=HP)
               + _place_gate_matrix(w_hh1.T, H, HP, row_off=H, lane_off=H, n_rows=HP))
    w_big = jnp.concatenate([w_cell0, w_cell1], axis=1)            # (HP, 8*HP)

    g0b = _place_gate_vector(g0_bias, H, HP, lane_off=0)            # (1, 4*HP)
    b1p = _place_gate_vector((b_ih1 + b_hh1).reshape(1, 4 * H), H, HP, lane_off=H)

    # fc consumes h1, whose live lanes sit at [H, 2H).
    fcw_p = jnp.zeros((HP, OUTP), jnp.float32).at[H:2 * H, :output_dim].set(fc_w.T)
    fcb_p = jnp.zeros((1, OUTP), jnp.float32).at[:, :output_dim].set(
        fc_b.reshape(1, output_dim))

    vmem = pl.BlockSpec(memory_space=pltpu.MemorySpace.VMEM)

    # ~0.6 MiB of weights + ~1 KiB per time step (h1 buffer + output slab).
    # Only raise the scoped VMEM limit for very long autonomous horizons
    # (relevant on v7x's 64 MiB VMEM); irrelevant at small T.
    resident_bytes = 4 * (w_big.size + g0b.size + b1p.size + fcw_p.size
                          + fcb_p.size + T_pad * HP + T_pad * OUTP)
    compiler_params = None
    if resident_bytes > 24 * 1024 * 1024:
        compiler_params = pltpu.CompilerParams(
            vmem_limit_bytes=min(resident_bytes + (8 << 20), 60 << 20))

    out = pl.pallas_call(
        functools.partial(lstm_model_kernel, num_steps=T, hidden_pad=HP),
        out_shape=jax.ShapeDtypeStruct((T_pad, OUTP), jnp.float32),
        in_specs=[vmem] * 5,
        out_specs=vmem,
        scratch_shapes=[pltpu.VMEM((T_pad, HP), jnp.float32)],
        compiler_params=compiler_params,
    )(w_big, g0b, b1p, fcw_p, fcb_p)
    return out[:T, :output_dim]                # [T, output_dim] == [T, 1]


def reference_forward(batch, params):
    """Pure-JAX mirror of the PyTorch forward (autonomous mode), un-specialized."""
    T, _, input_dim = batch.shape
    x = batch.reshape(T, input_dim).astype(jnp.float32)
    (gamma, beta,
     w_ih0, w_hh0, b_ih0, b_hh0,
     w_ih1, w_hh1, b_ih1, b_hh1,
     fc_w, fc_b) = [jnp.asarray(p, jnp.float32) for p in params]
    H = w_hh0.shape[1]
    eps = 1e-5
    hi = lax.Precision.HIGHEST

    def mm(a, b):
        return jnp.dot(a, b, precision=hi)

    def cell(xx, h, c, w_ih, w_hh, bi, bh):
        g = mm(xx, w_ih.T) + bi + mm(h, w_hh.T) + bh
        i, f, gg, o = (_sigmoid(g[:, :H]), _sigmoid(g[:, H:2 * H]),
                       jnp.tanh(g[:, 2 * H:3 * H]), _sigmoid(g[:, 3 * H:]))
        c_new = f * c + i * gg
        return o * jnp.tanh(c_new), c_new

    h0 = c0 = h1 = c1 = jnp.zeros((1, H), jnp.float32)
    prior = None
    outs = []
    for t in range(T):
        inp = x[t:t + 1] if prior is None else prior
        mu = jnp.mean(inp, axis=-1, keepdims=True)
        var = jnp.mean((inp - mu) ** 2, axis=-1, keepdims=True)
        xn = (inp - mu) / jnp.sqrt(var + eps) * gamma + beta
        h0, c0 = cell(xn, h0, c0, w_ih0, w_hh0, b_ih0, b_hh0)
        h1, c1 = cell(h0, h1, c1, w_ih1, w_hh1, b_ih1, b_hh1)
        pred = mm(jnp.maximum(h1, 0.0), fc_w.T) + fc_b
        outs.append(pred)
        prior = pred
    return jnp.concatenate(outs, axis=0)       # [T, output_dim]


def init_params(key, input_dim, hidden_size, output_dim):
    """PyTorch-shaped params. LayerNorm beta/gamma are randomized (instead of
    the 0/1 torch defaults) purely so the folded beta @ W_ih0 path is exercised
    by the correctness check; kernel and reference consume the same values."""
    ks = jax.random.split(key, 12)
    s = 1.0 / jnp.sqrt(hidden_size)

    def u(k, shape, scale=None):
        sc = s if scale is None else scale
        return jax.random.uniform(k, shape, jnp.float32, -sc, sc)

    gamma = 1.0 + u(ks[11], (input_dim,), 0.1)
    beta = u(ks[10], (input_dim,), 0.5)
    w_ih0 = u(ks[0], (4 * hidden_size, input_dim))
    w_hh0 = u(ks[1], (4 * hidden_size, hidden_size))
    b_ih0 = u(ks[2], (4 * hidden_size,))
    b_hh0 = u(ks[3], (4 * hidden_size,))
    w_ih1 = u(ks[4], (4 * hidden_size, hidden_size))
    w_hh1 = u(ks[5], (4 * hidden_size, hidden_size))
    b_ih1 = u(ks[6], (4 * hidden_size,))
    b_hh1 = u(ks[7], (4 * hidden_size,))
    fc_w = u(ks[8], (output_dim, hidden_size))
    fc_b = u(ks[9], (output_dim,))
    return (gamma, beta,
            w_ih0, w_hh0, b_ih0, b_hh0,
            w_ih1, w_hh1, b_ih1, b_hh1,
            fc_w, fc_b)


if __name__ == "__main__":
    T, input_dim, hidden_size, output_dim = 8, 1, 32, 1
    key = jax.random.PRNGKey(0)
    k_in, k_par = jax.random.split(key)

    batch = jax.random.normal(k_in, (T, 1, input_dim), jnp.float32)
    params = init_params(k_par, input_dim, hidden_size, output_dim)

    out = lstm_model_forward(batch, params)
    out = jax.block_until_ready(out)

    ref = reference_forward(batch, params)
    assert out.shape == (T, output_dim), out.shape
    assert bool(jnp.allclose(out, ref, atol=2e-4, rtol=2e-4)), (out, ref)
    print("KERNEL_OK")
</pallas_src>

<mosaic_0001>
module attributes {stable_mosaic.version = 11 : i64} {
  func.func @lstm_model_kernel(%arg0: memref<128x1024xf32, #tpu.memory_space<vmem>>, %arg1: memref<1x512xf32, #tpu.memory_space<vmem>>, %arg2: memref<1x512xf32, #tpu.memory_space<vmem>>, %arg3: memref<128x128xf32, #tpu.memory_space<vmem>>, %arg4: memref<1x128xf32, #tpu.memory_space<vmem>>, %arg5: memref<8x128xf32, #tpu.memory_space<vmem>>, %arg6: memref<8x128xf32, #tpu.memory_space<vmem>>) attributes {dimension_semantics = [], scalar_prefetch = 0 : i64, scratch_operands = 1 : i64, tpu.core_type = #tpu.core_type<tc>} {
    %cst = arith.constant 0.000000e+00 : f32
    %0 = vector.broadcast %cst : f32 to vector<1x128xf32>
    %cst_0 = arith.constant 0.000000e+00 : f32
    %1 = vector.broadcast %cst_0 : f32 to vector<1x512xf32>
    %c0 = arith.constant 0 : index
    %c0_1 = arith.constant 0 : index
    %2 = vector.load %arg1[%c0, %c0_1] : memref<1x512xf32, #tpu.memory_space<vmem>>, vector<1x512xf32>
    %3 = arith.addf %1, %2 : vector<1x512xf32>
    %4 = vector.extract_strided_slice %3 {offsets = [0, 0], sizes = [1, 128], strides = [1, 1]} : vector<1x512xf32> to vector<1x128xf32>
    %cst_2 = arith.constant 0.000000e+00 : f32
    %5 = vector.broadcast %cst_2 : f32 to vector<1x128xf32>
    %6 = arith.subf %5, %4 : vector<1x128xf32>
    %7 = math.exp %6 : vector<1x128xf32>
    %cst_3 = arith.constant 1.000000e+00 : f32
    %8 = vector.broadcast %cst_3 : f32 to vector<1x128xf32>
    %9 = arith.addf %8, %7 : vector<1x128xf32>
    %cst_4 = arith.constant 1.000000e+00 : f32
    %10 = vector.broadcast %cst_4 : f32 to vector<1x128xf32>
    %11 = arith.divf %10, %9 : vector<1x128xf32>
    %12 = vector.extract_strided_slice %3 {offsets = [0, 128], sizes = [1, 128], strides = [1, 1]} : vector<1x512xf32> to vector<1x128xf32>
    %cst_5 = arith.constant 0.000000e+00 : f32
    %13 = vector.broadcast %cst_5 : f32 to vector<1x128xf32>
    %14 = arith.subf %13, %12 : vector<1x128xf32>
    %15 = math.exp %14 : vector<1x128xf32>
    %cst_6 = arith.constant 1.000000e+00 : f32
    %16 = vector.broadcast %cst_6 : f32 to vector<1x128xf32>
    %17 = arith.addf %16, %15 : vector<1x128xf32>
    %cst_7 = arith.constant 1.000000e+00 : f32
    %18 = vector.broadcast %cst_7 : f32 to vector<1x128xf32>
    %19 = arith.divf %18, %17 : vector<1x128xf32>
    %20 = vector.extract_strided_slice %3 {offsets = [0, 256], sizes = [1, 128], strides = [1, 1]} : vector<1x512xf32> to vector<1x128xf32>
    %21 = math.tanh %20 : vector<1x128xf32>
    %22 = vector.extract_strided_slice %3 {offsets = [0, 384], sizes = [1, 128], strides = [1, 1]} : vector<1x512xf32> to vector<1x128xf32>
    %cst_8 = arith.constant 0.000000e+00 : f32
    %23 = vector.broadcast %cst_8 : f32 to vector<1x128xf32>
    %24 = arith.subf %23, %22 : vector<1x128xf32>
    %25 = math.exp %24 : vector<1x128xf32>
    %cst_9 = arith.constant 1.000000e+00 : f32
    %26 = vector.broadcast %cst_9 : f32 to vector<1x128xf32>
    %27 = arith.addf %26, %25 : vector<1x128xf32>
    %cst_10 = arith.constant 1.000000e+00 : f32
    %28 = vector.broadcast %cst_10 : f32 to vector<1x128xf32>
    %29 = arith.divf %28, %27 : vector<1x128xf32>
    %30 = arith.mulf %19, %0 : vector<1x128xf32>
    %31 = arith.mulf %11, %21 : vector<1x128xf32>
    %32 = arith.addf %30, %31 : vector<1x128xf32>
    %33 = math.tanh %32 : vector<1x128xf32>
    %34 = arith.mulf %29, %33 : vector<1x128xf32>
    %35 = arith.addf %34, %0 : vector<1x128xf32>
    %c0_11 = arith.constant 0 : index
    %c0_12 = arith.constant 0 : index
    %36 = vector.load %arg0[%c0_11, %c0_12] : memref<128x1024xf32, #tpu.memory_space<vmem>>, vector<128x1024xf32>
    %cst_13 = arith.constant dense<0.000000e+00> : vector<1x1024xf32>
    %37 = tpu.matmul %35, %36, %cst_13 {dimension_numbers = #tpu.dot_dimension_numbers<[1], [0], [0], [1], [0, 0, 1, 1], [], []>} : vector<1x128xf32>, vector<128x1024xf32>, vector<1x1024xf32> -> vector<1x1024xf32>
    %38 = vector.extract_strided_slice %37 {offsets = [0, 0], sizes = [1, 512], strides = [1, 1]} : vector<1x1024xf32> to vector<1x512xf32>
    %39 = vector.extract_strided_slice %37 {offsets = [0, 512], sizes = [1, 512], strides = [1, 1]} : vector<1x1024xf32> to vector<1x512xf32>
    %c0_14 = arith.constant 0 : index
    %c0_15 = arith.constant 0 : index
    %40 = vector.load %arg2[%c0_14, %c0_15] : memref<1x512xf32, #tpu.memory_space<vmem>>, vector<1x512xf32>
    %41 = arith.addf %39, %40 : vector<1x512xf32>
    %42 = vector.extract_strided_slice %41 {offsets = [0, 0], sizes = [1, 128], strides = [1, 1]} : vector<1x512xf32> to vector<1x128xf32>
    %cst_16 = arith.constant 0.000000e+00 : f32
    %43 = vector.broadcast %cst_16 : f32 to vector<1x128xf32>
    %44 = arith.subf %43, %42 : vector<1x128xf32>
    %45 = math.exp %44 : vector<1x128xf32>
    %cst_17 = arith.constant 1.000000e+00 : f32
    %46 = vector.broadcast %cst_17 : f32 to vector<1x128xf32>
    %47 = arith.addf %46, %45 : vector<1x128xf32>
    %cst_18 = arith.constant 1.000000e+00 : f32
    %48 = vector.broadcast %cst_18 : f32 to vector<1x128xf32>
    %49 = arith.divf %48, %47 : vector<1x128xf32>
    %50 = vector.extract_strided_slice %41 {offsets = [0, 128], sizes = [1, 128], strides = [1, 1]} : vector<1x512xf32> to vector<1x128xf32>
    %cst_19 = arith.constant 0.000000e+00 : f32
    %51 = vector.broadcast %cst_19 : f32 to vector<1x128xf32>
    %52 = arith.subf %51, %50 : vector<1x128xf32>
    %53 = math.exp %52 : vector<1x128xf32>
    %cst_20 = arith.constant 1.000000e+00 : f32
    %54 = vector.broadcast %cst_20 : f32 to vector<1x128xf32>
    %55 = arith.addf %54, %53 : vector<1x128xf32>
    %cst_21 = arith.constant 1.000000e+00 : f32
    %56 = vector.broadcast %cst_21 : f32 to vector<1x128xf32>
    %57 = arith.divf %56, %55 : vector<1x128xf32>
    %58 = vector.extract_strided_slice %41 {offsets = [0, 256], sizes = [1, 128], strides = [1, 1]} : vector<1x512xf32> to vector<1x128xf32>
    %59 = math.tanh %58 : vector<1x128xf32>
    %60 = vector.extract_strided_slice %41 {offsets = [0, 384], sizes = [1, 128], strides = [1, 1]} : vector<1x512xf32> to vector<1x128xf32>
    %cst_22 = arith.constant 0.000000e+00 : f32
    %61 = vector.broadcast %cst_22 : f32 to vector<1x128xf32>
    %62 = arith.subf %61, %60 : vector<1x128xf32>
    %63 = math.exp %62 : vector<1x128xf32>
    %cst_23 = arith.constant 1.000000e+00 : f32
    %64 = vector.broadcast %cst_23 : f32 to vector<1x128xf32>
    %65 = arith.addf %64, %63 : vector<1x128xf32>
    %cst_24 = arith.constant 1.000000e+00 : f32
    %66 = vector.broadcast %cst_24 : f32 to vector<1x128xf32>
    %67 = arith.divf %66, %65 : vector<1x128xf32>
    %68 = arith.mulf %57, %0 : vector<1x128xf32>
    %69 = arith.mulf %49, %59 : vector<1x128xf32>
    %70 = arith.addf %68, %69 : vector<1x128xf32>
    %71 = math.tanh %70 : vector<1x128xf32>
    %72 = arith.mulf %67, %71 : vector<1x128xf32>
    %c0_25 = arith.constant 0 : index
    %c0_26 = arith.constant 0 : index
    %73 = vector.load %arg1[%c0_25, %c0_26] : memref<1x512xf32, #tpu.memory_space<vmem>>, vector<1x512xf32>
    %74 = arith.addf %38, %73 : vector<1x512xf32>
    %75 = vector.extract_strided_slice %74 {offsets = [0, 0], sizes = [1, 128], strides = [1, 1]} : vector<1x512xf32> to vector<1x128xf32>
    %cst_27 = arith.constant 0.000000e+00 : f32
    %76 = vector.broadcast %cst_27 : f32 to vector<1x128xf32>
    %77 = arith.subf %76, %75 : vector<1x128xf32>
    %78 = math.exp %77 : vector<1x128xf32>
    %cst_28 = arith.constant 1.000000e+00 : f32
    %79 = vector.broadcast %cst_28 : f32 to vector<1x128xf32>
    %80 = arith.addf %79, %78 : vector<1x128xf32>
    %cst_29 = arith.constant 1.000000e+00 : f32
    %81 = vector.broadcast %cst_29 : f32 to vector<1x128xf32>
    %82 = arith.divf %81, %80 : vector<1x128xf32>
    %83 = vector.extract_strided_slice %74 {offsets = [0, 128], sizes = [1, 128], strides = [1, 1]} : vector<1x512xf32> to vector<1x128xf32>
    %cst_30 = arith.constant 0.000000e+00 : f32
    %84 = vector.broadcast %cst_30 : f32 to vector<1x128xf32>
    %85 = arith.subf %84, %83 : vector<1x128xf32>
    %86 = math.exp %85 : vector<1x128xf32>
    %cst_31 = arith.constant 1.000000e+00 : f32
    %87 = vector.broadcast %cst_31 : f32 to vector<1x128xf32>
    %88 = arith.addf %87, %86 : vector<1x128xf32>
    %cst_32 = arith.constant 1.000000e+00 : f32
    %89 = vector.broadcast %cst_32 : f32 to vector<1x128xf32>
    %90 = arith.divf %89, %88 : vector<1x128xf32>
    %91 = vector.extract_strided_slice %74 {offsets = [0, 256], sizes = [1, 128], strides = [1, 1]} : vector<1x512xf32> to vector<1x128xf32>
    %92 = math.tanh %91 : vector<1x128xf32>
    %93 = vector.extract_strided_slice %74 {offsets = [0, 384], sizes = [1, 128], strides = [1, 1]} : vector<1x512xf32> to vector<1x128xf32>
    %cst_33 = arith.constant 0.000000e+00 : f32
    %94 = vector.broadcast %cst_33 : f32 to vector<1x128xf32>
    %95 = arith.subf %94, %93 : vector<1x128xf32>
    %96 = math.exp %95 : vector<1x128xf32>
    %cst_34 = arith.constant 1.000000e+00 : f32
    %97 = vector.broadcast %cst_34 : f32 to vector<1x128xf32>
    %98 = arith.addf %97, %96 : vector<1x128xf32>
    %cst_35 = arith.constant 1.000000e+00 : f32
    %99 = vector.broadcast %cst_35 : f32 to vector<1x128xf32>
    %100 = arith.divf %99, %98 : vector<1x128xf32>
    %101 = arith.mulf %90, %32 : vector<1x128xf32>
    %102 = arith.mulf %82, %92 : vector<1x128xf32>
    %103 = arith.addf %101, %102 : vector<1x128xf32>
    %104 = math.tanh %103 : vector<1x128xf32>
    %105 = arith.mulf %100, %104 : vector<1x128xf32>
    %106 = arith.addf %105, %72 : vector<1x128xf32>
    %c0_36 = arith.constant 0 : index
    %c0_37 = arith.constant 0 : index
    %107 = vector.load %arg0[%c0_36, %c0_37] : memref<128x1024xf32, #tpu.memory_space<vmem>>, vector<128x1024xf32>
    %cst_38 = arith.constant dense<0.000000e+00> : vector<1x1024xf32>
    %108 = tpu.matmul %106, %107, %cst_38 {dimension_numbers = #tpu.dot_dimension_numbers<[1], [0], [0], [1], [0, 0, 1, 1], [], []>} : vector<1x128xf32>, vector<128x1024xf32>, vector<1x1024xf32> -> vector<1x1024xf32>
    %109 = vector.extract_strided_slice %108 {offsets = [0, 0], sizes = [1, 512], strides = [1, 1]} : vector<1x1024xf32> to vector<1x512xf32>
    %110 = vector.extract_strided_slice %108 {offsets = [0, 512], sizes = [1, 512], strides = [1, 1]} : vector<1x1024xf32> to vector<1x512xf32>
    %c0_39 = arith.constant 0 : index
    %c0_40 = arith.constant 0 : index
    %111 = vector.load %arg2[%c0_39, %c0_40] : memref<1x512xf32, #tpu.memory_space<vmem>>, vector<1x512xf32>
    %112 = arith.addf %110, %111 : vector<1x512xf32>
    %113 = vector.extract_strided_slice %112 {offsets = [0, 0], sizes = [1, 128], strides = [1, 1]} : vector<1x512xf32> to vector<1x128xf32>
    %cst_41 = arith.constant 0.000000e+00 : f32
    %114 = vector.broadcast %cst_41 : f32 to vector<1x128xf32>
    %115 = arith.subf %114, %113 : vector<1x128xf32>
    %116 = math.exp %115 : vector<1x128xf32>
    %cst_42 = arith.constant 1.000000e+00 : f32
    %117 = vector.broadcast %cst_42 : f32 to vector<1x128xf32>
    %118 = arith.addf %117, %116 : vector<1x128xf32>
    %cst_43 = arith.constant 1.000000e+00 : f32
    %119 = vector.broadcast %cst_43 : f32 to vector<1x128xf32>
    %120 = arith.divf %119, %118 : vector<1x128xf32>
    %121 = vector.extract_strided_slice %112 {offsets = [0, 128], sizes = [1, 128], strides = [1, 1]} : vector<1x512xf32> to vector<1x128xf32>
    %cst_44 = arith.constant 0.000000e+00 : f32
    %122 = vector.broadcast %cst_44 : f32 to vector<1x128xf32>
    %123 = arith.subf %122, %121 : vector<1x128xf32>
    %124 = math.exp %123 : vector<1x128xf32>
    %cst_45 = arith.constant 1.000000e+00 : f32
    %125 = vector.broadcast %cst_45 : f32 to vector<1x128xf32>
    %126 = arith.addf %125, %124 : vector<1x128xf32>
    %cst_46 = arith.constant 1.000000e+00 : f32
    %127 = vector.broadcast %cst_46 : f32 to vector<1x128xf32>
    %128 = arith.divf %127, %126 : vector<1x128xf32>
    %129 = vector.extract_strided_slice %112 {offsets = [0, 256], sizes = [1, 128], strides = [1, 1]} : vector<1x512xf32> to vector<1x128xf32>
    %130 = math.tanh %129 : vector<1x128xf32>
    %131 = vector.extract_strided_slice %112 {offsets = [0, 384], sizes = [1, 128], strides = [1, 1]} : vector<1x512xf32> to vector<1x128xf32>
    %cst_47 = arith.constant 0.000000e+00 : f32
    %132 = vector.broadcast %cst_47 : f32 to vector<1x128xf32>
    %133 = arith.subf %132, %131 : vector<1x128xf32>
    %134 = math.exp %133 : vector<1x128xf32>
    %cst_48 = arith.constant 1.000000e+00 : f32
    %135 = vector.broadcast %cst_48 : f32 to vector<1x128xf32>
    %136 = arith.addf %135, %134 : vector<1x128xf32>
    %cst_49 = arith.constant 1.000000e+00 : f32
    %137 = vector.broadcast %cst_49 : f32 to vector<1x128xf32>
    %138 = arith.divf %137, %136 : vector<1x128xf32>
    %139 = arith.mulf %128, %70 : vector<1x128xf32>
    %140 = arith.mulf %120, %130 : vector<1x128xf32>
    %141 = arith.addf %139, %140 : vector<1x128xf32>
    %142 = math.tanh %141 : vector<1x128xf32>
    %143 = arith.mulf %138, %142 : vector<1x128xf32>
    %c0_50 = arith.constant 0 : index
    %c0_51 = arith.constant 0 : index
    %144 = vector.load %arg1[%c0_50, %c0_51] : memref<1x512xf32, #tpu.memory_space<vmem>>, vector<1x512xf32>
    %145 = arith.addf %109, %144 : vector<1x512xf32>
    %146 = vector.extract_strided_slice %145 {offsets = [0, 0], sizes = [1, 128], strides = [1, 1]} : vector<1x512xf32> to vector<1x128xf32>
    %cst_52 = arith.constant 0.000000e+00 : f32
    %147 = vector.broadcast %cst_52 : f32 to vector<1x128xf32>
    %148 = arith.subf %147, %146 : vector<1x128xf32>
    %149 = math.exp %148 : vector<1x128xf32>
    %cst_53 = arith.constant 1.000000e+00 : f32
    %150 = vector.broadcast %cst_53 : f32 to vector<1x128xf32>
    %151 = arith.addf %150, %149 : vector<1x128xf32>
    %cst_54 = arith.constant 1.000000e+00 : f32
    %152 = vector.broadcast %cst_54 : f32 to vector<1x128xf32>
    %153 = arith.divf %152, %151 : vector<1x128xf32>
    %154 = vector.extract_strided_slice %145 {offsets = [0, 128], sizes = [1, 128], strides = [1, 1]} : vector<1x512xf32> to vector<1x128xf32>
    %cst_55 = arith.constant 0.000000e+00 : f32
    %155 = vector.broadcast %cst_55 : f32 to vector<1x128xf32>
    %156 = arith.subf %155, %154 : vector<1x128xf32>
    %157 = math.exp %156 : vector<1x128xf32>
    %cst_56 = arith.constant 1.000000e+00 : f32
    %158 = vector.broadcast %cst_56 : f32 to vector<1x128xf32>
    %159 = arith.addf %158, %157 : vector<1x128xf32>
    %cst_57 = arith.constant 1.000000e+00 : f32
    %160 = vector.broadcast %cst_57 : f32 to vector<1x128xf32>
    %161 = arith.divf %160, %159 : vector<1x128xf32>
    %162 = vector.extract_strided_slice %145 {offsets = [0, 256], sizes = [1, 128], strides = [1, 1]} : vector<1x512xf32> to vector<1x128xf32>
    %163 = math.tanh %162 : vector<1x128xf32>
    %164 = vector.extract_strided_slice %145 {offsets = [0, 384], sizes = [1, 128], strides = [1, 1]} : vector<1x512xf32> to vector<1x128xf32>
    %cst_58 = arith.constant 0.000000e+00 : f32
    %165 = vector.broadcast %cst_58 : f32 to vector<1x128xf32>
    %166 = arith.subf %165, %164 : vector<1x128xf32>
    %167 = math.exp %166 : vector<1x128xf32>
    %cst_59 = arith.constant 1.000000e+00 : f32
    %168 = vector.broadcast %cst_59 : f32 to vector<1x128xf32>
    %169 = arith.addf %168, %167 : vector<1x128xf32>
    %cst_60 = arith.constant 1.000000e+00 : f32
    %170 = vector.broadcast %cst_60 : f32 to vector<1x128xf32>
    %171 = arith.divf %170, %169 : vector<1x128xf32>
    %172 = arith.mulf %161, %103 : vector<1x128xf32>
    %173 = arith.mulf %153, %163 : vector<1x128xf32>
    %174 = arith.addf %172, %173 : vector<1x128xf32>
    %175 = math.tanh %174 : vector<1x128xf32>
    %176 = arith.mulf %171, %175 : vector<1x128xf32>
    %177 = arith.addf %176, %143 : vector<1x128xf32>
    %c0_61 = arith.constant 0 : index
    %c0_62 = arith.constant 0 : index
    %178 = vector.load %arg0[%c0_61, %c0_62] : memref<128x1024xf32, #tpu.memory_space<vmem>>, vector<128x1024xf32>
    %cst_63 = arith.constant dense<0.000000e+00> : vector<1x1024xf32>
    %179 = tpu.matmul %177, %178, %cst_63 {dimension_numbers = #tpu.dot_dimension_numbers<[1], [0], [0], [1], [0, 0, 1, 1], [], []>} : vector<1x128xf32>, vector<128x1024xf32>, vector<1x1024xf32> -> vector<1x1024xf32>
    %180 = vector.extract_strided_slice %179 {offsets = [0, 0], sizes = [1, 512], strides = [1, 1]} : vector<1x1024xf32> to vector<1x512xf32>
    %181 = vector.extract_strided_slice %179 {offsets = [0, 512], sizes = [1, 512], strides = [1, 1]} : vector<1x1024xf32> to vector<1x512xf32>
    %c0_64 = arith.constant 0 : index
    %c0_65 = arith.constant 0 : index
    %182 = vector.load %arg2[%c0_64, %c0_65] : memref<1x512xf32, #tpu.memory_space<vmem>>, vector<1x512xf32>
    %183 = arith.addf %181, %182 : vector<1x512xf32>
    %184 = vector.extract_strided_slice %183 {offsets = [0, 0], sizes = [1, 128], strides = [1, 1]} : vector<1x512xf32> to vector<1x128xf32>
    %cst_66 = arith.constant 0.000000e+00 : f32
    %185 = vector.broadcast %cst_66 : f32 to vector<1x128xf32>
    %186 = arith.subf %185, %184 : vector<1x128xf32>
    %187 = math.exp %186 : vector<1x128xf32>
    %cst_67 = arith.constant 1.000000e+00 : f32
    %188 = vector.broadcast %cst_67 : f32 to vector<1x128xf32>
    %189 = arith.addf %188, %187 : vector<1x128xf32>
    %cst_68 = arith.constant 1.000000e+00 : f32
    %190 = vector.broadcast %cst_68 : f32 to vector<1x128xf32>
    %191 = arith.divf %190, %189 : vector<1x128xf32>
    %192 = vector.extract_strided_slice %183 {offsets = [0, 128], sizes = [1, 128], strides = [1, 1]} : vector<1x512xf32> to vector<1x128xf32>
    %cst_69 = arith.constant 0.000000e+00 : f32
    %193 = vector.broadcast %cst_69 : f32 to vector<1x128xf32>
    %194 = arith.subf %193, %192 : vector<1x128xf32>
    %195 = math.exp %194 : vector<1x128xf32>
    %cst_70 = arith.constant 1.000000e+00 : f32
    %196 = vector.broadcast %cst_70 : f32 to vector<1x128xf32>
    %197 = arith.addf %196, %195 : vector<1x128xf32>
    %cst_71 = arith.constant 1.000000e+00 : f32
    %198 = vector.broadcast %cst_71 : f32 to vector<1x128xf32>
    %199 = arith.divf %198, %197 : vector<1x128xf32>
    %200 = vector.extract_strided_slice %183 {offsets = [0, 256], sizes = [1, 128], strides = [1, 1]} : vector<1x512xf32> to vector<1x128xf32>
    %201 = math.tanh %200 : vector<1x128xf32>
    %202 = vector.extract_strided_slice %183 {offsets = [0, 384], sizes = [1, 128], strides = [1, 1]} : vector<1x512xf32> to vector<1x128xf32>
    %cst_72 = arith.constant 0.000000e+00 : f32
    %203 = vector.broadcast %cst_72 : f32 to vector<1x128xf32>
    %204 = arith.subf %203, %202 : vector<1x128xf32>
    %205 = math.exp %204 : vector<1x128xf32>
    %cst_73 = arith.constant 1.000000e+00 : f32
    %206 = vector.broadcast %cst_73 : f32 to vector<1x128xf32>
    %207 = arith.addf %206, %205 : vector<1x128xf32>
    %cst_74 = arith.constant 1.000000e+00 : f32
    %208 = vector.broadcast %cst_74 : f32 to vector<1x128xf32>
    %209 = arith.divf %208, %207 : vector<1x128xf32>
    %210 = arith.mulf %199, %141 : vector<1x128xf32>
    %211 = arith.mulf %191, %201 : vector<1x128xf32>
    %212 = arith.addf %210, %211 : vector<1x128xf32>
    %213 = math.tanh %212 : vector<1x128xf32>
    %214 = arith.mulf %209, %213 : vector<1x128xf32>
    %c0_75 = arith.constant 0 : index
    %c0_76 = arith.constant 0 : index
    %215 = vector.load %arg1[%c0_75, %c0_76] : memref<1x512xf32, #tpu.memory_space<vmem>>, vector<1x512xf32>
    %216 = arith.addf %180, %215 : vector<1x512xf32>
    %217 = vector.extract_strided_slice %216 {offsets = [0, 0], sizes = [1, 128], strides = [1, 1]} : vector<1x512xf32> to vector<1x128xf32>
    %cst_77 = arith.constant 0.000000e+00 : f32
    %218 = vector.broadcast %cst_77 : f32 to vector<1x128xf32>
    %219 = arith.subf %218, %217 : vector<1x128xf32>
    %220 = math.exp %219 : vector<1x128xf32>
    %cst_78 = arith.constant 1.000000e+00 : f32
    %221 = vector.broadcast %cst_78 : f32 to vector<1x128xf32>
    %222 = arith.addf %221, %220 : vector<1x128xf32>
    %cst_79 = arith.constant 1.000000e+00 : f32
    %223 = vector.broadcast %cst_79 : f32 to vector<1x128xf32>
    %224 = arith.divf %223, %222 : vector<1x128xf32>
    %225 = vector.extract_strided_slice %216 {offsets = [0, 128], sizes = [1, 128], strides = [1, 1]} : vector<1x512xf32> to vector<1x128xf32>
    %cst_80 = arith.constant 0.000000e+00 : f32
    %226 = vector.broadcast %cst_80 : f32 to vector<1x128xf32>
    %227 = arith.subf %226, %225 : vector<1x128xf32>
    %228 = math.exp %227 : vector<1x128xf32>
    %cst_81 = arith.constant 1.000000e+00 : f32
    %229 = vector.broadcast %cst_81 : f32 to vector<1x128xf32>
    %230 = arith.addf %229, %228 : vector<1x128xf32>
    %cst_82 = arith.constant 1.000000e+00 : f32
    %231 = vector.broadcast %cst_82 : f32 to vector<1x128xf32>
    %232 = arith.divf %231, %230 : vector<1x128xf32>
    %233 = vector.extract_strided_slice %216 {offsets = [0, 256], sizes = [1, 128], strides = [1, 1]} : vector<1x512xf32> to vector<1x128xf32>
    %234 = math.tanh %233 : vector<1x128xf32>
    %235 = vector.extract_strided_slice %216 {offsets = [0, 384], sizes = [1, 128], strides = [1, 1]} : vector<1x512xf32> to vector<1x128xf32>
    %cst_83 = arith.constant 0.000000e+00 : f32
    %236 = vector.broadcast %cst_83 : f32 to vector<1x128xf32>
    %237 = arith.subf %236, %235 : vector<1x128xf32>
    %238 = math.exp %237 : vector<1x128xf32>
    %cst_84 = arith.constant 1.000000e+00 : f32
    %239 = vector.broadcast %cst_84 : f32 to vector<1x128xf32>
    %240 = arith.addf %239, %238 : vector<1x128xf32>
    %cst_85 = arith.constant 1.000000e+00 : f32
    %241 = vector.broadcast %cst_85 : f32 to vector<1x128xf32>
    %242 = arith.divf %241, %240 : vector<1x128xf32>
    %243 = arith.mulf %232, %174 : vector<1x128xf32>
    %244 = arith.mulf %224, %234 : vector<1x128xf32>
    %245 = arith.addf %243, %244 : vector<1x128xf32>
    %246 = math.tanh %245 : vector<1x128xf32>
    %247 = arith.mulf %242, %246 : vector<1x128xf32>
    %248 = arith.addf %247, %214 : vector<1x128xf32>
    %c0_86 = arith.constant 0 : index
    %c0_87 = arith.constant 0 : index
    %249 = vector.load %arg0[%c0_86, %c0_87] : memref<128x1024xf32, #tpu.memory_space<vmem>>, vector<128x1024xf32>
    %cst_88 = arith.constant dense<0.000000e+00> : vector<1x1024xf32>
    %250 = tpu.matmul %248, %249, %cst_88 {dimension_numbers = #tpu.dot_dimension_numbers<[1], [0], [0], [1], [0, 0, 1, 1], [], []>} : vector<1x128xf32>, vector<128x1024xf32>, vector<1x1024xf32> -> vector<1x1024xf32>
    %251 = vector.extract_strided_slice %250 {offsets = [0, 0], sizes = [1, 512], strides = [1, 1]} : vector<1x1024xf32> to vector<1x512xf32>
    %252 = vector.extract_strided_slice %250 {offsets = [0, 512], sizes = [1, 512], strides = [1, 1]} : vector<1x1024xf32> to vector<1x512xf32>
    %c0_89 = arith.constant 0 : index
    %c0_90 = arith.constant 0 : index
    %253 = vector.load %arg2[%c0_89, %c0_90] : memref<1x512xf32, #tpu.memory_space<vmem>>, vector<1x512xf32>
    %254 = arith.addf %252, %253 : vector<1x512xf32>
    %255 = vector.extract_strided_slice %254 {offsets = [0, 0], sizes = [1, 128], strides = [1, 1]} : vector<1x512xf32> to vector<1x128xf32>
    %cst_91 = arith.constant 0.000000e+00 : f32
    %256 = vector.broadcast %cst_91 : f32 to vector<1x128xf32>
    %257 = arith.subf %256, %255 : vector<1x128xf32>
    %258 = math.exp %257 : vector<1x128xf32>
    %cst_92 = arith.constant 1.000000e+00 : f32
    %259 = vector.broadcast %cst_92 : f32 to vector<1x128xf32>
    %260 = arith.addf %259, %258 : vector<1x128xf32>
    %cst_93 = arith.constant 1.000000e+00 : f32
    %261 = vector.broadcast %cst_93 : f32 to vector<1x128xf32>
    %262 = arith.divf %261, %260 : vector<1x128xf32>
    %263 = vector.extract_strided_slice %254 {offsets = [0, 128], sizes = [1, 128], strides = [1, 1]} : vector<1x512xf32> to vector<1x128xf32>
    %cst_94 = arith.constant 0.000000e+00 : f32
    %264 = vector.broadcast %cst_94 : f32 to vector<1x128xf32>
    %265 = arith.subf %264, %263 : vector<1x128xf32>
    %266 = math.exp %265 : vector<1x128xf32>
    %cst_95 = arith.constant 1.000000e+00 : f32
    %267 = vector.broadcast %cst_95 : f32 to vector<1x128xf32>
    %268 = arith.addf %267, %266 : vector<1x128xf32>
    %cst_96 = arith.constant 1.000000e+00 : f32
    %269 = vector.broadcast %cst_96 : f32 to vector<1x128xf32>
    %270 = arith.divf %269, %268 : vector<1x128xf32>
    %271 = vector.extract_strided_slice %254 {offsets = [0, 256], sizes = [1, 128], strides = [1, 1]} : vector<1x512xf32> to vector<1x128xf32>
    %272 = math.tanh %271 : vector<1x128xf32>
    %273 = vector.extract_strided_slice %254 {offsets = [0, 384], sizes = [1, 128], strides = [1, 1]} : vector<1x512xf32> to vector<1x128xf32>
    %cst_97 = arith.constant 0.000000e+00 : f32
    %274 = vector.broadcast %cst_97 : f32 to vector<1x128xf32>
    %275 = arith.subf %274, %273 : vector<1x128xf32>
    %276 = math.exp %275 : vector<1x128xf32>
    %cst_98 = arith.constant 1.000000e+00 : f32
    %277 = vector.broadcast %cst_98 : f32 to vector<1x128xf32>
    %278 = arith.addf %277, %276 : vector<1x128xf32>
    %cst_99 = arith.constant 1.000000e+00 : f32
    %279 = vector.broadcast %cst_99 : f32 to vector<1x128xf32>
    %280 = arith.divf %279, %278 : vector<1x128xf32>
    %281 = arith.mulf %270, %212 : vector<1x128xf32>
    %282 = arith.mulf %262, %272 : vector<1x128xf32>
    %283 = arith.addf %281, %282 : vector<1x128xf32>
    %284 = math.tanh %283 : vector<1x128xf32>
    %285 = arith.mulf %280, %284 : vector<1x128xf32>
    %c0_100 = arith.constant 0 : index
    %c0_101 = arith.constant 0 : index
    %286 = vector.load %arg1[%c0_100, %c0_101] : memref<1x512xf32, #tpu.memory_space<vmem>>, vector<1x512xf32>
    %287 = arith.addf %251, %286 : vector<1x512xf32>
    %288 = vector.extract_strided_slice %287 {offsets = [0, 0], sizes = [1, 128], strides = [1, 1]} : vector<1x512xf32> to vector<1x128xf32>
    %cst_102 = arith.constant 0.000000e+00 : f32
    %289 = vector.broadcast %cst_102 : f32 to vector<1x128xf32>
    %290 = arith.subf %289, %288 : vector<1x128xf32>
    %291 = math.exp %290 : vector<1x128xf32>
    %cst_103 = arith.constant 1.000000e+00 : f32
    %292 = vector.broadcast %cst_103 : f32 to vector<1x128xf32>
    %293 = arith.addf %292, %291 : vector<1x128xf32>
    %cst_104 = arith.constant 1.000000e+00 : f32
    %294 = vector.broadcast %cst_104 : f32 to vector<1x128xf32>
    %295 = arith.divf %294, %293 : vector<1x128xf32>
    %296 = vector.extract_strided_slice %287 {offsets = [0, 128], sizes = [1, 128], strides = [1, 1]} : vector<1x512xf32> to vector<1x128xf32>
    %cst_105 = arith.constant 0.000000e+00 : f32
    %297 = vector.broadcast %cst_105 : f32 to vector<1x128xf32>
    %298 = arith.subf %297, %296 : vector<1x128xf32>
    %299 = math.exp %298 : vector<1x128xf32>
    %cst_106 = arith.constant 1.000000e+00 : f32
    %300 = vector.broadcast %cst_106 : f32 to vector<1x128xf32>
    %301 = arith.addf %300, %299 : vector<1x128xf32>
    %cst_107 = arith.constant 1.000000e+00 : f32
    %302 = vector.broadcast %cst_107 : f32 to vector<1x128xf32>
    %303 = arith.divf %302, %301 : vector<1x128xf32>
    %304 = vector.extract_strided_slice %287 {offsets = [0, 256], sizes = [1, 128], strides = [1, 1]} : vector<1x512xf32> to vector<1x128xf32>
    %305 = math.tanh %304 : vector<1x128xf32>
    %306 = vector.extract_strided_slice %287 {offsets = [0, 384], sizes = [1, 128], strides = [1, 1]} : vector<1x512xf32> to vector<1x128xf32>
    %cst_108 = arith.constant 0.000000e+00 : f32
    %307 = vector.broadcast %cst_108 : f32 to vector<1x128xf32>
    %308 = arith.subf %307, %306 : vector<1x128xf32>
    %309 = math.exp %308 : vector<1x128xf32>
    %cst_109 = arith.constant 1.000000e+00 : f32
    %310 = vector.broadcast %cst_109 : f32 to vector<1x128xf32>
    %311 = arith.addf %310, %309 : vector<1x128xf32>
    %cst_110 = arith.constant 1.000000e+00 : f32
    %312 = vector.broadcast %cst_110 : f32 to vector<1x128xf32>
    %313 = arith.divf %312, %311 : vector<1x128xf32>
    %314 = arith.mulf %303, %245 : vector<1x128xf32>
    %315 = arith.mulf %295, %305 : vector<1x128xf32>
    %316 = arith.addf %314, %315 : vector<1x128xf32>
    %317 = math.tanh %316 : vector<1x128xf32>
    %318 = arith.mulf %313, %317 : vector<1x128xf32>
    %319 = arith.addf %318, %285 : vector<1x128xf32>
    %c0_111 = arith.constant 0 : index
    %c0_112 = arith.constant 0 : index
    %320 = vector.load %arg0[%c0_111, %c0_112] : memref<128x1024xf32, #tpu.memory_space<vmem>>, vector<128x1024xf32>
    %cst_113 = arith.constant dense<0.000000e+00> : vector<1x1024xf32>
    %321 = tpu.matmul %319, %320, %cst_113 {dimension_numbers = #tpu.dot_dimension_numbers<[1], [0], [0], [1], [0, 0, 1, 1], [], []>} : vector<1x128xf32>, vector<128x1024xf32>, vector<1x1024xf32> -> vector<1x1024xf32>
    %322 = vector.extract_strided_slice %321 {offsets = [0, 0], sizes = [1, 512], strides = [1, 1]} : vector<1x1024xf32> to vector<1x512xf32>
    %323 = vector.extract_strided_slice %321 {offsets = [0, 512], sizes = [1, 512], strides = [1, 1]} : vector<1x1024xf32> to vector<1x512xf32>
    %c0_114 = arith.constant 0 : index
    %c0_115 = arith.constant 0 : index
    %324 = vector.load %arg2[%c0_114, %c0_115] : memref<1x512xf32, #tpu.memory_space<vmem>>, vector<1x512xf32>
    %325 = arith.addf %323, %324 : vector<1x512xf32>
    %326 = vector.extract_strided_slice %325 {offsets = [0, 0], sizes = [1, 128], strides = [1, 1]} : vector<1x512xf32> to vector<1x128xf32>
    %cst_116 = arith.constant 0.000000e+00 : f32
    %327 = vector.broadcast %cst_116 : f32 to vector<1x128xf32>
    %328 = arith.subf %327, %326 : vector<1x128xf32>
    %329 = math.exp %328 : vector<1x128xf32>
    %cst_117 = arith.constant 1.000000e+00 : f32
    %330 = vector.broadcast %cst_117 : f32 to vector<1x128xf32>
    %331 = arith.addf %330, %329 : vector<1x128xf32>
    %cst_118 = arith.constant 1.000000e+00 : f32
    %332 = vector.broadcast %cst_118 : f32 to vector<1x128xf32>
    %333 = arith.divf %332, %331 : vector<1x128xf32>
    %334 = vector.extract_strided_slice %325 {offsets = [0, 128], sizes = [1, 128], strides = [1, 1]} : vector<1x512xf32> to vector<1x128xf32>
    %cst_119 = arith.constant 0.000000e+00 : f32
    %335 = vector.broadcast %cst_119 : f32 to vector<1x128xf32>
    %336 = arith.subf %335, %334 : vector<1x128xf32>
    %337 = math.exp %336 : vector<1x128xf32>
    %cst_120 = arith.constant 1.000000e+00 : f32
    %338 = vector.broadcast %cst_120 : f32 to vector<1x128xf32>
    %339 = arith.addf %338, %337 : vector<1x128xf32>
    %cst_121 = arith.constant 1.000000e+00 : f32
    %340 = vector.broadcast %cst_121 : f32 to vector<1x128xf32>
    %341 = arith.divf %340, %339 : vector<1x128xf32>
    %342 = vector.extract_strided_slice %325 {offsets = [0, 256], sizes = [1, 128], strides = [1, 1]} : vector<1x512xf32> to vector<1x128xf32>
    %343 = math.tanh %342 : vector<1x128xf32>
    %344 = vector.extract_strided_slice %325 {offsets = [0, 384], sizes = [1, 128], strides = [1, 1]} : vector<1x512xf32> to vector<1x128xf32>
    %cst_122 = arith.constant 0.000000e+00 : f32
    %345 = vector.broadcast %cst_122 : f32 to vector<1x128xf32>
    %346 = arith.subf %345, %344 : vector<1x128xf32>
    %347 = math.exp %346 : vector<1x128xf32>
    %cst_123 = arith.constant 1.000000e+00 : f32
    %348 = vector.broadcast %cst_123 : f32 to vector<1x128xf32>
    %349 = arith.addf %348, %347 : vector<1x128xf32>
    %cst_124 = arith.constant 1.000000e+00 : f32
    %350 = vector.broadcast %cst_124 : f32 to vector<1x128xf32>
    %351 = arith.divf %350, %349 : vector<1x128xf32>
    %352 = arith.mulf %341, %283 : vector<1x128xf32>
    %353 = arith.mulf %333, %343 : vector<1x128xf32>
    %354 = arith.addf %352, %353 : vector<1x128xf32>
    %355 = math.tanh %354 : vector<1x128xf32>
    %356 = arith.mulf %351, %355 : vector<1x128xf32>
    %c0_125 = arith.constant 0 : index
    %c0_126 = arith.constant 0 : index
    %357 = vector.load %arg1[%c0_125, %c0_126] : memref<1x512xf32, #tpu.memory_space<vmem>>, vector<1x512xf32>
    %358 = arith.addf %322, %357 : vector<1x512xf32>
    %359 = vector.extract_strided_slice %358 {offsets = [0, 0], sizes = [1, 128], strides = [1, 1]} : vector<1x512xf32> to vector<1x128xf32>
    %cst_127 = arith.constant 0.000000e+00 : f32
    %360 = vector.broadcast %cst_127 : f32 to vector<1x128xf32>
    %361 = arith.subf %360, %359 : vector<1x128xf32>
    %362 = math.exp %361 : vector<1x128xf32>
    %cst_128 = arith.constant 1.000000e+00 : f32
    %363 = vector.broadcast %cst_128 : f32 to vector<1x128xf32>
    %364 = arith.addf %363, %362 : vector<1x128xf32>
    %cst_129 = arith.constant 1.000000e+00 : f32
    %365 = vector.broadcast %cst_129 : f32 to vector<1x128xf32>
    %366 = arith.divf %365, %364 : vector<1x128xf32>
    %367 = vector.extract_strided_slice %358 {offsets = [0, 128], sizes = [1, 128], strides = [1, 1]} : vector<1x512xf32> to vector<1x128xf32>
    %cst_130 = arith.constant 0.000000e+00 : f32
    %368 = vector.broadcast %cst_130 : f32 to vector<1x128xf32>
    %369 = arith.subf %368, %367 : vector<1x128xf32>
    %370 = math.exp %369 : vector<1x128xf32>
    %cst_131 = arith.constant 1.000000e+00 : f32
    %371 = vector.broadcast %cst_131 : f32 to vector<1x128xf32>
    %372 = arith.addf %371, %370 : vector<1x128xf32>
    %cst_132 = arith.constant 1.000000e+00 : f32
    %373 = vector.broadcast %cst_132 : f32 to vector<1x128xf32>
    %374 = arith.divf %373, %372 : vector<1x128xf32>
    %375 = vector.extract_strided_slice %358 {offsets = [0, 256], sizes = [1, 128], strides = [1, 1]} : vector<1x512xf32> to vector<1x128xf32>
    %376 = math.tanh %375 : vector<1x128xf32>
    %377 = vector.extract_strided_slice %358 {offsets = [0, 384], sizes = [1, 128], strides = [1, 1]} : vector<1x512xf32> to vector<1x128xf32>
    %cst_133 = arith.constant 0.000000e+00 : f32
    %378 = vector.broadcast %cst_133 : f32 to vector<1x128xf32>
    %379 = arith.subf %378, %377 : vector<1x128xf32>
    %380 = math.exp %379 : vector<1x128xf32>
    %cst_134 = arith.constant 1.000000e+00 : f32
    %381 = vector.broadcast %cst_134 : f32 to vector<1x128xf32>
    %382 = arith.addf %381, %380 : vector<1x128xf32>
    %cst_135 = arith.constant 1.000000e+00 : f32
    %383 = vector.broadcast %cst_135 : f32 to vector<1x128xf32>
    %384 = arith.divf %383, %382 : vector<1x128xf32>
    %385 = arith.mulf %374, %316 : vector<1x128xf32>
    %386 = arith.mulf %366, %376 : vector<1x128xf32>
    %387 = arith.addf %385, %386 : vector<1x128xf32>
    %388 = math.tanh %387 : vector<1x128xf32>
    %389 = arith.mulf %384, %388 : vector<1x128xf32>
    %390 = arith.addf %389, %356 : vector<1x128xf32>
    %c0_136 = arith.constant 0 : index
    %c0_137 = arith.constant 0 : index
    %391 = vector.load %arg0[%c0_136, %c0_137] : memref<128x1024xf32, #tpu.memory_space<vmem>>, vector<128x1024xf32>
    %cst_138 = arith.constant dense<0.000000e+00> : vector<1x1024xf32>
    %392 = tpu.matmul %390, %391, %cst_138 {dimension_numbers = #tpu.dot_dimension_numbers<[1], [0], [0], [1], [0, 0, 1, 1], [], []>} : vector<1x128xf32>, vector<128x1024xf32>, vector<1x1024xf32> -> vector<1x1024xf32>
    %393 = vector.extract_strided_slice %392 {offsets = [0, 0], sizes = [1, 512], strides = [1, 1]} : vector<1x1024xf32> to vector<1x512xf32>
    %394 = vector.extract_strided_slice %392 {offsets = [0, 512], sizes = [1, 512], strides = [1, 1]} : vector<1x1024xf32> to vector<1x512xf32>
    %c0_139 = arith.constant 0 : index
    %c0_140 = arith.constant 0 : index
    %395 = vector.load %arg2[%c0_139, %c0_140] : memref<1x512xf32, #tpu.memory_space<vmem>>, vector<1x512xf32>
    %396 = arith.addf %394, %395 : vector<1x512xf32>
    %397 = vector.extract_strided_slice %396 {offsets = [0, 0], sizes = [1, 128], strides = [1, 1]} : vector<1x512xf32> to vector<1x128xf32>
    %cst_141 = arith.constant 0.000000e+00 : f32
    %398 = vector.broadcast %cst_141 : f32 to vector<1x128xf32>
    %399 = arith.subf %398, %397 : vector<1x128xf32>
    %400 = math.exp %399 : vector<1x128xf32>
    %cst_142 = arith.constant 1.000000e+00 : f32
    %401 = vector.broadcast %cst_142 : f32 to vector<1x128xf32>
    %402 = arith.addf %401, %400 : vector<1x128xf32>
    %cst_143 = arith.constant 1.000000e+00 : f32
    %403 = vector.broadcast %cst_143 : f32 to vector<1x128xf32>
    %404 = arith.divf %403, %402 : vector<1x128xf32>
    %405 = vector.extract_strided_slice %396 {offsets = [0, 128], sizes = [1, 128], strides = [1, 1]} : vector<1x512xf32> to vector<1x128xf32>
    %cst_144 = arith.constant 0.000000e+00 : f32
    %406 = vector.broadcast %cst_144 : f32 to vector<1x128xf32>
    %407 = arith.subf %406, %405 : vector<1x128xf32>
    %408 = math.exp %407 : vector<1x128xf32>
    %cst_145 = arith.constant 1.000000e+00 : f32
    %409 = vector.broadcast %cst_145 : f32 to vector<1x128xf32>
    %410 = arith.addf %409, %408 : vector<1x128xf32>
    %cst_146 = arith.constant 1.000000e+00 : f32
    %411 = vector.broadcast %cst_146 : f32 to vector<1x128xf32>
    %412 = arith.divf %411, %410 : vector<1x128xf32>
    %413 = vector.extract_strided_slice %396 {offsets = [0, 256], sizes = [1, 128], strides = [1, 1]} : vector<1x512xf32> to vector<1x128xf32>
    %414 = math.tanh %413 : vector<1x128xf32>
    %415 = vector.extract_strided_slice %396 {offsets = [0, 384], sizes = [1, 128], strides = [1, 1]} : vector<1x512xf32> to vector<1x128xf32>
    %cst_147 = arith.constant 0.000000e+00 : f32
    %416 = vector.broadcast %cst_147 : f32 to vector<1x128xf32>
    %417 = arith.subf %416, %415 : vector<1x128xf32>
    %418 = math.exp %417 : vector<1x128xf32>
    %cst_148 = arith.constant 1.000000e+00 : f32
    %419 = vector.broadcast %cst_148 : f32 to vector<1x128xf32>
    %420 = arith.addf %419, %418 : vector<1x128xf32>
    %cst_149 = arith.constant 1.000000e+00 : f32
    %421 = vector.broadcast %cst_149 : f32 to vector<1x128xf32>
    %422 = arith.divf %421, %420 : vector<1x128xf32>
    %423 = arith.mulf %412, %354 : vector<1x128xf32>
    %424 = arith.mulf %404, %414 : vector<1x128xf32>
    %425 = arith.addf %423, %424 : vector<1x128xf32>
    %426 = math.tanh %425 : vector<1x128xf32>
    %427 = arith.mulf %422, %426 : vector<1x128xf32>
    %c0_150 = arith.constant 0 : index
    %c0_151 = arith.constant 0 : index
    %428 = vector.load %arg1[%c0_150, %c0_151] : memref<1x512xf32, #tpu.memory_space<vmem>>, vector<1x512xf32>
    %429 = arith.addf %393, %428 : vector<1x512xf32>
    %430 = vector.extract_strided_slice %429 {offsets = [0, 0], sizes = [1, 128], strides = [1, 1]} : vector<1x512xf32> to vector<1x128xf32>
    %cst_152 = arith.constant 0.000000e+00 : f32
    %431 = vector.broadcast %cst_152 : f32 to vector<1x128xf32>
    %432 = arith.subf %431, %430 : vector<1x128xf32>
    %433 = math.exp %432 : vector<1x128xf32>
    %cst_153 = arith.constant 1.000000e+00 : f32
    %434 = vector.broadcast %cst_153 : f32 to vector<1x128xf32>
    %435 = arith.addf %434, %433 : vector<1x128xf32>
    %cst_154 = arith.constant 1.000000e+00 : f32
    %436 = vector.broadcast %cst_154 : f32 to vector<1x128xf32>
    %437 = arith.divf %436, %435 : vector<1x128xf32>
    %438 = vector.extract_strided_slice %429 {offsets = [0, 128], sizes = [1, 128], strides = [1, 1]} : vector<1x512xf32> to vector<1x128xf32>
    %cst_155 = arith.constant 0.000000e+00 : f32
    %439 = vector.broadcast %cst_155 : f32 to vector<1x128xf32>
    %440 = arith.subf %439, %438 : vector<1x128xf32>
    %441 = math.exp %440 : vector<1x128xf32>
    %cst_156 = arith.constant 1.000000e+00 : f32
    %442 = vector.broadcast %cst_156 : f32 to vector<1x128xf32>
    %443 = arith.addf %442, %441 : vector<1x128xf32>
    %cst_157 = arith.constant 1.000000e+00 : f32
    %444 = vector.broadcast %cst_157 : f32 to vector<1x128xf32>
    %445 = arith.divf %444, %443 : vector<1x128xf32>
    %446 = vector.extract_strided_slice %429 {offsets = [0, 256], sizes = [1, 128], strides = [1, 1]} : vector<1x512xf32> to vector<1x128xf32>
    %447 = math.tanh %446 : vector<1x128xf32>
    %448 = vector.extract_strided_slice %429 {offsets = [0, 384], sizes = [1, 128], strides = [1, 1]} : vector<1x512xf32> to vector<1x128xf32>
    %cst_158 = arith.constant 0.000000e+00 : f32
    %449 = vector.broadcast %cst_158 : f32 to vector<1x128xf32>
    %450 = arith.subf %449, %448 : vector<1x128xf32>
    %451 = math.exp %450 : vector<1x128xf32>
    %cst_159 = arith.constant 1.000000e+00 : f32
    %452 = vector.broadcast %cst_159 : f32 to vector<1x128xf32>
    %453 = arith.addf %452, %451 : vector<1x128xf32>
    %cst_160 = arith.constant 1.000000e+00 : f32
    %454 = vector.broadcast %cst_160 : f32 to vector<1x128xf32>
    %455 = arith.divf %454, %453 : vector<1x128xf32>
    %456 = arith.mulf %445, %387 : vector<1x128xf32>
    %457 = arith.mulf %437, %447 : vector<1x128xf32>
    %458 = arith.addf %456, %457 : vector<1x128xf32>
    %459 = math.tanh %458 : vector<1x128xf32>
    %460 = arith.mulf %455, %459 : vector<1x128xf32>
    %461 = arith.addf %460, %427 : vector<1x128xf32>
    %c0_161 = arith.constant 0 : index
    %c0_162 = arith.constant 0 : index
    %462 = vector.load %arg0[%c0_161, %c0_162] : memref<128x1024xf32, #tpu.memory_space<vmem>>, vector<128x1024xf32>
    %cst_163 = arith.constant dense<0.000000e+00> : vector<1x1024xf32>
    %463 = tpu.matmul %461, %462, %cst_163 {dimension_numbers = #tpu.dot_dimension_numbers<[1], [0], [0], [1], [0, 0, 1, 1], [], []>} : vector<1x128xf32>, vector<128x1024xf32>, vector<1x1024xf32> -> vector<1x1024xf32>
    %464 = vector.extract_strided_slice %463 {offsets = [0, 0], sizes = [1, 512], strides = [1, 1]} : vector<1x1024xf32> to vector<1x512xf32>
    %465 = vector.extract_strided_slice %463 {offsets = [0, 512], sizes = [1, 512], strides = [1, 1]} : vector<1x1024xf32> to vector<1x512xf32>
    %c0_164 = arith.constant 0 : index
    %c0_165 = arith.constant 0 : index
    %466 = vector.load %arg2[%c0_164, %c0_165] : memref<1x512xf32, #tpu.memory_space<vmem>>, vector<1x512xf32>
    %467 = arith.addf %465, %466 : vector<1x512xf32>
    %468 = vector.extract_strided_slice %467 {offsets = [0, 0], sizes = [1, 128], strides = [1, 1]} : vector<1x512xf32> to vector<1x128xf32>
    %cst_166 = arith.constant 0.000000e+00 : f32
    %469 = vector.broadcast %cst_166 : f32 to vector<1x128xf32>
    %470 = arith.subf %469, %468 : vector<1x128xf32>
    %471 = math.exp %470 : vector<1x128xf32>
    %cst_167 = arith.constant 1.000000e+00 : f32
    %472 = vector.broadcast %cst_167 : f32 to vector<1x128xf32>
    %473 = arith.addf %472, %471 : vector<1x128xf32>
    %cst_168 = arith.constant 1.000000e+00 : f32
    %474 = vector.broadcast %cst_168 : f32 to vector<1x128xf32>
    %475 = arith.divf %474, %473 : vector<1x128xf32>
    %476 = vector.extract_strided_slice %467 {offsets = [0, 128], sizes = [1, 128], strides = [1, 1]} : vector<1x512xf32> to vector<1x128xf32>
    %cst_169 = arith.constant 0.000000e+00 : f32
    %477 = vector.broadcast %cst_169 : f32 to vector<1x128xf32>
    %478 = arith.subf %477, %476 : vector<1x128xf32>
    %479 = math.exp %478 : vector<1x128xf32>
    %cst_170 = arith.constant 1.000000e+00 : f32
    %480 = vector.broadcast %cst_170 : f32 to vector<1x128xf32>
    %481 = arith.addf %480, %479 : vector<1x128xf32>
    %cst_171 = arith.constant 1.000000e+00 : f32
    %482 = vector.broadcast %cst_171 : f32 to vector<1x128xf32>
    %483 = arith.divf %482, %481 : vector<1x128xf32>
    %484 = vector.extract_strided_slice %467 {offsets = [0, 256], sizes = [1, 128], strides = [1, 1]} : vector<1x512xf32> to vector<1x128xf32>
    %485 = math.tanh %484 : vector<1x128xf32>
    %486 = vector.extract_strided_slice %467 {offsets = [0, 384], sizes = [1, 128], strides = [1, 1]} : vector<1x512xf32> to vector<1x128xf32>
    %cst_172 = arith.constant 0.000000e+00 : f32
    %487 = vector.broadcast %cst_172 : f32 to vector<1x128xf32>
    %488 = arith.subf %487, %486 : vector<1x128xf32>
    %489 = math.exp %488 : vector<1x128xf32>
    %cst_173 = arith.constant 1.000000e+00 : f32
    %490 = vector.broadcast %cst_173 : f32 to vector<1x128xf32>
    %491 = arith.addf %490, %489 : vector<1x128xf32>
    %cst_174 = arith.constant 1.000000e+00 : f32
    %492 = vector.broadcast %cst_174 : f32 to vector<1x128xf32>
    %493 = arith.divf %492, %491 : vector<1x128xf32>
    %494 = arith.mulf %483, %425 : vector<1x128xf32>
    %495 = arith.mulf %475, %485 : vector<1x128xf32>
    %496 = arith.addf %494, %495 : vector<1x128xf32>
    %497 = math.tanh %496 : vector<1x128xf32>
    %498 = arith.mulf %493, %497 : vector<1x128xf32>
    %c0_175 = arith.constant 0 : index
    %c0_176 = arith.constant 0 : index
    %499 = vector.load %arg1[%c0_175, %c0_176] : memref<1x512xf32, #tpu.memory_space<vmem>>, vector<1x512xf32>
    %500 = arith.addf %464, %499 : vector<1x512xf32>
    %501 = vector.extract_strided_slice %500 {offsets = [0, 0], sizes = [1, 128], strides = [1, 1]} : vector<1x512xf32> to vector<1x128xf32>
    %cst_177 = arith.constant 0.000000e+00 : f32
    %502 = vector.broadcast %cst_177 : f32 to vector<1x128xf32>
    %503 = arith.subf %502, %501 : vector<1x128xf32>
    %504 = math.exp %503 : vector<1x128xf32>
    %cst_178 = arith.constant 1.000000e+00 : f32
    %505 = vector.broadcast %cst_178 : f32 to vector<1x128xf32>
    %506 = arith.addf %505, %504 : vector<1x128xf32>
    %cst_179 = arith.constant 1.000000e+00 : f32
    %507 = vector.broadcast %cst_179 : f32 to vector<1x128xf32>
    %508 = arith.divf %507, %506 : vector<1x128xf32>
    %509 = vector.extract_strided_slice %500 {offsets = [0, 128], sizes = [1, 128], strides = [1, 1]} : vector<1x512xf32> to vector<1x128xf32>
    %cst_180 = arith.constant 0.000000e+00 : f32
    %510 = vector.broadcast %cst_180 : f32 to vector<1x128xf32>
    %511 = arith.subf %510, %509 : vector<1x128xf32>
    %512 = math.exp %511 : vector<1x128xf32>
    %cst_181 = arith.constant 1.000000e+00 : f32
    %513 = vector.broadcast %cst_181 : f32 to vector<1x128xf32>
    %514 = arith.addf %513, %512 : vector<1x128xf32>
    %cst_182 = arith.constant 1.000000e+00 : f32
    %515 = vector.broadcast %cst_182 : f32 to vector<1x128xf32>
    %516 = arith.divf %515, %514 : vector<1x128xf32>
    %517 = vector.extract_strided_slice %500 {offsets = [0, 256], sizes = [1, 128], strides = [1, 1]} : vector<1x512xf32> to vector<1x128xf32>
    %518 = math.tanh %517 : vector<1x128xf32>
    %519 = vector.extract_strided_slice %500 {offsets = [0, 384], sizes = [1, 128], strides = [1, 1]} : vector<1x512xf32> to vector<1x128xf32>
    %cst_183 = arith.constant 0.000000e+00 : f32
    %520 = vector.broadcast %cst_183 : f32 to vector<1x128xf32>
    %521 = arith.subf %520, %519 : vector<1x128xf32>
    %522 = math.exp %521 : vector<1x128xf32>
    %cst_184 = arith.constant 1.000000e+00 : f32
    %523 = vector.broadcast %cst_184 : f32 to vector<1x128xf32>
    %524 = arith.addf %523, %522 : vector<1x128xf32>
    %cst_185 = arith.constant 1.000000e+00 : f32
    %525 = vector.broadcast %cst_185 : f32 to vector<1x128xf32>
    %526 = arith.divf %525, %524 : vector<1x128xf32>
    %527 = arith.mulf %516, %458 : vector<1x128xf32>
    %528 = arith.mulf %508, %518 : vector<1x128xf32>
    %529 = arith.addf %527, %528 : vector<1x128xf32>
    %530 = math.tanh %529 : vector<1x128xf32>
    %531 = arith.mulf %526, %530 : vector<1x128xf32>
    %532 = arith.addf %531, %498 : vector<1x128xf32>
    %c0_186 = arith.constant 0 : index
    %c0_187 = arith.constant 0 : index
    %533 = vector.load %arg0[%c0_186, %c0_187] : memref<128x1024xf32, #tpu.memory_space<vmem>>, vector<128x1024xf32>
    %cst_188 = arith.constant dense<0.000000e+00> : vector<1x1024xf32>
    %534 = tpu.matmul %532, %533, %cst_188 {dimension_numbers = #tpu.dot_dimension_numbers<[1], [0], [0], [1], [0, 0, 1, 1], [], []>} : vector<1x128xf32>, vector<128x1024xf32>, vector<1x1024xf32> -> vector<1x1024xf32>
    %535 = vector.extract_strided_slice %534 {offsets = [0, 512], sizes = [1, 512], strides = [1, 1]} : vector<1x1024xf32> to vector<1x512xf32>
    %c0_189 = arith.constant 0 : index
    %c0_190 = arith.constant 0 : index
    %536 = vector.load %arg2[%c0_189, %c0_190] : memref<1x512xf32, #tpu.memory_space<vmem>>, vector<1x512xf32>
    %537 = arith.addf %535, %536 : vector<1x512xf32>
    %538 = vector.extract_strided_slice %537 {offsets = [0, 0], sizes = [1, 128], strides = [1, 1]} : vector<1x512xf32> to vector<1x128xf32>
    %cst_191 = arith.constant 0.000000e+00 : f32
    %539 = vector.broadcast %cst_191 : f32 to vector<1x128xf32>
    %540 = arith.subf %539, %538 : vector<1x128xf32>
    %541 = math.exp %540 : vector<1x128xf32>
    %cst_192 = arith.constant 1.000000e+00 : f32
    %542 = vector.broadcast %cst_192 : f32 to vector<1x128xf32>
    %543 = arith.addf %542, %541 : vector<1x128xf32>
    %cst_193 = arith.constant 1.000000e+00 : f32
    %544 = vector.broadcast %cst_193 : f32 to vector<1x128xf32>
    %545 = arith.divf %544, %543 : vector<1x128xf32>
    %546 = vector.extract_strided_slice %537 {offsets = [0, 128], sizes = [1, 128], strides = [1, 1]} : vector<1x512xf32> to vector<1x128xf32>
    %cst_194 = arith.constant 0.000000e+00 : f32
    %547 = vector.broadcast %cst_194 : f32 to vector<1x128xf32>
    %548 = arith.subf %547, %546 : vector<1x128xf32>
    %549 = math.exp %548 : vector<1x128xf32>
    %cst_195 = arith.constant 1.000000e+00 : f32
    %550 = vector.broadcast %cst_195 : f32 to vector<1x128xf32>
    %551 = arith.addf %550, %549 : vector<1x128xf32>
    %cst_196 = arith.constant 1.000000e+00 : f32
    %552 = vector.broadcast %cst_196 : f32 to vector<1x128xf32>
    %553 = arith.divf %552, %551 : vector<1x128xf32>
    %554 = vector.extract_strided_slice %537 {offsets = [0, 256], sizes = [1, 128], strides = [1, 1]} : vector<1x512xf32> to vector<1x128xf32>
    %555 = math.tanh %554 : vector<1x128xf32>
    %556 = vector.extract_strided_slice %537 {offsets = [0, 384], sizes = [1, 128], strides = [1, 1]} : vector<1x512xf32> to vector<1x128xf32>
    %cst_197 = arith.constant 0.000000e+00 : f32
    %557 = vector.broadcast %cst_197 : f32 to vector<1x128xf32>
    %558 = arith.subf %557, %556 : vector<1x128xf32>
    %559 = math.exp %558 : vector<1x128xf32>
    %cst_198 = arith.constant 1.000000e+00 : f32
    %560 = vector.broadcast %cst_198 : f32 to vector<1x128xf32>
    %561 = arith.addf %560, %559 : vector<1x128xf32>
    %cst_199 = arith.constant 1.000000e+00 : f32
    %562 = vector.broadcast %cst_199 : f32 to vector<1x128xf32>
    %563 = arith.divf %562, %561 : vector<1x128xf32>
    %564 = arith.mulf %553, %496 : vector<1x128xf32>
    %565 = arith.mulf %545, %555 : vector<1x128xf32>
    %566 = arith.addf %564, %565 : vector<1x128xf32>
    %567 = math.tanh %566 : vector<1x128xf32>
    %568 = arith.mulf %563, %567 : vector<1x128xf32>
    %569 = tpu.concatenate %72, %143, %214, %285, %356, %427, %498, %568 in 0 : vector<1x128xf32>, vector<1x128xf32>, vector<1x128xf32>, vector<1x128xf32>, vector<1x128xf32>, vector<1x128xf32>, vector<1x128xf32>, vector<1x128xf32> -> vector<8x128xf32>
    %c0_200 = arith.constant 0 : index
    %c0_201 = arith.constant 0 : index
    %570 = vector.load %arg6[%c0_200, %c0_201] : memref<8x128xf32, #tpu.memory_space<vmem>>, vector<8x128xf32>
    tpu.vector_store %arg6[%c0_200, %c0_201], %569 {strides = array<i32>} : memref<8x128xf32, #tpu.memory_space<vmem>>, vector<8x128xf32>,
    %c0_202 = arith.constant 0 : index
    %c0_203 = arith.constant 0 : index
    %571 = vector.load %arg6[%c0_202, %c0_203] : memref<8x128xf32, #tpu.memory_space<vmem>>, vector<8x128xf32>
    %cst_204 = arith.constant 0.000000e+00 : f32
    %572 = vector.broadcast %cst_204 : f32 to vector<8x128xf32>
    %573 = arith.maximumf %571, %572 : vector<8x128xf32>
    %c0_205 = arith.constant 0 : index
    %c0_206 = arith.constant 0 : index
    %574 = vector.load %arg3[%c0_205, %c0_206] : memref<128x128xf32, #tpu.memory_space<vmem>>, vector<128x128xf32>
    %cst_207 = arith.constant dense<0.000000e+00> : vector<8x128xf32>
    %575 = tpu.matmul %573, %574, %cst_207 {dimension_numbers = #tpu.dot_dimension_numbers<[1], [0], [0], [1], [0, 0, 1, 1], [], []>} : vector<8x128xf32>, vector<128x128xf32>, vector<8x128xf32> -> vector<8x128xf32>
    %c0_208 = arith.constant 0 : index
    %c0_209 = arith.constant 0 : index
    %576 = vector.load %arg4[%c0_208, %c0_209] : memref<1x128xf32, #tpu.memory_space<vmem>>, vector<1x128xf32>
    %577 = vector.broadcast %576 : vector<1x128xf32> to vector<8x128xf32>
    %578 = arith.addf %575, %577 : vector<8x128xf32>
    %c0_210 = arith.constant 0 : index
    %c0_211 = arith.constant 0 : index
    %579 = vector.load %arg5[%c0_210, %c0_211] : memref<8x128xf32, #tpu.memory_space<vmem>>, vector<8x128xf32>
    tpu.vector_store %arg5[%c0_210, %c0_211], %578 {strides = array<i32>} : memref<8x128xf32, #tpu.memory_space<vmem>>, vector<8x128xf32>,
    return
  }
}

</mosaic_0001>

<bundles_post_ra>
// kernel: tpu_custom_call.1
= control target key start
LH: loop header
LB: loop body
LE: loop exit
PB: predicated region body
PF: predicated region fallthrough
CT: control target
= control target key end

     0   :  { %10 = vsyncpa [#allocation4], 0  ;;  %s5555_s0 = inlined_call_operand.hbm [shape: f32[128,1024], index: 0, kind: input, shape index: {}]   ;;  %s5556_s1 = inlined_call_operand.hbm [shape: f32[1,512], index: 1, kind: input, shape index: {}]   ;;  %s5557_s2 = inlined_call_operand.hbm [shape: f32[1,512], index: 2, kind: input, shape index: {}]   ;;  %s5558_s3 = inlined_call_operand.hbm [shape: f32[128,128], index: 3, kind: input, shape index: {}]   ;;  %s5559_s4 = inlined_call_operand.vmem [shape: f32[1,128], index: 4, kind: input, shape index: {}]   ;;  %s5560_s5 = inlined_call_operand.hbm [shape: f32[8,128], index: 5, kind: output, shape index: {}]  }
   0x1   :  { %11 = vsyncpa [#allocation7], 0 }
   0x2   :  { %12 = vsyncpa [#allocation10], 0 }
   0x3   :  { %13 = vsyncpa [#allocation5], 0  ;;  %s3667_s18 = smov [#allocation6]   ;;  %s3668_s20 = smov [#allocation3]  }
   0x4   :  { %s32_s19 = sshll.u32 %s3667_s18, 4  ;;  %s19_s21 = sshll.u32 %s3668_s20, 4  ;;  %s33_s19 = int_to_ptr.vmem [resolvable:$true] %s32_s19  ;;  %s20_s21 = int_to_ptr.vmem [resolvable:$true] %s19_s21 }
   0x5   :  { %s3567_s22 = scalar_lea.vmem %s33_s19, 64  ;;  %p3572_p1 = scmp.lt.s32.totalorder %s33_s19, %s33_s19 }
   0x6   :  { %p3568_p0 = scmp.ne.s32.totalorder %s33_s19, %s3567_s22  ;;  %p3573_p2 = scmp.lt.s32.totalorder %s3567_s22, %s3567_s22 }
   0x8   :  { %p3574_p3 = por %p3573_p2, %p3572_p1 }
   0xa   :  { %p3575_p4 = pnand %p3574_p3, %p3568_p0 }
   0xc   :  { %3578 = shalt.err (!%p3575_p4)
}
   0xd   :  { %35 = dma.hbm_to_vmem [thread:$0]  %s5556_s1, 64, %s33_s19, [#allocation7]  }
   0xe   :  { %s3587_s25 = scalar_lea.vmem %s20_s21, 16384  ;;  %p3592_p6 = scmp.lt.s32.totalorder %s20_s21, %s20_s21 }
   0xf   :  { %p3588_p5 = scmp.ne.s32.totalorder %s20_s21, %s3587_s25  ;;  %p3593_p7 = scmp.lt.s32.totalorder %s3587_s25, %s3587_s25 }
  0x11   :  { %p3594_p8 = por %p3593_p7, %p3592_p6 }
  0x13   :  { %p3595_p9 = pnand %p3594_p8, %p3588_p5 }
  0x15   :  { %3598 = shalt.err (!%p3595_p9)
}
  0x16   :  { %s3669_s26 = smov 1024   ;;  %s3670_s27 = smov 64  }
  0x17   :  { %25 = dma.hbm_to_vmem [thread:$0]  %s5555_s0, 16384, %s20_s21, [#allocation4], %s3669_s26, %s3669_s26, %s3670_s27  }
  0x18   :  { %s3671_s30 = smov [#allocation8]   ;;  %s3672_s7 = smov [#allocation9]  }
  0x19   :  { %s42_s6 = sshll.u32 %s3671_s30, 4  ;;  %s51_s8 = sshll.u32 %s3672_s7, 4  ;;  %s43_s6 = int_to_ptr.vmem [resolvable:$true] %s42_s6  ;;  %s52_s8 = int_to_ptr.vmem [resolvable:$true] %s51_s8 }
  0x1a   :  { %s3607_s1 = scalar_lea.vmem %s43_s6, 64  ;;  %p3612_p11 = scmp.lt.s32.totalorder %s43_s6, %s43_s6 }
  0x1b   :  { %p3608_p10 = scmp.ne.s32.totalorder %s43_s6, %s3607_s1  ;;  %p3613_p12 = scmp.lt.s32.totalorder %s3607_s1, %s3607_s1 }
  0x1d   :  { %p3614_p13 = por %p3613_p12, %p3612_p11 }
  0x1f   :  { %p3615_p0 = pnand %p3614_p13, %p3608_p10 }
  0x21   :  { %3618 = shalt.err (!%p3615_p0)
}
  0x22   :  { %45 = dma.hbm_to_vmem [thread:$0]  %s5557_s2, 64, %s43_s6, [#allocation7]  }
  0x23   :  { %s3627_s11 = scalar_lea.vmem %s52_s8, 2048  ;;  %p3632_p2 = scmp.lt.s32.totalorder %s52_s8, %s52_s8 }
  0x24   :  { %p3628_p1 = scmp.ne.s32.totalorder %s52_s8, %s3627_s11  ;;  %p3633_p3 = scmp.lt.s32.totalorder %s3627_s11, %s3627_s11 }
  0x26   :  { %p3634_p4 = por %p3633_p3, %p3632_p2 }
  0x28   :  { %p3635_p5 = pnand %p3634_p4, %p3628_p1 }
  0x2a   :  { %3638 = shalt.err (!%p3635_p5)
}
  0x2b   :  { %s3673_s0 = smov 128   ;;  %s3674_s12 = smov 8  }
  0x2c   :  { %57 = dma.hbm_to_vmem [thread:$0]  %s5558_s3, 2048, %s52_s8, [#allocation10], %s3673_s0, %s3673_s0, %s3674_s12  }
  0x2d   :  { %3659 = dma.done.wait [#allocation4], 16384  }
  0x2e   :  { %3660 = vsyncadd [#allocation4], 4294950912 }
  0x2f   :  { %3661 = dma.done.wait [#allocation7], 128  }
  0x30   :  { %3662 = vsyncadd [#allocation7], 4294967168 }
  0x31   :  { %3663 = dma.done.wait [#allocation10], 2048  }
  0x32   :  { %3664 = vsyncadd [#allocation10], 4294965248  ;;  %v5561_v0 = vmov 0.0   ;;  %v3722_v1 = vld [vmem:[#allocation3 + $0x3c8] sm:$0xff]  ;;  %v3724_v2 = vld [vmem:[#allocation3 + $0x3c0] sm:$0xff]  ;;  %vm2855_vm0 = vcmask 1040384  }
  0x33   :  { %298 = vmatprep.mubr.f32.mxu0 %v5561_v0  ;;  %369 = vmatprep.mubr.f32.mxu1 %v5561_v0  ;;  %v3726_v3 = vld [vmem:[#allocation3 + $0x388] sm:$0xff]  ;;  %v3729_v4 = vld [vmem:[#allocation3 + $0x380] sm:$0xff]  ;;  %v3743_v9 = vld [vmem:[#allocation3 + $0x3d8] sm:$0xff]  ;;  %vm2857_vm1 = vcmask 1041408   ;;  %vm2859_vm2 = vcmask 1042432   ;;  %vm2861_vm3 = vcmask 1043456  }
  0x34   :  { %234 = vmatprep.subr.mxu0 %v3722_v1  ;;  %v3732_v5 = vld [vmem:[#allocation3 + $0x348] sm:$0xff]  ;;  %v3735_v6 = vld [vmem:[#allocation3 + $0x340] sm:$0xff]  ;;  %305 = vmatprep.subr.mxu1 %v3743_v9  ;;  %v3749_v11 = vld [vmem:[#allocation3 + $0x3d0] sm:$0xff]  ;;  %vm2863_vm4 = vcmask 1044480   ;;  %vm2865_vm5 = vcmask 1045504   ;;  %vm3676_vm6 = vmmov 0  }
  0x35   :  { %235 = vmatpush1.msra.mxu0 %v3724_v2  ;;  %v3738_v7 = vld [vmem:[#allocation3 + $0x308] sm:$0xff]  ;;  %v3741_v8 = vld [vmem:[#allocation3 + $0x300] sm:$0xff]  ;;  %306 = vmatpush1.msra.mxu1 %v3749_v11  ;;  %v3755_v13 = vld [vmem:[#allocation3 + $0x398] sm:$0xff]  ;;  %vm2867_vm7 = vcmask 1046528   ;;  %s3677_s15 = smov [#allocation11]  }
  0x36   :  { %236 = vmatprep.subr.mxu0 %v3726_v3  ;;  %v3746_v10 = vld [vmem:[#allocation3 + $0x2c8] sm:$0xff]  ;;  %v3752_v12 = vld [vmem:[#allocation3 + $0x2c0] sm:$0xff]  ;;  %v3757_v14 = vld [vmem:[#allocation3 + $0x390] sm:$0xff]  ;;  %307 = vmatprep.subr.mxu1 %v3755_v13  ;;  %s2972_s16 = sshll.u32 %s3677_s15, 4  ;;  %s2973_s16 = int_to_ptr.vmem [resolvable:$true] %s2972_s16 }
  0x37   :  { %237 = vmatpush1.msra.mxu0 %v3729_v4  ;;  %v3760_v15 = vld [vmem:[#allocation3 + $0x288] sm:$0xff]  ;;  %v3763_v16 = vld [vmem:[#allocation3 + $0x358] sm:$0xff]  ;;  %v3766_v17 = vld [vmem:[#allocation3 + $0x280] sm:$0xff]  ;;  %308 = vmatpush1.msra.mxu1 %v3757_v14  ;;  %s3639_s17 = scalar_lea.vmem %s2973_s16, 128  ;;  %p3644_p7 = scmp.lt.s32.totalorder %s2973_s16, %s2973_s16 }
  0x38   :  { %238 = vmatprep.subr.mxu0 %v3732_v5  ;;  %v3769_v18 = vld [vmem:[#allocation3 + $0x350] sm:$0xff]  ;;  %v3771_v19 = vld [vmem:[#allocation3 + $0x318] sm:$0xff]  ;;  %v3774_v20 = vld [vmem:[#allocation3 + $0x248] sm:$0xff]  ;;  %309 = vmatprep.subr.mxu1 %v3763_v16  ;;  %p3640_p6 = scmp.ne.s32.totalorder %s2973_s16, %s3639_s17  ;;  %p3645_p8 = scmp.lt.s32.totalorder %s3639_s17, %s3639_s17 }
  0x39   :  { %239 = vmatpush1.msra.mxu0 %v3735_v6  ;;  %v3777_v21 = vld [vmem:[#allocation3 + $0x310] sm:$0xff]  ;;  %v3780_v22 = vld [vmem:[#allocation3 + $0x240] sm:$0xff]  ;;  %310 = vmatpush1.msra.mxu1 %v3769_v18  ;;  %v3783_v23 = vld [vmem:[#allocation3 + $0x2d8] sm:$0xff] }
  0x3a   :  { %240 = vmatprep.subr.mxu0 %v3738_v7  ;;  %v3786_v24 = vld [vmem:[#allocation3 + $0x208] sm:$0xff]  ;;  %311 = vmatprep.subr.mxu1 %v3771_v19  ;;  %v3789_v25 = vld [vmem:[#allocation3 + $0x2d0] sm:$0xff]  ;;  %v3792_v26 = vld [vmem:[#allocation3 + $0x200] sm:$0xff]  ;;  %p3646_p9 = por %p3645_p8, %p3644_p7 }
  0x3b   :  { %241 = vmatpush1.msra.mxu0 %v3741_v8  ;;  %312 = vmatpush1.msra.mxu1 %v3777_v21  ;;  %v3795_v27 = vld [vmem:[#allocation3 + $0x298] sm:$0xff]  ;;  %v3798_v28 = vld [vmem:[#allocation3 + $0x1c8] sm:$0xff]  ;;  %v3801_v29 = vld [vmem:[#allocation3 + $0x290] sm:$0xff] }
  0x3c   :  { %242 = vmatprep.subr.mxu0 %v3746_v10  ;;  %313 = vmatprep.subr.mxu1 %v3783_v23  ;;  %v3804_v30 = vld [vmem:[#allocation3 + $0x1c0] sm:$0xff]  ;;  %v3807_v31 = vld [vmem:[#allocation3 + $0x258] sm:$0xff]  ;;  %v3810_v32 = vld [vmem:[#allocation3 + $0x188] sm:$0xff]  ;;  %p3647_p10 = pnand %p3646_p9, %p3640_p6 }
  0x3d   :  { %243 = vmatpush1.msra.mxu0 %v3752_v12  ;;  %314 = vmatpush1.msra.mxu1 %v3789_v25  ;;  %v3813_v33 = vld [vmem:[#allocation3 + $0x250] sm:$0xff]  ;;  %v3815_v34 = vld [vmem:[#allocation6] sm:$0xf]  ;;  %v3821_v36 = vld [vmem:[#allocation3 + $0x218] sm:$0xff] }
  0x3e   :  { %244 = vmatprep.subr.mxu0 %v3760_v15  ;;  %315 = vmatprep.subr.mxu1 %v3795_v27  ;;  %5905 = vst [vmem:[#allocation16_spill] sm:$0xff] %v3815_v34  ;;  %v3818_v35 = vld [vmem:[#allocation3 + $0x180] sm:$0xff]  ;;  %v74_v37 = vsub.f32 0.0, %v3815_v34  ;;  %v81_v38 = vrot.slane %v3815_v34, 1  ;;  %v3826_v39 = vld [vmem:[#allocation3 + $0x148] sm:$0xff]  ;;  %v3829_v40 = vld [vmem:[#allocation3 + $0x210] sm:$0xff] }
  0x3f   :  { %245 = vmatpush1.msra.mxu0 %v3766_v17  ;;  %316 = vmatpush1.msra.mxu1 %v3801_v29  ;;  %5906 = vst [vmem:[#allocation17_spill] sm:$0xff] %v3826_v39  ;;  %v3832_v41 = vld [vmem:[#allocation3 + $0x140] sm:$0xff]  ;;  %v3835_v42 = vld [vmem:[#allocation3 + $0x1d8] sm:$0xff]  ;;  %v3838_v45 = vld [vmem:[#allocation3 + $0x108] sm:$0xff]  ;;  %v92_v53 = vrot.slane %v3815_v34, 3 }
  0x40   :  { %246 = vmatprep.subr.mxu0 %v3774_v20  ;;  %317 = vmatprep.subr.mxu1 %v3807_v31  ;;  %5907 = vst [vmem:[#allocation18_spill] sm:$0xff] %v3832_v41  ;;  %v75_v43 = vmul.f32 1.442695, %v74_v37  ;;  %v83_v44 = vsub.f32 0.0, %v81_v38  ;;  %5908 = vst [vmem:[#allocation19_spill] sm:$0xff] %v3838_v45  ;;  %v3841_v46 = vld [vmem:[#allocation3 + $0x1d0] sm:$0xff] }
  0x41   :  { %247 = vmatpush1.msra.mxu0 %v3780_v22  ;;  %318 = vmatpush1.msra.mxu1 %v3813_v33  ;;  %v3844_v47 = vld [vmem:[#allocation3 + $0x100] sm:$0xff]  ;;  %v3847_v49 = vld [vmem:[#allocation3 + $0x198] sm:$0xff]  ;;  %v3850_v50 = vld [vmem:[#allocation3 + $0xc8] sm:$0xff]  ;;  %v94_v62 = vsub.f32 0.0, %v92_v53  ;;  %v89_v53 = vrot.slane %v3815_v34, 2 }
  0x42   :  { %248 = vmatprep.subr.mxu0 %v3786_v24  ;;  %319 = vmatprep.subr.mxu1 %v3821_v36  ;;  %5909 = vst [vmem:[#allocation20_spill] sm:$0xff] %v3844_v47  ;;  %3047 = vpow2.f32 %v75_v43  ;;  %v84_v48 = vmul.f32 1.442695, %v83_v44  ;;  %5910 = vst [vmem:[#allocation21_spill] sm:$0xff] %v3850_v50  ;;  %v3853_v51 = vld [vmem:[#allocation3 + $0x190] sm:$0xff]  ;;  %v3856_v52 = vld [vmem:[#allocation3 + $0xc0] sm:$0xff] }
  0x43   :  { %249 = vmatpush1.msra.mxu0 %v3792_v26  ;;  %320 = vmatpush1.msra.mxu1 %v3829_v40  ;;  %5911 = vst [vmem:[#allocation22_spill] sm:$0xff] %v3856_v52  ;;  %v3860_v54 = vld [vmem:[#allocation3 + $0x158] sm:$0xff]  ;;  %v3863_v55 = vld [vmem:[#allocation3 + $0x88] sm:$0xff]  ;;  %v3866_v56 = vld [vmem:[#allocation3 + $0x150] sm:$0xff] }
  0x44   :  { %250 = vmatprep.subr.mxu0 %v3798_v28  ;;  %321 = vmatprep.subr.mxu1 %v3835_v42  ;;  %3049 = vpow2.f32 %v84_v48  ;;  %5912 = vst [vmem:[#allocation23_spill] sm:$0xff] %v3860_v54  ;;  %5913 = vst [vmem:[#allocation24_spill] sm:$0xff] %v3863_v55  ;;  %v3869_v57 = vld [vmem:[#allocation3 + $0x80] sm:$0xff]  ;;  %v3872_v58 = vld [vmem:[#allocation3 + $0x118] sm:$0xff] }
  0x45   :  { %251 = vmatpush1.msra.mxu0 %v3804_v30  ;;  %322 = vmatpush1.msra.mxu1 %v3841_v46  ;;  %5914 = vst [vmem:[#allocation25_spill] sm:$0xff] %v3866_v56  ;;  %5915 = vst [vmem:[#allocation26_spill] sm:$0xff] %v3869_v57  ;;  %v3875_v59 = vld [vmem:[#allocation3 + $0x48] sm:$0xff]  ;;  %v3878_v60 = vld [vmem:[#allocation3 + $0x110] sm:$0xff]  ;;  %3051 = vtanh.f32 %v89_v53 }
  0x46   :  { %252 = vmatprep.subr.mxu0 %v3810_v32  ;;  %323 = vmatprep.subr.mxu1 %v3847_v49  ;;  %5916 = vst [vmem:[#allocation27_spill] sm:$0xff] %v3872_v58  ;;  %5917 = vst [vmem:[#allocation28_spill] sm:$0xff] %v3875_v59  ;;  %v3881_v61 = vld [vmem:[#allocation3 + $0x40] sm:$0xff]  ;;  %v3884_v63 = vld [vmem:[#allocation3 + $0xd8] sm:$0xff] }
  0x47   :  { %253 = vmatpush1.msra.mxu0 %v3818_v35  ;;  %324 = vmatpush1.msra.mxu1 %v3853_v51  ;;  %5918 = vst [vmem:[#allocation29_spill] sm:$0xff] %v3878_v60  ;;  %5919 = vst [vmem:[#allocation30_spill] sm:$0xff] %v3881_v61  ;;  %v3887_v37 = vld [vmem:[#allocation3 + $0x8] sm:$0xff]  ;;  %v3890_v38 = vld [vmem:[#allocation3 + $0xd0] sm:$0xff] }
  0x48   :  { %254 = vmatprep.subr.mxu0 %v3826_v39  ;;  %325 = vmatprep.subr.mxu1 %v3860_v54  ;;  %5920 = vst [vmem:[#allocation31_spill] sm:$0xff] %v3884_v63  ;;  %5921 = vst [vmem:[#allocation32_spill] sm:$0xff] %v3887_v37  ;;  %v3893_v43 = vld [vmem:[#allocation3] sm:$0xff]  ;;  %v3896_v44 = vld [vmem:[#allocation3 + $0x98] sm:$0xff] }
  0x49   :  { %255 = vmatpush1.msra.mxu0 %v3832_v41  ;;  %326 = vmatpush1.msra.mxu1 %v3866_v56  ;;  %5922 = vst [vmem:[#allocation33_spill] sm:$0xff] %v3890_v38  ;;  %5923 = vst [vmem:[#allocation34_spill] sm:$0xff] %v3893_v43  ;;  %v3899_v48 = vld [vmem:[#allocation3 + $0x3e8] sm:$0xff]  ;;  %v3903_v0 = vld [vmem:[#allocation3 + $0x90] sm:$0xff] }
  0x4a   :  { %256 = vmatprep.subr.mxu0 %v3838_v45  ;;  %327 = vmatprep.subr.mxu1 %v3872_v58  ;;  %5924 = vst [vmem:[#allocation35_spill] sm:$0xff] %v3896_v44  ;;  %5925 = vst [vmem:[#allocation36_spill] sm:$0xff] %v3899_v48  ;;  %v3915_v34 = vld [vmem:[#allocation3 + $0x18] sm:$0xff] }
  0x4b   :  { %257 = vmatpush1.msra.mxu0 %v3844_v47  ;;  %328 = vmatpush1.msra.mxu1 %v3878_v60  ;;  %5926 = vst [vmem:[#allocation37_spill] sm:$0xff] %v3903_v0  ;;  %5929 = vst [vmem:[#allocation40_spill] sm:$0xff] %v3915_v34 }
  0x4c   :  { %258 = vmatprep.subr.mxu0 %v3850_v50  ;;  %329 = vmatprep.subr.mxu1 %v3884_v63  ;;  %v3937_v63 = vld [vmem:[#allocation3 + $0x3b8] sm:$0xff] }
  0x4d   :  { %259 = vmatpush1.msra.mxu0 %v3856_v52  ;;  %330 = vmatpush1.msra.mxu1 %v3890_v38  ;;  %5934 = vst [vmem:[#allocation45_spill] sm:$0xff] %v3937_v63 }
  0x4e   :  { %260 = vmatprep.subr.mxu0 %v3863_v55  ;;  %331 = vmatprep.subr.mxu1 %v3896_v44 }
  0x4f   :  { %261 = vmatpush1.msra.mxu0 %v3869_v57  ;;  %v95_v57 = vmul.f32 1.442695, %v94_v62  ;;  %332 = vmatpush1.msra.mxu1 %v3903_v0  ;;  %v3048_v55 = vpop.eup %3047  ;;  %v3918_v62 = vld [vmem:[#allocation3 + $0x10] sm:$0xff] }
  0x50   :  { %262 = vmatprep.subr.mxu0 %v3875_v59  ;;  %v3907_v59 = vld [vmem:[#allocation3 + $0x58] sm:$0xff]  ;;  %5930 = vst [vmem:[#allocation41_spill] sm:$0xff] %v3918_v62 }
  0x51   :  { %263 = vmatpush1.msra.mxu0 %v3881_v61  ;;  %5927 = vst [vmem:[#allocation38_spill] sm:$0xff] %v3907_v59  ;;  %v3911_v61 = vld [vmem:[#allocation3 + $0x50] sm:$0xff]  ;;  %333 = vmatprep.subr.mxu1 %v3907_v59  ;;  %3053 = vpow2.f32 %v95_v57  ;;  %v3050_v44 = vpop.eup %3049 }
  0x52   :  { %264 = vmatprep.subr.mxu0 %v3887_v37  ;;  %5928 = vst [vmem:[#allocation39_spill] sm:$0xff] %v3911_v61  ;;  %v77_v37 = vadd.f32 1.0, %v3048_v55  ;;  %334 = vmatpush1.msra.mxu1 %v3911_v61  ;;  %v3052_v53 = vpop.eup %3051 }
  0x53   :  { %265 = vmatpush1.msra.mxu0 %v3893_v43  ;;  %v3921_v43 = vld [vmem:[#allocation3 + $0x3f8] sm:$0xff]  ;;  %335 = vmatprep.subr.mxu1 %v3915_v34 }
  0x54   :  { %376 = vmatprep.subr.mxu0 %v3899_v48  ;;  %5931 = vst [vmem:[#allocation42_spill] sm:$0xff] %v3921_v43  ;;  %3055 = vrcp.f32 %v77_v37  ;;  %v86_v48 = vadd.f32 1.0, %v3050_v44  ;;  %336 = vmatpush1.msra.mxu1 %v3918_v62  ;;  %v3931_v62 = vld [vmem:[#allocation3 + $0x3e0] sm:$0xff] }
  0x55   :  { %447 = vmatprep.subr.mxu1 %v3921_v43  ;;  %v3933_v43 = vld [vmem:[#allocation3 + $0x3f0] sm:$0xff] }
  0x56   :  { %3057 = vrcp.f32 %v86_v48  ;;  %5932 = vst [vmem:[#allocation43_spill] sm:$0xff] %v3933_v43  ;;  %v3935_v48 = vld [vmem:[#allocation3 + $0x3a8] sm:$0xff] }
  0x57   :  { %5933 = vst [vmem:[#allocation44_spill] sm:$0xff] %v3935_v48 }
  0x5e   :  { %v3054_v59 = vpop.eup %3053 }
  0x5f   :  { %v97_v38 = vadd.f32 1.0, %v3054_v59  ;;  %v3949_v59 = vld [vmem:[#allocation3 + $0x378] sm:$0xff] }
  0x60   :  { %5938 = vst [vmem:[#allocation49_spill] sm:$0xff] %v3949_v59 }
  0x61   :  { %v3056_v0 = vpop.eup %3055  ;;  %3059 = vrcp.f32 %v97_v38  ;;  %v3952_v38 = vld [vmem:[#allocation3 + $0x360] sm:$0xff] }
  0x62   :  { %v101_v55 = vmul.f32 %v3056_v0, %v3052_v53  ;;  %v3940_v0 = vld [vmem:[#allocation3 + $0x3a0] sm:$0xff]  ;;  %5939 = vst [vmem:[#allocation50_spill] sm:$0xff] %v3952_v38  ;;  %v3955_v53 = vld [vmem:[#allocation3 + $0x370] sm:$0xff] }
  0x63   :  { %v3058_v57 = vpop.eup %3057  ;;  %5935 = vst [vmem:[#allocation46_spill] sm:$0xff] %v3940_v0  ;;  %5940 = vst [vmem:[#allocation51_spill] sm:$0xff] %v3955_v53 }
  0x64   :  { %v100_v52 = vmul.f32 0.0, %v3058_v57  ;;  %v3961_v57 = vld [vmem:[#allocation3 + $0x338] sm:$0xff] }
  0x65   :  { %5942 = vst [vmem:[#allocation53_spill] sm:$0xff] %v3961_v57 }
  0x66   :  { %v3926_v61 = vadd.f32 %v101_v55, %v100_v52  ;;  %v3943_v52 = vld [vmem:[#allocation3 + $0x3b0] sm:$0xff]  ;;  %v3958_v55 = vld [vmem:[#allocation3 + $0x328] sm:$0xff] }
  0x67   :  { %5936 = vst [vmem:[#allocation47_spill] sm:$0xff] %v3943_v52  ;;  %5941 = vst [vmem:[#allocation52_spill] sm:$0xff] %v3958_v55 }
  0x68   :  { %3061 = vtanh.f32 %v3926_v61 }
  0x6e   :  { %v3060_v34 = vpop.eup %3059 }
  0x75   :  { %v3062_v37 = vpop.eup %3061 }
  0x76   :  { %v3929_v44 = vmul.f32 %v3062_v37, %v3060_v34  ;;  %v3946_v34 = vld [vmem:[#allocation3 + $0x368] sm:$0xff]  ;;  %v3964_v37 = vld [vmem:[#allocation3 + $0x320] sm:$0xff] }
  0x77   :  { %5937 = vst [vmem:[#allocation48_spill] sm:$0xff] %v3946_v34  ;;  %5943 = vst [vmem:[#allocation54_spill] sm:$0xff] %v3964_v37 }
  0x78   :  { %299 = vmatmul.mubr.f32.vlgmr.msra.gmra.mxu0 %v3929_v44  ;;  %370 = vmatmul.mubr.f32.vlgmr.msra.gmra.mxu1 %v3929_v44 }
  0x79   :  { %377 = vmatpush1.msra.mxu0 %v3931_v62  ;;  %448 = vmatpush1.msra.mxu1 %v3933_v43  ;;  %v4046_v43 = vld [vmem:[#allocation3 + $0x160] sm:$0xff] }
  0x7a   :  { %378 = vmatprep.subr.mxu0 %v3935_v48  ;;  %449 = vmatprep.subr.mxu1 %v3937_v63  ;;  %v3967_v48 = vld [vmem:[#allocation3 + $0x330] sm:$0xff]  ;;  %v3970_v63 = vld [vmem:[#allocation3 + $0x2e8] sm:$0xff]  ;;  %5971 = vst [vmem:[#allocation81_spill] sm:$0xff] %v4046_v43 }
  0x7b   :  { %379 = vmatpush1.msra.mxu0 %v3940_v0  ;;  %450 = vmatpush1.msra.mxu1 %v3943_v52  ;;  %5944 = vst [vmem:[#allocation55_spill] sm:$0xff] %v3967_v48  ;;  %5945 = vst [vmem:[#allocation56_spill] sm:$0xff] %v3970_v63  ;;  %v3973_v0 = vld [vmem:[#allocation3 + $0x2f8] sm:$0xff]  ;;  %v3976_v52 = vld [vmem:[#allocation3 + $0x2e0] sm:$0xff] }
  0x7c   :  { %380 = vmatprep.subr.mxu0 %v3946_v34  ;;  %451 = vmatprep.subr.mxu1 %v3949_v59  ;;  %5946 = vst [vmem:[#allocation57_spill] sm:$0xff] %v3973_v0  ;;  %5947 = vst [vmem:[#allocation58_spill] sm:$0xff] %v3976_v52  ;;  %v3979_v34 = vld [vmem:[#allocation3 + $0x2f0] sm:$0xff]  ;;  %v3982_v59 = vld [vmem:[#allocation3 + $0x2a8] sm:$0xff] }
  0x7d   :  { %381 = vmatpush1.msra.mxu0 %v3952_v38  ;;  %452 = vmatpush1.msra.mxu1 %v3955_v53  ;;  %5948 = vst [vmem:[#allocation59_spill] sm:$0xff] %v3979_v34  ;;  %5949 = vst [vmem:[#allocation60_spill] sm:$0xff] %v3982_v59  ;;  %v3985_v38 = vld [vmem:[#allocation3 + $0x2b8] sm:$0xff]  ;;  %v3988_v53 = vld [vmem:[#allocation3 + $0x2a0] sm:$0xff] }
  0x7e   :  { %382 = vmatprep.subr.mxu0 %v3958_v55  ;;  %453 = vmatprep.subr.mxu1 %v3961_v57  ;;  %5950 = vst [vmem:[#allocation61_spill] sm:$0xff] %v3985_v38  ;;  %5951 = vst [vmem:[#allocation62_spill] sm:$0xff] %v3988_v53  ;;  %v3991_v55 = vld [vmem:[#allocation3 + $0x2b0] sm:$0xff]  ;;  %v3994_v57 = vld [vmem:[#allocation3 + $0x268] sm:$0xff] }
  0x7f   :  { %383 = vmatpush1.msra.mxu0 %v3964_v37  ;;  %454 = vmatpush1.msra.mxu1 %v3967_v48  ;;  %5952 = vst [vmem:[#allocation63_spill] sm:$0xff] %v3991_v55  ;;  %5953 = vst [vmem:[#allocation64_spill] sm:$0xff] %v3994_v57  ;;  %v3997_v37 = vld [vmem:[#allocation3 + $0x278] sm:$0xff]  ;;  %v4000_v48 = vld [vmem:[#allocation3 + $0x260] sm:$0xff] }
  0x80   :  { %384 = vmatprep.subr.mxu0 %v3970_v63  ;;  %455 = vmatprep.subr.mxu1 %v3973_v0  ;;  %5954 = vst [vmem:[#allocation65_spill] sm:$0xff] %v3997_v37  ;;  %5955 = vst [vmem:[#allocation66_spill] sm:$0xff] %v4000_v48  ;;  %v4003_v63 = vld [vmem:[#allocation3 + $0x270] sm:$0xff]  ;;  %v4006_v0 = vld [vmem:[#allocation3 + $0x228] sm:$0xff] }
  0x81   :  { %385 = vmatpush1.msra.mxu0 %v3976_v52  ;;  %456 = vmatpush1.msra.mxu1 %v3979_v34  ;;  %5956 = vst [vmem:[#allocation67_spill] sm:$0xff] %v4003_v63  ;;  %5957 = vst [vmem:[#allocation68_spill] sm:$0xff] %v4006_v0  ;;  %v4009_v52 = vld [vmem:[#allocation3 + $0x238] sm:$0xff]  ;;  %v4012_v34 = vld [vmem:[#allocation3 + $0x220] sm:$0xff] }
  0x82   :  { %386 = vmatprep.subr.mxu0 %v3982_v59  ;;  %457 = vmatprep.subr.mxu1 %v3985_v38  ;;  %5958 = vst [vmem:[#allocation69_spill] sm:$0xff] %v4009_v52  ;;  %5959 = vst [vmem:[#allocation70_spill] sm:$0xff] %v4012_v34  ;;  %v4016_v59 = vld [vmem:[#allocation3 + $0x1e8] sm:$0xff]  ;;  %v4019_v38 = vld [vmem:[#allocation3 + $0x230] sm:$0xff] }
  0x83   :  { %387 = vmatpush1.msra.mxu0 %v3988_v53  ;;  %458 = vmatpush1.msra.mxu1 %v3991_v55  ;;  %5960 = vst [vmem:[#allocation71_spill] sm:$0xff] %v4016_v59  ;;  %5961 = vst [vmem:[#allocation72_spill] sm:$0xff] %v4019_v38  ;;  %v4022_v53 = vld [vmem:[#allocation3 + $0x1e0] sm:$0xff]  ;;  %v4025_v55 = vld [vmem:[#allocation3 + $0x1f8] sm:$0xff] }
  0x84   :  { %388 = vmatprep.subr.mxu0 %v3994_v57  ;;  %459 = vmatprep.subr.mxu1 %v3997_v37  ;;  %5962 = vst [vmem:[#allocation73_spill] sm:$0xff] %v4022_v53  ;;  %5963 = vst [vmem:[#allocation74_spill] sm:$0xff] %v4025_v55  ;;  %v4028_v57 = vld [vmem:[#allocation3 + $0x1a8] sm:$0xff]  ;;  %v5965_v37 = vmov 0.0  }
  0x85   :  { %389 = vmatpush1.msra.mxu0 %v4000_v48  ;;  %460 = vmatpush1.msra.mxu1 %v4003_v63  ;;  %5964 = vst [vmem:[#allocation75_spill] sm:$0xff] %v4028_v57  ;;  %v4031_v48 = vld [vmem:[#allocation3 + $0x1f0] sm:$0xff]  ;;  %v4034_v63 = vld [vmem:[#allocation3 + $0x1a0] sm:$0xff] }
  0x86   :  { %390 = vmatprep.subr.mxu0 %v4006_v0  ;;  %461 = vmatprep.subr.mxu1 %v4009_v52  ;;  %5966 = vst [vmem:[#allocation76_spill] sm:$0xff] %v4031_v48  ;;  %5967 = vst [vmem:[#allocation77_spill] sm:$0xff] %v4034_v63  ;;  %v4037_v0 = vld [vmem:[#allocation3 + $0x1b8] sm:$0xff]  ;;  %v4040_v52 = vld [vmem:[#allocation3 + $0x168] sm:$0xff] }
  0x87   :  { %391 = vmatpush1.msra.mxu0 %v4012_v34  ;;  %440 = vmatprep.mubr.f32.mxu0 %v5965_v37  ;;  %5968 = vst [vmem:[#allocation78_spill] sm:$0xff] %v4037_v0  ;;  %5969 = vst [vmem:[#allocation79_spill] sm:$0xff] %v4040_v52  ;;  %v4043_v34 = vld [vmem:[#allocation3 + $0x1b0] sm:$0xff] }
  0x88   :  { %392 = vmatprep.subr.mxu0 %v4016_v59  ;;  %462 = vmatpush1.msra.mxu1 %v4019_v38  ;;  %5970 = vst [vmem:[#allocation80_spill] sm:$0xff] %v4043_v34  ;;  %v4049_v59 = vld [vmem:[#allocation3 + $0x178] sm:$0xff]  ;;  %v4052_v38 = vld [vmem:[#allocation3 + $0x128] sm:$0xff] }
  0x89   :  { %393 = vmatpush1.msra.mxu0 %v4022_v53  ;;  %463 = vmatprep.subr.mxu1 %v4025_v55  ;;  %5972 = vst [vmem:[#allocation82_spill] sm:$0xff] %v4049_v59  ;;  %5973 = vst [vmem:[#allocation83_spill] sm:$0xff] %v4052_v38  ;;  %v4055_v53 = vld [vmem:[#allocation3 + $0x170] sm:$0xff]  ;;  %v4058_v55 = vld [vmem:[#allocation3 + $0x120] sm:$0xff] }
  0x8a   :  { %394 = vmatprep.subr.mxu0 %v4028_v57  ;;  %464 = vmatpush1.msra.mxu1 %v4031_v48  ;;  %5974 = vst [vmem:[#allocation84_spill] sm:$0xff] %v4055_v53  ;;  %5975 = vst [vmem:[#allocation85_spill] sm:$0xff] %v4058_v55  ;;  %v4061_v57 = vld [vmem:[#allocation3 + $0x138] sm:$0xff]  ;;  %v4064_v48 = vld [vmem:[#allocation3 + $0xe8] sm:$0xff] }
  0x8b   :  { %395 = vmatpush1.msra.mxu0 %v4034_v63  ;;  %465 = vmatprep.subr.mxu1 %v4037_v0  ;;  %5976 = vst [vmem:[#allocation86_spill] sm:$0xff] %v4061_v57  ;;  %5977 = vst [vmem:[#allocation87_spill] sm:$0xff] %v4064_v48  ;;  %v4067_v63 = vld [vmem:[#allocation3 + $0x130] sm:$0xff]  ;;  %v4070_v0 = vld [vmem:[#allocation3 + $0xe0] sm:$0xff] }
  0x8c   :  { %396 = vmatprep.subr.mxu0 %v4040_v52  ;;  %466 = vmatpush1.msra.mxu1 %v4043_v34  ;;  %5978 = vst [vmem:[#allocation88_spill] sm:$0xff] %v4067_v63  ;;  %5979 = vst [vmem:[#allocation89_spill] sm:$0xff] %v4070_v0  ;;  %v4073_v52 = vld [vmem:[#allocation3 + $0xf8] sm:$0xff]  ;;  %v4076_v34 = vld [vmem:[#allocation3 + $0xa8] sm:$0xff] }
  0x8d   :  { %397 = vmatpush1.msra.mxu0 %v4046_v43  ;;  %467 = vmatprep.subr.mxu1 %v4049_v59  ;;  %5980 = vst [vmem:[#allocation90_spill] sm:$0xff] %v4073_v52  ;;  %5981 = vst [vmem:[#allocation91_spill] sm:$0xff] %v4076_v34  ;;  %v4079_v43 = vld [vmem:[#allocation3 + $0xf0] sm:$0xff]  ;;  %v4082_v59 = vld [vmem:[#allocation3 + $0xa0] sm:$0xff] }
  0x8e   :  { %398 = vmatprep.subr.mxu0 %v4052_v38  ;;  %468 = vmatpush1.msra.mxu1 %v4055_v53  ;;  %5982 = vst [vmem:[#allocation92_spill] sm:$0xff] %v4079_v43  ;;  %v4085_v38 = vld [vmem:[#allocation3 + $0xb8] sm:$0xff]  ;;  %v4088_v53 = vld [vmem:[#allocation3 + $0x68] sm:$0xff] }
  0x8f   :  { %399 = vmatpush1.msra.mxu0 %v4058_v55  ;;  %469 = vmatprep.subr.mxu1 %v4061_v57  ;;  %v4091_v55 = vld [vmem:[#allocation3 + $0xb0] sm:$0xff]  ;;  %v4094_v57 = vld [vmem:[#allocation3 + $0x60] sm:$0xff] }
  0x90   :  { %400 = vmatprep.subr.mxu0 %v4064_v48  ;;  %470 = vmatpush1.msra.mxu1 %v4067_v63  ;;  %v4097_v48 = vld [vmem:[#allocation3 + $0x78] sm:$0xff]  ;;  %v4100_v63 = vld [vmem:[#allocation3 + $0x28] sm:$0xff] }
  0x91   :  { %401 = vmatpush1.msra.mxu0 %v4070_v0  ;;  %471 = vmatprep.subr.mxu1 %v4073_v52  ;;  %5983 = vst [vmem:[#allocation93_spill] sm:$0xff] %v4097_v48  ;;  %5984 = vst [vmem:[#allocation94_spill] sm:$0xff] %v4100_v63  ;;  %v4103_v0 = vld [vmem:[#allocation3 + $0x70] sm:$0xff]  ;;  %v4106_v52 = vld [vmem:[#allocation3 + $0x20] sm:$0xff] }
  0x92   :  { %402 = vmatprep.subr.mxu0 %v4076_v34  ;;  %472 = vmatpush1.msra.mxu1 %v4079_v43  ;;  %5985 = vst [vmem:[#allocation95_spill] sm:$0xff] %v4106_v52  ;;  %v4109_v34 = vld [vmem:[#allocation3 + $0x38] sm:$0xff]  ;;  %v4113_v43 = vld [vmem:[#allocation3 + $0x30] sm:$0xff] }
  0x93   :  { %403 = vmatpush1.msra.mxu0 %v4082_v59  ;;  %473 = vmatprep.subr.mxu1 %v4085_v38  ;;  %5986 = vst [vmem:[#allocation96_spill] sm:$0xff] %v4113_v43 }
  0x94   :  { %404 = vmatprep.subr.mxu0 %v4088_v53  ;;  %474 = vmatpush1.msra.mxu1 %v4091_v55 }
  0x95   :  { %405 = vmatpush1.msra.mxu0 %v4094_v57  ;;  %475 = vmatprep.subr.mxu1 %v4097_v48 }
  0x96   :  { %406 = vmatprep.subr.mxu0 %v4100_v63  ;;  %476 = vmatpush1.msra.mxu1 %v4103_v0 }
  0x97   :  { %407 = vmatpush1.msra.mxu0 %v4106_v52  ;;  %477 = vmatprep.subr.mxu1 %v4109_v34 }
  0x98   :  { %441 = vmatmul.mubr.f32.vlgmr.msra.gmra.mxu0 %v3929_v44  ;;  %478 = vmatpush1.msra.mxu1 %v4113_v43 }
  0x99   :  { %511 = vmatprep.mubr.f32.mxu1 %v5965_v37  ;;  %618 = vmatprep.subr.mxu0 %v3722_v1  ;;  %v5987_v1 = vld [vmem:[#allocation31_spill] sm:$0xff] }
  0x9a   :  { %512 = vmatmul.mubr.f32.vlgmr.msra.gmra.mxu1 %v3929_v44  ;;  %689 = vmatprep.subr.mxu1 %v3743_v9  ;;  %v6000_v44 = vld [vmem:[#allocation34_spill] sm:$0xff] }
  0x9b   :  { %619 = vmatpush1.msra.mxu0 %v3724_v2  ;;  %690 = vmatpush1.msra.mxu1 %v3749_v11  ;;  %v5988_v2 = vld [vmem:[#allocation22_spill] sm:$0xff] }
  0x9c   :  { %620 = vmatprep.subr.mxu0 %v3726_v3  ;;  %691 = vmatprep.subr.mxu1 %v3755_v13  ;;  %v5989_v3 = vld [vmem:[#allocation33_spill] sm:$0xff] }
  0x9d   :  { %621 = vmatpush1.msra.mxu0 %v3729_v4  ;;  %692 = vmatpush1.msra.mxu1 %v3757_v14  ;;  %v5990_v4 = vld [vmem:[#allocation24_spill] sm:$0xff] }
  0x9e   :  { %622 = vmatprep.subr.mxu0 %v3732_v5  ;;  %693 = vmatprep.subr.mxu1 %v3763_v16  ;;  %v5991_v5 = vld [vmem:[#allocation35_spill] sm:$0xff] }
  0x9f   :  { %623 = vmatpush1.msra.mxu0 %v3735_v6  ;;  %694 = vmatpush1.msra.mxu1 %v3769_v18  ;;  %v5992_v6 = vld [vmem:[#allocation26_spill] sm:$0xff] }
  0xa0   :  { %624 = vmatprep.subr.mxu0 %v3738_v7  ;;  %695 = vmatprep.subr.mxu1 %v3771_v19  ;;  %v5993_v7 = vld [vmem:[#allocation37_spill] sm:$0xff] }
  0xa1   :  { %625 = vmatpush1.msra.mxu0 %v3741_v8  ;;  %696 = vmatpush1.msra.mxu1 %v3777_v21  ;;  %v5994_v8 = vld [vmem:[#allocation28_spill] sm:$0xff] }
  0xa2   :  { %626 = vmatprep.subr.mxu0 %v3746_v10  ;;  %697 = vmatprep.subr.mxu1 %v3783_v23  ;;  %v5995_v10 = vld [vmem:[#allocation38_spill] sm:$0xff] }
  0xa3   :  { %627 = vmatpush1.msra.mxu0 %v3752_v12  ;;  %698 = vmatpush1.msra.mxu1 %v3789_v25  ;;  %v5996_v12 = vld [vmem:[#allocation30_spill] sm:$0xff] }
  0xa4   :  { %628 = vmatprep.subr.mxu0 %v3760_v15  ;;  %699 = vmatprep.subr.mxu1 %v3795_v27  ;;  %v5997_v15 = vld [vmem:[#allocation39_spill] sm:$0xff] }
  0xa5   :  { %629 = vmatpush1.msra.mxu0 %v3766_v17  ;;  %700 = vmatpush1.msra.mxu1 %v3801_v29  ;;  %v5998_v17 = vld [vmem:[#allocation32_spill] sm:$0xff] }
  0xa6   :  { %630 = vmatprep.subr.mxu0 %v3774_v20  ;;  %701 = vmatprep.subr.mxu1 %v3807_v31  ;;  %v5999_v20 = vld [vmem:[#allocation40_spill] sm:$0xff] }
  0xa7   :  { %631 = vmatpush1.msra.mxu0 %v3780_v22  ;;  %702 = vmatpush1.msra.mxu1 %v3813_v33 }
  0xa8   :  { %632 = vmatprep.subr.mxu0 %v3786_v24  ;;  %703 = vmatprep.subr.mxu1 %v3821_v36 }
  0xa9   :  { %633 = vmatpush1.msra.mxu0 %v3792_v26  ;;  %704 = vmatpush1.msra.mxu1 %v3829_v40 }
  0xaa   :  { %634 = vmatprep.subr.mxu0 %v3798_v28  ;;  %705 = vmatprep.subr.mxu1 %v3835_v42 }
  0xab   :  { %635 = vmatpush1.msra.mxu0 %v3804_v30  ;;  %706 = vmatpush1.msra.mxu1 %v3841_v46 }
  0xac   :  { %636 = vmatprep.subr.mxu0 %v3810_v32  ;;  %707 = vmatprep.subr.mxu1 %v3847_v49 }
  0xad   :  { %637 = vmatpush1.msra.mxu0 %v3818_v35  ;;  %708 = vmatpush1.msra.mxu1 %v3853_v51 }
  0xae   :  { %638 = vmatprep.subr.mxu0 %v3826_v39  ;;  %709 = vmatprep.subr.mxu1 %v3860_v54 }
  0xaf   :  { %639 = vmatpush1.msra.mxu0 %v3832_v41  ;;  %710 = vmatpush1.msra.mxu1 %v3866_v56 }
  0xb0   :  { %640 = vmatprep.subr.mxu0 %v3838_v45  ;;  %711 = vmatprep.subr.mxu1 %v3872_v58 }
  0xb1   :  { %641 = vmatpush1.msra.mxu0 %v3844_v47  ;;  %712 = vmatpush1.msra.mxu1 %v3878_v60 }
  0xb2   :  { %642 = vmatprep.subr.mxu0 %v3850_v50  ;;  %713 = vmatprep.subr.mxu1 %v5987_v1 }
  0xb3   :  { %643 = vmatpush1.msra.mxu0 %v5988_v2  ;;  %714 = vmatpush1.msra.mxu1 %v5989_v3 }
  0xb4   :  { %644 = vmatprep.subr.mxu0 %v5990_v4  ;;  %715 = vmatprep.subr.mxu1 %v5991_v5  ;;  %v6001_v4 = vld [vmem:[#allocation41_spill] sm:$0xff] }
  0xb5   :  { %645 = vmatpush1.msra.mxu0 %v5992_v6  ;;  %716 = vmatpush1.msra.mxu1 %v5993_v7  ;;  %v6002_v7 = vld [vmem:[#allocation36_spill] sm:$0xff] }
  0xb6   :  { %646 = vmatprep.subr.mxu0 %v5994_v8  ;;  %717 = vmatprep.subr.mxu1 %v5995_v10  ;;  %v6003_v8 = vld [vmem:[#allocation42_spill] sm:$0xff]  ;;  %v520_v10 = vlaneseq }
  0xb7   :  { %647 = vmatpush1.msra.mxu0 %v5996_v12  ;;  %718 = vmatpush1.msra.mxu1 %v5997_v15 }
  0xb8   :  { %648 = vmatprep.subr.mxu0 %v5998_v17  ;;  %719 = vmatprep.subr.mxu1 %v5999_v20  ;;  %v521_v12 = vshrl.u32 %v520_v10, 7  ;;  %v6004_v17 = vld [vmem:[#allocation16_spill] sm:$0xff] }
  0xb9   :  { %649 = vmatpush1.msra.mxu0 %v6000_v44  ;;  %720 = vmatpush1.msra.mxu1 %v6001_v4 }
  0xba   :  { %682 = vmatprep.mubr.f32.mxu0 %v5965_v37  ;;  %753 = vmatprep.mubr.f32.mxu1 %v5965_v37  ;;  %v526_v6 = vsub.s32 1, %v521_v12  ;;  %v522_v5 = vsub.s32 0, %v521_v12  ;;  %v534_v45 = vsub.s32 3, %v521_v12 }
  0xbb   :  { %760 = vmatprep.subr.mxu0 %v6002_v7  ;;  %831 = vmatprep.subr.mxu1 %v6003_v8  ;;  %v518_v8 = vld [vmem:[#allocation8] sm:$0xf] }
  0xbc   :  { %v4192_v3 = vrot.slane %v6004_v17, %v526_v6  ;;  %v4195_v44 = vrot.slane %v6004_v17, %v522_v5  ;;  %v4199_v10 = vrot.slane %v518_v8, %v522_v5  ;;  %v4201_v58 = vrot.slane %v518_v8, %v526_v6 }
  0xbe   :  { %6005 = vst [vmem:[#allocation16_spill] sm:$0xff] %v4192_v3  ;;  %6006 = vst [vmem:[#allocation97_spill] sm:$0xff] %v4195_v44 }
  0xbf   :  { %6007 = vst [vmem:[#allocation98_spill] sm:$0xff] %v4199_v10  ;;  %6008 = vst [vmem:[#allocation99_spill] sm:$0xff] %v4201_v58 }
 0x138   :  { %v300_v15 = vpop.f32.mrf.mxu0  ;;  %v371_v47 = vpop.f32.mrf.mxu1 }
 0x139   :  { %v589_v2 = vadd.f32 %v4195_v44, %v300_v15  ;;  %v530_v44 = vsub.s32 2, %v521_v12 }
 0x13a   :  { %v302_v20 = vpop.f32.mrf.mxu0  ;;  %v373_v41 = vpop.f32.mrf.mxu1 }
 0x13b   :  { %v590_v4 = vadd.f32 %v4192_v3, %v302_v20  ;;  %v593_v7 = vsub.f32 0.0, %v589_v2  ;;  %v4213_v39 = vrot.slane %v6004_v17, %v530_v44 }
 0x13d   :  { %v599_v1 = vsub.f32 0.0, %v590_v4  ;;  %v594_v60 = vmul.f32 1.442695, %v593_v7  ;;  %6011 = vst [vmem:[#allocation102_spill] sm:$0xff] %v4213_v39 }
 0x13f   :  { %v600_v50 = vmul.f32 1.442695, %v599_v1  ;;  %v4206_v1 = vrot.slane %v6004_v17, %v534_v45 }
 0x141   :  { %3063 = vpow2.f32 %v600_v50  ;;  %6009 = vst [vmem:[#allocation100_spill] sm:$0xff] %v4206_v1  ;;  %v4208_v50 = vrot.slane %v518_v8, %v534_v45  ;;  %v592_v15 = vadd.f32 %v4206_v1, %v373_v41  ;;  %v4215_v45 = vrot.slane %v518_v8, %v530_v44 }
 0x142   :  { %3065 = vpow2.f32 %v594_v60 }
 0x143   :  { %6010 = vst [vmem:[#allocation101_spill] sm:$0xff] %v4208_v50  ;;  %6012 = vst [vmem:[#allocation103_spill] sm:$0xff] %v4215_v45 }
 0x158   :  { %v442_v56 = vpop.f32.mrf.mxu0 }
 0x159   :  { %v540_v54 = vadd.f32 %v4199_v10, %v442_v56  ;;  %v3064_v56 = vpop.eup %3063 }
 0x15a   :  { %v444_v20 = vpop.f32.mrf.mxu0  ;;  %v513_v2 = vpop.f32.mrf.mxu1 }
 0x15b   :  { %v544_v3 = vsub.f32 0.0, %v540_v54  ;;  %v541_v4 = vadd.f32 %v4201_v58, %v444_v20  ;;  %v3066_v10 = vpop.eup %3065  ;;  %v606_v20 = vsub.f32 0.0, %v592_v15  ;;  %v602_v58 = vadd.f32 1.0, %v3064_v56 }
 0x15c   :  { %v515_v6 = vpop.f32.mrf.mxu1 }
 0x15d   :  { %v545_v5 = vmul.f32 1.442695, %v544_v3  ;;  %v550_v7 = vsub.f32 0.0, %v541_v4  ;;  %v543_v54 = vadd.f32 %v4208_v50, %v515_v6  ;;  %v596_v4 = vadd.f32 1.0, %v3066_v10 }
 0x15f   :  { %3067 = vpow2.f32 %v545_v5  ;;  %v551_v60 = vmul.f32 1.442695, %v550_v7  ;;  %v557_v3 = vsub.f32 0.0, %v543_v54  ;;  %v607_v5 = vmul.f32 1.442695, %v606_v20 }
 0x160   :  { %v591_v7 = vadd.f32 %v4213_v39, %v371_v47 }
 0x161   :  { %3069 = vpow2.f32 %v551_v60  ;;  %v558_v41 = vmul.f32 1.442695, %v557_v3  ;;  %v542_v60 = vadd.f32 %v4215_v45, %v513_v2 }
 0x162   :  { %3071 = vrcp.f32 %v602_v58 }
 0x163   :  { %3073 = vrcp.f32 %v596_v4 }
 0x164   :  { %3075 = vpow2.f32 %v607_v5 }
 0x165   :  { %3077 = vtanh.f32 %v591_v7 }
 0x166   :  { %3079 = vpow2.f32 %v558_v41 }
 0x16c   :  { %v3068_v12 = vpop.eup %3067 }
 0x16d   :  { %v547_v6 = vadd.f32 1.0, %v3068_v12 }
 0x16e   :  { %v3070_v15 = vpop.eup %3069 }
 0x16f   :  { %3081 = vrcp.f32 %v547_v6  ;;  %v553_v17 = vadd.f32 1.0, %v3070_v15  ;;  %v3072_v8 = vpop.eup %3071 }
 0x170   :  { %3083 = vtanh.f32 %v542_v60  ;;  %v3074_v44 = vpop.eup %3073  ;;  %v612_v58 = vmul.f32 %v3072_v8, %v3926_v61 }
 0x171   :  { %3085 = vrcp.f32 %v553_v17  ;;  %v3076_v10 = vpop.eup %3075 }
 0x172   :  { %v3078_v47 = vpop.eup %3077  ;;  %v609_v3 = vadd.f32 1.0, %v3076_v10 }
 0x173   :  { %v3080_v56 = vpop.eup %3079  ;;  %v613_v54 = vmul.f32 %v3078_v47, %v3074_v44  ;;  %v6015_v47 = vld [vmem:[#allocation44_spill] sm:$0xff] }
 0x174   :  { %v560_v7 = vadd.f32 1.0, %v3080_v56  ;;  %3087 = vrcp.f32 %v609_v3  ;;  %v6016_v56 = vld [vmem:[#allocation45_spill] sm:$0xff]  ;;  %v6019_v3 = vld [vmem:[#allocation48_spill] sm:$0xff] }
 0x175   :  { %v4220_v2 = vadd.f32 %v613_v54, %v612_v58  ;;  %v6014_v58 = vld [vmem:[#allocation43_spill] sm:$0xff]  ;;  %v6017_v54 = vld [vmem:[#allocation46_spill] sm:$0xff] }
 0x177   :  { %3089 = vtanh.f32 %v4220_v2 }
 0x178   :  { %3091 = vrcp.f32 %v560_v7  ;;  %v6022_v7 = vld [vmem:[#allocation51_spill] sm:$0xff] }
 0x17c   :  { %v3082_v20 = vpop.eup %3081 }
 0x17d   :  { %v3084_v4 = vpop.eup %3083 }
 0x17e   :  { %v3086_v5 = vpop.eup %3085  ;;  %v564_v12 = vmul.f32 %v3084_v4, %v3082_v20  ;;  %v6018_v20 = vld [vmem:[#allocation47_spill] sm:$0xff]  ;;  %v6020_v4 = vld [vmem:[#allocation49_spill] sm:$0xff] }
 0x17f   :  { %v563_v41 = vmul.f32 0.0, %v3086_v5  ;;  %v6021_v5 = vld [vmem:[#allocation50_spill] sm:$0xff] }
 0x181   :  { %v4223_v60 = vadd.f32 %v564_v12, %v563_v41  ;;  %v3088_v61 = vpop.eup %3087  ;;  %v6023_v41 = vld [vmem:[#allocation52_spill] sm:$0xff]  ;;  %v6024_v12 = vld [vmem:[#allocation53_spill] sm:$0xff] }
 0x183   :  { %3093 = vtanh.f32 %v4223_v60 }
 0x184   :  { %v3090_v6 = vpop.eup %3089 }
 0x185   :  { %v3092_v15 = vpop.eup %3091  ;;  %v616_v44 = vmul.f32 %v3090_v6, %v3088_v61  ;;  %v6025_v61 = vld [vmem:[#allocation54_spill] sm:$0xff]  ;;  %v6026_v6 = vld [vmem:[#allocation55_spill] sm:$0xff] }
 0x190   :  { %v3094_v17 = vpop.eup %3093 }
 0x191   :  { %v4226_v8 = vmul.f32 %v3094_v17, %v3092_v15  ;;  %v6027_v15 = vld [vmem:[#allocation56_spill] sm:$0xff]  ;;  %v6028_v17 = vld [vmem:[#allocation57_spill] sm:$0xff] }
 0x193   :  { %6013 = vst [vmem:[#allocation104_spill] sm:$0xff] %v4226_v8  ;;  %v4229_v10 = vadd.f32 %v616_v44, %v4226_v8  ;;  %v6029_v44 = vld [vmem:[#allocation58_spill] sm:$0xff]  ;;  %v6030_v8 = vld [vmem:[#allocation59_spill] sm:$0xff] }
 0x195   :  { %683 = vmatmul.mubr.f32.vlgmr.msra.gmra.mxu0 %v4229_v10  ;;  %754 = vmatmul.mubr.f32.vlgmr.msra.gmra.mxu1 %v4229_v10 }
 0x196   :  { %761 = vmatpush1.msra.mxu0 %v3931_v62  ;;  %832 = vmatpush1.msra.mxu1 %v6014_v58 }
 0x197   :  { %762 = vmatprep.subr.mxu0 %v6015_v47  ;;  %833 = vmatprep.subr.mxu1 %v6016_v56 }
 0x198   :  { %763 = vmatpush1.msra.mxu0 %v6017_v54  ;;  %834 = vmatpush1.msra.mxu1 %v6018_v20 }
 0x199   :  { %764 = vmatprep.subr.mxu0 %v6019_v3  ;;  %835 = vmatprep.subr.mxu1 %v6020_v4  ;;  %v6031_v4 = vld [vmem:[#allocation60_spill] sm:$0xff] }
 0x19a   :  { %765 = vmatpush1.msra.mxu0 %v6021_v5  ;;  %836 = vmatpush1.msra.mxu1 %v6022_v7  ;;  %v6032_v5 = vld [vmem:[#allocation61_spill] sm:$0xff]  ;;  %v6033_v7 = vld [vmem:[#allocation62_spill] sm:$0xff] }
 0x19b   :  { %766 = vmatprep.subr.mxu0 %v6023_v41  ;;  %837 = vmatprep.subr.mxu1 %v6024_v12  ;;  %v6034_v41 = vld [vmem:[#allocation63_spill] sm:$0xff]  ;;  %v6035_v12 = vld [vmem:[#allocation64_spill] sm:$0xff] }
 0x19c   :  { %767 = vmatpush1.msra.mxu0 %v6025_v61  ;;  %838 = vmatpush1.msra.mxu1 %v6026_v6  ;;  %v6036_v61 = vld [vmem:[#allocation65_spill] sm:$0xff]  ;;  %v6037_v6 = vld [vmem:[#allocation66_spill] sm:$0xff] }
 0x19d   :  { %768 = vmatprep.subr.mxu0 %v6027_v15  ;;  %839 = vmatprep.subr.mxu1 %v6028_v17  ;;  %v6038_v15 = vld [vmem:[#allocation67_spill] sm:$0xff]  ;;  %v6039_v17 = vld [vmem:[#allocation68_spill] sm:$0xff] }
 0x19e   :  { %769 = vmatpush1.msra.mxu0 %v6029_v44  ;;  %840 = vmatpush1.msra.mxu1 %v6030_v8  ;;  %v6040_v44 = vld [vmem:[#allocation69_spill] sm:$0xff]  ;;  %v6041_v8 = vld [vmem:[#allocation70_spill] sm:$0xff] }
 0x19f   :  { %770 = vmatprep.subr.mxu0 %v6031_v4  ;;  %841 = vmatprep.subr.mxu1 %v6032_v5  ;;  %v6042_v4 = vld [vmem:[#allocation72_spill] sm:$0xff]  ;;  %v6043_v5 = vld [vmem:[#allocation71_spill] sm:$0xff] }
 0x1a0   :  { %771 = vmatpush1.msra.mxu0 %v6033_v7  ;;  %842 = vmatpush1.msra.mxu1 %v6034_v41  ;;  %v6044_v7 = vld [vmem:[#allocation74_spill] sm:$0xff]  ;;  %v6045_v41 = vld [vmem:[#allocation73_spill] sm:$0xff] }
 0x1a1   :  { %772 = vmatprep.subr.mxu0 %v6035_v12  ;;  %843 = vmatprep.subr.mxu1 %v6036_v61  ;;  %v6046_v12 = vld [vmem:[#allocation76_spill] sm:$0xff]  ;;  %v6047_v61 = vld [vmem:[#allocation75_spill] sm:$0xff] }
 0x1a2   :  { %773 = vmatpush1.msra.mxu0 %v6037_v6  ;;  %844 = vmatpush1.msra.mxu1 %v6038_v15  ;;  %v6048_v6 = vld [vmem:[#allocation78_spill] sm:$0xff]  ;;  %v6049_v15 = vld [vmem:[#allocation77_spill] sm:$0xff] }
 0x1a3   :  { %774 = vmatprep.subr.mxu0 %v6039_v17  ;;  %845 = vmatprep.subr.mxu1 %v6040_v44  ;;  %v6050_v17 = vld [vmem:[#allocation80_spill] sm:$0xff]  ;;  %v6051_v44 = vld [vmem:[#allocation79_spill] sm:$0xff] }
 0x1a4   :  { %775 = vmatpush1.msra.mxu0 %v6041_v8  ;;  %846 = vmatpush1.msra.mxu1 %v6042_v4  ;;  %v6052_v8 = vld [vmem:[#allocation82_spill] sm:$0xff]  ;;  %v6053_v4 = vld [vmem:[#allocation81_spill] sm:$0xff] }
 0x1a5   :  { %776 = vmatprep.subr.mxu0 %v6043_v5  ;;  %847 = vmatprep.subr.mxu1 %v6044_v7  ;;  %v6054_v5 = vld [vmem:[#allocation84_spill] sm:$0xff]  ;;  %v6055_v7 = vld [vmem:[#allocation83_spill] sm:$0xff] }
 0x1a6   :  { %777 = vmatpush1.msra.mxu0 %v6045_v41  ;;  %848 = vmatpush1.msra.mxu1 %v6046_v12  ;;  %v6056_v41 = vld [vmem:[#allocation86_spill] sm:$0xff]  ;;  %v6057_v12 = vld [vmem:[#allocation85_spill] sm:$0xff] }
 0x1a7   :  { %778 = vmatprep.subr.mxu0 %v6047_v61  ;;  %849 = vmatprep.subr.mxu1 %v6048_v6  ;;  %v6058_v61 = vld [vmem:[#allocation88_spill] sm:$0xff]  ;;  %v6059_v6 = vld [vmem:[#allocation87_spill] sm:$0xff] }
 0x1a8   :  { %779 = vmatpush1.msra.mxu0 %v6049_v15  ;;  %850 = vmatpush1.msra.mxu1 %v6050_v17  ;;  %v6060_v15 = vld [vmem:[#allocation90_spill] sm:$0xff]  ;;  %v6061_v17 = vld [vmem:[#allocation89_spill] sm:$0xff] }
 0x1a9   :  { %780 = vmatprep.subr.mxu0 %v6051_v44  ;;  %851 = vmatprep.subr.mxu1 %v6052_v8  ;;  %v6062_v44 = vld [vmem:[#allocation92_spill] sm:$0xff]  ;;  %v6063_v8 = vld [vmem:[#allocation91_spill] sm:$0xff] }
 0x1aa   :  { %781 = vmatpush1.msra.mxu0 %v6053_v4  ;;  %852 = vmatpush1.msra.mxu1 %v6054_v5 }
 0x1ab   :  { %782 = vmatprep.subr.mxu0 %v6055_v7  ;;  %853 = vmatprep.subr.mxu1 %v6056_v41 }
 0x1ac   :  { %783 = vmatpush1.msra.mxu0 %v6057_v12  ;;  %854 = vmatpush1.msra.mxu1 %v6058_v61 }
 0x1ad   :  { %784 = vmatprep.subr.mxu0 %v6059_v6  ;;  %855 = vmatprep.subr.mxu1 %v6060_v15 }
 0x1ae   :  { %785 = vmatpush1.msra.mxu0 %v6061_v17  ;;  %856 = vmatpush1.msra.mxu1 %v6062_v44 }
 0x1af   :  { %786 = vmatprep.subr.mxu0 %v6063_v8  ;;  %857 = vmatprep.subr.mxu1 %v4085_v38 }
 0x1b0   :  { %787 = vmatpush1.msra.mxu0 %v4082_v59  ;;  %858 = vmatpush1.msra.mxu1 %v4091_v55 }
 0x1b1   :  { %788 = vmatprep.subr.mxu0 %v4088_v53  ;;  %859 = vmatprep.subr.mxu1 %v4097_v48  ;;  %v4299_v48 = vld [vmem:[#allocation3 + $0x3c8] sm:$0xff] }
 0x1b2   :  { %789 = vmatpush1.msra.mxu0 %v4094_v57  ;;  %860 = vmatpush1.msra.mxu1 %v4103_v0 }
 0x1b3   :  { %790 = vmatprep.subr.mxu0 %v4100_v63  ;;  %861 = vmatprep.subr.mxu1 %v4109_v34  ;;  %v4303_v63 = vld [vmem:[#allocation3 + $0x3c0] sm:$0xff] }
 0x1b4   :  { %791 = vmatpush1.msra.mxu0 %v4106_v52  ;;  %824 = vmatprep.mubr.f32.mxu0 %v5965_v37  ;;  %v4307_v52 = vld [vmem:[#allocation3 + $0x388] sm:$0xff] }
 0x1b5   :  { %862 = vmatpush1.msra.mxu1 %v4113_v43  ;;  %895 = vmatprep.mubr.f32.mxu1 %v5965_v37  ;;  %v4311_v43 = vld [vmem:[#allocation3 + $0x380] sm:$0xff] }
 0x1b6   :  { %825 = vmatmul.mubr.f32.vlgmr.msra.gmra.mxu0 %v4229_v10  ;;  %896 = vmatmul.mubr.f32.vlgmr.msra.gmra.mxu1 %v4229_v10  ;;  %v4315_v10 = vld [vmem:[#allocation3 + $0x348] sm:$0xff] }
 0x1b7   :  { %959 = vmatprep.subr.mxu0 %v4299_v48  ;;  %1030 = vmatprep.subr.mxu1 %v3743_v9  ;;  %v4319_v9 = vld [vmem:[#allocation3 + $0x340] sm:$0xff] }
 0x1b8   :  { %960 = vmatpush1.msra.mxu0 %v4303_v63  ;;  %1031 = vmatpush1.msra.mxu1 %v3749_v11  ;;  %v4323_v11 = vld [vmem:[#allocation3 + $0x308] sm:$0xff] }
 0x1b9   :  { %961 = vmatprep.subr.mxu0 %v4307_v52  ;;  %1032 = vmatprep.subr.mxu1 %v3755_v13  ;;  %v4327_v13 = vld [vmem:[#allocation3 + $0x300] sm:$0xff] }
 0x1ba   :  { %962 = vmatpush1.msra.mxu0 %v4311_v43  ;;  %1033 = vmatpush1.msra.mxu1 %v3757_v14  ;;  %v4331_v14 = vld [vmem:[#allocation3 + $0x2c8] sm:$0xff] }
 0x1bb   :  { %963 = vmatprep.subr.mxu0 %v4315_v10  ;;  %1034 = vmatprep.subr.mxu1 %v3763_v16  ;;  %v4335_v16 = vld [vmem:[#allocation3 + $0x2c0] sm:$0xff] }
 0x1bc   :  { %964 = vmatpush1.msra.mxu0 %v4319_v9  ;;  %1035 = vmatpush1.msra.mxu1 %v3769_v18  ;;  %v4339_v18 = vld [vmem:[#allocation3 + $0x288] sm:$0xff] }
 0x1bd   :  { %965 = vmatprep.subr.mxu0 %v4323_v11  ;;  %1036 = vmatprep.subr.mxu1 %v3771_v19  ;;  %v4343_v19 = vld [vmem:[#allocation3 + $0x280] sm:$0xff] }
 0x1be   :  { %966 = vmatpush1.msra.mxu0 %v4327_v13  ;;  %1037 = vmatpush1.msra.mxu1 %v3777_v21  ;;  %6064 = vst [vmem:[#allocation43_spill] sm:$0xff] %v4343_v19  ;;  %v4347_v21 = vld [vmem:[#allocation3 + $0x248] sm:$0xff] }
 0x1bf   :  { %967 = vmatprep.subr.mxu0 %v4331_v14  ;;  %1038 = vmatprep.subr.mxu1 %v3783_v23  ;;  %6065 = vst [vmem:[#allocation44_spill] sm:$0xff] %v4347_v21  ;;  %v6067_v23 = vld [vmem:[#allocation23_spill] sm:$0xff] }
 0x1c0   :  { %968 = vmatpush1.msra.mxu0 %v4335_v16  ;;  %1039 = vmatpush1.msra.mxu1 %v3789_v25  ;;  %v6069_v25 = vld [vmem:[#allocation25_spill] sm:$0xff] }
 0x1c1   :  { %969 = vmatprep.subr.mxu0 %v4339_v18  ;;  %1040 = vmatprep.subr.mxu1 %v3795_v27  ;;  %v6071_v27 = vld [vmem:[#allocation27_spill] sm:$0xff] }
 0x1c2   :  { %970 = vmatpush1.msra.mxu0 %v4343_v19  ;;  %1041 = vmatpush1.msra.mxu1 %v3801_v29  ;;  %v6073_v29 = vld [vmem:[#allocation29_spill] sm:$0xff] }
 0x1c3   :  { %971 = vmatprep.subr.mxu0 %v4347_v21  ;;  %1042 = vmatprep.subr.mxu1 %v3807_v31  ;;  %v6075_v31 = vld [vmem:[#allocation31_spill] sm:$0xff] }
 0x1c4   :  { %972 = vmatpush1.msra.mxu0 %v3780_v22  ;;  %1043 = vmatpush1.msra.mxu1 %v3813_v33  ;;  %v6066_v22 = vld [vmem:[#allocation17_spill] sm:$0xff] }
 0x1c5   :  { %973 = vmatprep.subr.mxu0 %v3786_v24  ;;  %1044 = vmatprep.subr.mxu1 %v3821_v36  ;;  %v6068_v24 = vld [vmem:[#allocation18_spill] sm:$0xff]  ;;  %v6077_v33 = vld [vmem:[#allocation33_spill] sm:$0xff]  ;;  %v6079_v36 = vld [vmem:[#allocation35_spill] sm:$0xff] }
 0x1c6   :  { %974 = vmatpush1.msra.mxu0 %v3792_v26  ;;  %1045 = vmatpush1.msra.mxu1 %v3829_v40  ;;  %v6070_v26 = vld [vmem:[#allocation19_spill] sm:$0xff]  ;;  %v6080_v40 = vld [vmem:[#allocation26_spill] sm:$0xff] }
 0x1c7   :  { %975 = vmatprep.subr.mxu0 %v3798_v28  ;;  %1046 = vmatprep.subr.mxu1 %v3835_v42  ;;  %v6072_v28 = vld [vmem:[#allocation20_spill] sm:$0xff]  ;;  %v6081_v42 = vld [vmem:[#allocation37_spill] sm:$0xff] }
 0x1c8   :  { %976 = vmatpush1.msra.mxu0 %v3804_v30  ;;  %1047 = vmatpush1.msra.mxu1 %v3841_v46  ;;  %v6074_v30 = vld [vmem:[#allocation21_spill] sm:$0xff]  ;;  %v6082_v46 = vld [vmem:[#allocation28_spill] sm:$0xff] }
 0x1c9   :  { %977 = vmatprep.subr.mxu0 %v3810_v32  ;;  %1048 = vmatprep.subr.mxu1 %v3847_v49  ;;  %v6076_v32 = vld [vmem:[#allocation22_spill] sm:$0xff] }
 0x1ca   :  { %978 = vmatpush1.msra.mxu0 %v3818_v35  ;;  %1049 = vmatpush1.msra.mxu1 %v3853_v51  ;;  %v6078_v35 = vld [vmem:[#allocation24_spill] sm:$0xff]  ;;  %v6083_v49 = vld [vmem:[#allocation38_spill] sm:$0xff] }
 0x1cb   :  { %979 = vmatprep.subr.mxu0 %v6066_v22  ;;  %1050 = vmatprep.subr.mxu1 %v6067_v23  ;;  %v6084_v51 = vld [vmem:[#allocation30_spill] sm:$0xff]  ;;  %v6085_v22 = vld [vmem:[#allocation39_spill] sm:$0xff]  ;;  %v6086_v23 = vld [vmem:[#allocation32_spill] sm:$0xff] }
 0x1cc   :  { %980 = vmatpush1.msra.mxu0 %v6068_v24  ;;  %1051 = vmatpush1.msra.mxu1 %v6069_v25  ;;  %v6087_v24 = vld [vmem:[#allocation40_spill] sm:$0xff]  ;;  %v6088_v25 = vld [vmem:[#allocation34_spill] sm:$0xff] }
 0x1cd   :  { %981 = vmatprep.subr.mxu0 %v6070_v26  ;;  %1052 = vmatprep.subr.mxu1 %v6071_v27  ;;  %v6089_v26 = vld [vmem:[#allocation41_spill] sm:$0xff]  ;;  %v6090_v27 = vld [vmem:[#allocation36_spill] sm:$0xff] }
 0x1ce   :  { %982 = vmatpush1.msra.mxu0 %v6072_v28  ;;  %1053 = vmatpush1.msra.mxu1 %v6073_v29  ;;  %v6091_v28 = vld [vmem:[#allocation42_spill] sm:$0xff] }
 0x1cf   :  { %983 = vmatprep.subr.mxu0 %v6074_v30  ;;  %1054 = vmatprep.subr.mxu1 %v6075_v31  ;;  %v6092_v31 = vld [vmem:[#allocation16_spill] sm:$0xff] }
 0x1d0   :  { %984 = vmatpush1.msra.mxu0 %v6076_v32  ;;  %1055 = vmatpush1.msra.mxu1 %v6077_v33  ;;  %v6093_v33 = vld [vmem:[#allocation97_spill] sm:$0xff] }
 0x1d1   :  { %985 = vmatprep.subr.mxu0 %v6078_v35  ;;  %1056 = vmatprep.subr.mxu1 %v6079_v36 }
 0x1d2   :  { %986 = vmatpush1.msra.mxu0 %v6080_v40  ;;  %1057 = vmatpush1.msra.mxu1 %v6081_v42 }
 0x1d3   :  { %987 = vmatprep.subr.mxu0 %v6082_v46  ;;  %1058 = vmatprep.subr.mxu1 %v6083_v49 }
 0x1d4   :  { %988 = vmatpush1.msra.mxu0 %v6084_v51  ;;  %1059 = vmatpush1.msra.mxu1 %v6085_v22 }
 0x1d5   :  { %989 = vmatprep.subr.mxu0 %v6086_v23  ;;  %1060 = vmatprep.subr.mxu1 %v6087_v24  ;;  %v6094_v23 = vld [vmem:[#allocation98_spill] sm:$0xff] }
 0x1d6   :  { %990 = vmatpush1.msra.mxu0 %v6088_v25  ;;  %1061 = vmatpush1.msra.mxu1 %v6089_v26 }
 0x1d7   :  { %1023 = vmatprep.mubr.f32.mxu0 %v5965_v37  ;;  %1094 = vmatprep.mubr.f32.mxu1 %v5965_v37 }
 0x1d8   :  { %1101 = vmatprep.subr.mxu0 %v6090_v27  ;;  %1172 = vmatprep.subr.mxu1 %v6091_v28  ;;  %v6095_v28 = vld [vmem:[#allocation99_spill] sm:$0xff] }
 0x255   :  { %v684_v29 = vpop.f32.mrf.mxu0  ;;  %v755_v49 = vpop.f32.mrf.mxu1 }
 0x256   :  { %v930_v35 = vadd.f32 %v684_v29, %v6093_v33 }
 0x257   :  { %v686_v30 = vpop.f32.mrf.mxu0  ;;  %v757_v22 = vpop.f32.mrf.mxu1 }
 0x258   :  { %v931_v32 = vadd.f32 %v686_v30, %v6092_v31  ;;  %v934_v40 = vsub.f32 0.0, %v930_v35  ;;  %v933_v35 = vadd.f32 %v757_v22, %v4206_v1  ;;  %v932_v31 = vadd.f32 %v755_v49, %v4213_v39 }
 0x25a   :  { %v940_v36 = vsub.f32 0.0, %v931_v32  ;;  %v935_v46 = vmul.f32 1.442695, %v934_v40 }
 0x25c   :  { %v941_v42 = vmul.f32 1.442695, %v940_v36 }
 0x25e   :  { %3095 = vpow2.f32 %v941_v42 }
 0x25f   :  { %3097 = vpow2.f32 %v935_v46  ;;  %v947_v46 = vsub.f32 0.0, %v933_v35 }
 0x26b   :  { %v3096_v36 = vpop.eup %3095 }
 0x26c   :  { %v3098_v42 = vpop.eup %3097  ;;  %v943_v33 = vadd.f32 1.0, %v3096_v36 }
 0x276   :  { %v826_v51 = vpop.f32.mrf.mxu0  ;;  %v897_v27 = vpop.f32.mrf.mxu1 }
 0x277   :  { %v902_v24 = vadd.f32 %v826_v51, %v6094_v23  ;;  %v937_v23 = vadd.f32 1.0, %v3098_v42 }
 0x278   :  { %v828_v25 = vpop.f32.mrf.mxu0  ;;  %v899_v32 = vpop.f32.mrf.mxu1 }
 0x279   :  { %v906_v26 = vsub.f32 0.0, %v902_v24  ;;  %v903_v21 = vadd.f32 %v828_v25, %v6095_v28  ;;  %v905_v40 = vadd.f32 %v899_v32, %v4208_v50  ;;  %v948_v24 = vmul.f32 1.442695, %v947_v46 }
 0x27b   :  { %v907_v19 = vmul.f32 1.442695, %v906_v26  ;;  %v912_v30 = vsub.f32 0.0, %v903_v21  ;;  %v919_v51 = vsub.f32 0.0, %v905_v40  ;;  %v904_v21 = vadd.f32 %v897_v27, %v4215_v45 }
 0x27d   :  { %3099 = vpow2.f32 %v907_v19  ;;  %v913_v29 = vmul.f32 1.442695, %v912_v30  ;;  %v920_v25 = vmul.f32 1.442695, %v919_v51 }
 0x27f   :  { %3101 = vpow2.f32 %v913_v29 }
 0x280   :  { %3103 = vrcp.f32 %v943_v33 }
 0x281   :  { %3105 = vrcp.f32 %v937_v23 }
 0x282   :  { %3107 = vpow2.f32 %v948_v24 }
 0x283   :  { %3109 = vtanh.f32 %v932_v31 }
 0x284   :  { %3111 = vpow2.f32 %v920_v25 }
 0x28a   :  { %v3100_v19 = vpop.eup %3099 }
 0x28b   :  { %v909_v22 = vadd.f32 1.0, %v3100_v19 }
 0x28c   :  { %v3102_v26 = vpop.eup %3101 }
 0x28d   :  { %3113 = vrcp.f32 %v909_v22  ;;  %v915_v30 = vadd.f32 1.0, %v3102_v26  ;;  %v3104_v29 = vpop.eup %3103 }
 0x28e   :  { %3115 = vtanh.f32 %v904_v21  ;;  %v3106_v32 = vpop.eup %3105  ;;  %v953_v49 = vmul.f32 %v3104_v29, %v4220_v2 }
 0x28f   :  { %3117 = vrcp.f32 %v915_v30  ;;  %v3108_v35 = vpop.eup %3107 }
 0x290   :  { %v3110_v33 = vpop.eup %3109  ;;  %v950_v42 = vadd.f32 1.0, %v3108_v35  ;;  %v6097_v35 = vld [vmem:[#allocation50_spill] sm:$0xff] }
 0x291   :  { %v3112_v36 = vpop.eup %3111  ;;  %v954_v23 = vmul.f32 %v3110_v33, %v3106_v32  ;;  %v6099_v33 = vld [vmem:[#allocation52_spill] sm:$0xff] }
 0x292   :  { %v922_v51 = vadd.f32 1.0, %v3112_v36  ;;  %3119 = vrcp.f32 %v950_v42  ;;  %v6107_v36 = vld [vmem:[#allocation60_spill] sm:$0xff]  ;;  %v6110_v42 = vld [vmem:[#allocation63_spill] sm:$0xff] }
 0x293   :  { %v4402_v27 = vadd.f32 %v954_v23, %v953_v49  ;;  %v6098_v49 = vld [vmem:[#allocation51_spill] sm:$0xff]  ;;  %v6108_v23 = vld [vmem:[#allocation61_spill] sm:$0xff] }
 0x295   :  { %3121 = vtanh.f32 %v4402_v27 }
 0x296   :  { %3123 = vrcp.f32 %v922_v51  ;;  %v6113_v51 = vld [vmem:[#allocation66_spill] sm:$0xff] }
 0x29a   :  { %v3114_v40 = vpop.eup %3113 }
 0x29b   :  { %v3116_v46 = vpop.eup %3115 }
 0x29c   :  { %v3118_v31 = vpop.eup %3117  ;;  %v926_v24 = vmul.f32 %v3116_v46, %v3114_v40  ;;  %v6109_v40 = vld [vmem:[#allocation62_spill] sm:$0xff]  ;;  %v6111_v46 = vld [vmem:[#allocation64_spill] sm:$0xff] }
 0x29d   :  { %v925_v25 = vmul.f32 %v3118_v31, %v4223_v60  ;;  %v6096_v60 = vld [vmem:[#allocation49_spill] sm:$0xff] }
 0x29e   :  { %v6112_v31 = vld [vmem:[#allocation65_spill] sm:$0xff] }
 0x29f   :  { %v4405_v19 = vadd.f32 %v926_v24, %v925_v25  ;;  %v3120_v2 = vpop.eup %3119  ;;  %v6114_v24 = vld [vmem:[#allocation67_spill] sm:$0xff]  ;;  %v6115_v25 = vld [vmem:[#allocation68_spill] sm:$0xff] }
 0x2a1   :  { %3125 = vtanh.f32 %v4405_v19 }
 0x2a2   :  { %v3122_v21 = vpop.eup %3121 }
 0x2a3   :  { %v3124_v22 = vpop.eup %3123  ;;  %v957_v29 = vmul.f32 %v3122_v21, %v3120_v2  ;;  %v6116_v2 = vld [vmem:[#allocation69_spill] sm:$0xff]  ;;  %v6117_v21 = vld [vmem:[#allocation70_spill] sm:$0xff] }
 0x2ae   :  { %v3126_v26 = vpop.eup %3125 }
 0x2af   :  { %v4409_v30 = vmul.f32 %v3126_v26, %v3124_v22  ;;  %v6118_v22 = vld [vmem:[#allocation72_spill] sm:$0xff]  ;;  %v6119_v26 = vld [vmem:[#allocation71_spill] sm:$0xff] }
 0x2b1   :  { %v4412_v32 = vadd.f32 %v957_v29, %v4409_v30  ;;  %v6120_v29 = vld [vmem:[#allocation74_spill] sm:$0xff] }
 0x2b3   :  { %1024 = vmatmul.mubr.f32.vlgmr.msra.gmra.mxu0 %v4412_v32  ;;  %1095 = vmatmul.mubr.f32.vlgmr.msra.gmra.mxu1 %v4412_v32 }
 0x2b4   :  { %1102 = vmatpush1.msra.mxu0 %v3931_v62  ;;  %1173 = vmatpush1.msra.mxu1 %v6014_v58  ;;  %v6100_v62 = vld [vmem:[#allocation53_spill] sm:$0xff]  ;;  %v6101_v58 = vld [vmem:[#allocation54_spill] sm:$0xff] }
 0x2b5   :  { %1103 = vmatprep.subr.mxu0 %v6015_v47  ;;  %1174 = vmatprep.subr.mxu1 %v6016_v56  ;;  %v6102_v47 = vld [vmem:[#allocation55_spill] sm:$0xff]  ;;  %v6103_v56 = vld [vmem:[#allocation56_spill] sm:$0xff] }
 0x2b6   :  { %1104 = vmatpush1.msra.mxu0 %v6017_v54  ;;  %1175 = vmatpush1.msra.mxu1 %v6018_v20  ;;  %v6104_v54 = vld [vmem:[#allocation57_spill] sm:$0xff]  ;;  %v6105_v20 = vld [vmem:[#allocation58_spill] sm:$0xff] }
 0x2b7   :  { %1105 = vmatprep.subr.mxu0 %v6019_v3  ;;  %1176 = vmatprep.subr.mxu1 %v6096_v60  ;;  %v6106_v3 = vld [vmem:[#allocation59_spill] sm:$0xff]  ;;  %v6121_v60 = vld [vmem:[#allocation73_spill] sm:$0xff] }
 0x2b8   :  { %1106 = vmatpush1.msra.mxu0 %v6097_v35  ;;  %1177 = vmatpush1.msra.mxu1 %v6098_v49  ;;  %v6122_v35 = vld [vmem:[#allocation76_spill] sm:$0xff]  ;;  %v6123_v49 = vld [vmem:[#allocation75_spill] sm:$0xff] }
 0x2b9   :  { %1107 = vmatprep.subr.mxu0 %v6099_v33  ;;  %1178 = vmatprep.subr.mxu1 %v6100_v62  ;;  %v6124_v33 = vld [vmem:[#allocation78_spill] sm:$0xff]  ;;  %v6125_v62 = vld [vmem:[#allocation77_spill] sm:$0xff] }
 0x2ba   :  { %1108 = vmatpush1.msra.mxu0 %v6101_v58  ;;  %1179 = vmatpush1.msra.mxu1 %v6102_v47  ;;  %v6126_v58 = vld [vmem:[#allocation80_spill] sm:$0xff]  ;;  %v6127_v47 = vld [vmem:[#allocation79_spill] sm:$0xff] }
 0x2bb   :  { %1109 = vmatprep.subr.mxu0 %v6103_v56  ;;  %1180 = vmatprep.subr.mxu1 %v6104_v54  ;;  %v6128_v56 = vld [vmem:[#allocation82_spill] sm:$0xff] }
 0x2bc   :  { %1110 = vmatpush1.msra.mxu0 %v6105_v20  ;;  %1181 = vmatpush1.msra.mxu1 %v6106_v3  ;;  %v4534_v54 = vld [vmem:[#allocation3 + $0x240] sm:$0xff]  ;;  %v4537_v20 = vld [vmem:[#allocation3 + $0x250] sm:$0xff]  ;;  %v4540_v3 = vld [vmem:[#allocation3 + $0x208] sm:$0xff] }
 0x2bd   :  { %1111 = vmatprep.subr.mxu0 %v6107_v36  ;;  %1182 = vmatprep.subr.mxu1 %v6108_v23  ;;  %v4543_v36 = vld [vmem:[#allocation3 + $0x218] sm:$0xff]  ;;  %v4546_v23 = vld [vmem:[#allocation3 + $0x200] sm:$0xff] }
 0x2be   :  { %1112 = vmatpush1.msra.mxu0 %v6109_v40  ;;  %1183 = vmatpush1.msra.mxu1 %v6110_v42  ;;  %6135 = vst [vmem:[#allocation45_spill] sm:$0xff] %v4543_v36  ;;  %6136 = vst [vmem:[#allocation46_spill] sm:$0xff] %v4546_v23  ;;  %v4549_v40 = vld [vmem:[#allocation3 + $0x210] sm:$0xff]  ;;  %v4552_v42 = vld [vmem:[#allocation3 + $0x1c8] sm:$0xff] }
 0x2bf   :  { %1113 = vmatprep.subr.mxu0 %v6111_v46  ;;  %1184 = vmatprep.subr.mxu1 %v6112_v31  ;;  %6137 = vst [vmem:[#allocation47_spill] sm:$0xff] %v4549_v40  ;;  %6138 = vst [vmem:[#allocation48_spill] sm:$0xff] %v4552_v42  ;;  %v4555_v46 = vld [vmem:[#allocation3 + $0x1d8] sm:$0xff]  ;;  %v4558_v31 = vld [vmem:[#allocation3 + $0x1c0] sm:$0xff] }
 0x2c0   :  { %1114 = vmatpush1.msra.mxu0 %v6113_v51  ;;  %1185 = vmatpush1.msra.mxu1 %v6114_v24  ;;  %6139 = vst [vmem:[#allocation81_spill] sm:$0xff] %v4555_v46  ;;  %6140 = vst [vmem:[#allocation84_spill] sm:$0xff] %v4558_v31  ;;  %v4561_v51 = vld [vmem:[#allocation3 + $0x1d0] sm:$0xff]  ;;  %v4564_v24 = vld [vmem:[#allocation3 + $0x188] sm:$0xff] }
 0x2c1   :  { %1115 = vmatprep.subr.mxu0 %v6115_v25  ;;  %1186 = vmatprep.subr.mxu1 %v6116_v2  ;;  %6141 = vst [vmem:[#allocation83_spill] sm:$0xff] %v4561_v51  ;;  %6142 = vst [vmem:[#allocation86_spill] sm:$0xff] %v4564_v24  ;;  %v4567_v25 = vld [vmem:[#allocation3 + $0x198] sm:$0xff]  ;;  %v4570_v2 = vld [vmem:[#allocation3 + $0x180] sm:$0xff] }
 0x2c2   :  { %1116 = vmatpush1.msra.mxu0 %v6117_v21  ;;  %1187 = vmatpush1.msra.mxu1 %v6118_v22  ;;  %6143 = vst [vmem:[#allocation85_spill] sm:$0xff] %v4567_v25  ;;  %6144 = vst [vmem:[#allocation88_spill] sm:$0xff] %v4570_v2  ;;  %v4573_v21 = vld [vmem:[#allocation3 + $0x190] sm:$0xff]  ;;  %v4576_v22 = vld [vmem:[#allocation3 + $0x148] sm:$0xff] }
 0x2c3   :  { %1117 = vmatprep.subr.mxu0 %v6119_v26  ;;  %1188 = vmatprep.subr.mxu1 %v6120_v29  ;;  %6145 = vst [vmem:[#allocation87_spill] sm:$0xff] %v4573_v21  ;;  %6146 = vst [vmem:[#allocation90_spill] sm:$0xff] %v4576_v22  ;;  %v4579_v26 = vld [vmem:[#allocation3 + $0x158] sm:$0xff]  ;;  %v4582_v29 = vld [vmem:[#allocation3 + $0x140] sm:$0xff] }
 0x2c4   :  { %1118 = vmatpush1.msra.mxu0 %v6121_v60  ;;  %1189 = vmatpush1.msra.mxu1 %v6122_v35  ;;  %6147 = vst [vmem:[#allocation89_spill] sm:$0xff] %v4579_v26  ;;  %6148 = vst [vmem:[#allocation92_spill] sm:$0xff] %v4582_v29  ;;  %v4585_v60 = vld [vmem:[#allocation3 + $0x150] sm:$0xff]  ;;  %v4588_v35 = vld [vmem:[#allocation3 + $0x108] sm:$0xff] }
 0x2c5   :  { %1119 = vmatprep.subr.mxu0 %v6123_v49  ;;  %1190 = vmatprep.subr.mxu1 %v6124_v33  ;;  %6149 = vst [vmem:[#allocation91_spill] sm:$0xff] %v4585_v60  ;;  %6150 = vst [vmem:[#allocation17_spill] sm:$0xff] %v4588_v35  ;;  %v4591_v49 = vld [vmem:[#allocation3 + $0x118] sm:$0xff]  ;;  %v4594_v33 = vld [vmem:[#allocation3 + $0x100] sm:$0xff] }
 0x2c6   :  { %1120 = vmatpush1.msra.mxu0 %v6125_v62  ;;  %1191 = vmatpush1.msra.mxu1 %v6126_v58  ;;  %6151 = vst [vmem:[#allocation23_spill] sm:$0xff] %v4591_v49  ;;  %6152 = vst [vmem:[#allocation18_spill] sm:$0xff] %v4594_v33  ;;  %v4597_v62 = vld [vmem:[#allocation3 + $0x110] sm:$0xff]  ;;  %v4600_v58 = vld [vmem:[#allocation3 + $0xc8] sm:$0xff] }
 0x2c7   :  { %1121 = vmatprep.subr.mxu0 %v6127_v47  ;;  %1192 = vmatprep.subr.mxu1 %v6128_v56  ;;  %6153 = vst [vmem:[#allocation25_spill] sm:$0xff] %v4597_v62  ;;  %6154 = vst [vmem:[#allocation19_spill] sm:$0xff] %v4600_v58  ;;  %v4603_v47 = vld [vmem:[#allocation3 + $0xd8] sm:$0xff]  ;;  %v4606_v56 = vld [vmem:[#allocation3 + $0xc0] sm:$0xff] }
 0x2c8   :  { %1122 = vmatpush1.msra.mxu0 %v6053_v4  ;;  %1193 = vmatpush1.msra.mxu1 %v6054_v5  ;;  %v6129_v4 = vld [vmem:[#allocation93_spill] sm:$0xff]  ;;  %v6130_v5 = vld [vmem:[#allocation94_spill] sm:$0xff]  ;;  %6155 = vst [vmem:[#allocation27_spill] sm:$0xff] %v4603_v47  ;;  %6156 = vst [vmem:[#allocation20_spill] sm:$0xff] %v4606_v56 }
 0x2c9   :  { %1123 = vmatprep.subr.mxu0 %v6055_v7  ;;  %1194 = vmatprep.subr.mxu1 %v6056_v41  ;;  %v6131_v7 = vld [vmem:[#allocation95_spill] sm:$0xff]  ;;  %v4511_v41 = vld [vmem:[#allocation3 + $0x310] sm:$0xff] }
 0x2ca   :  { %1124 = vmatpush1.msra.mxu0 %v6057_v12  ;;  %1195 = vmatpush1.msra.mxu1 %v6058_v61  ;;  %v4515_v12 = vld [vmem:[#allocation3 + $0x2d8] sm:$0xff]  ;;  %v4519_v61 = vld [vmem:[#allocation3 + $0x2d0] sm:$0xff] }
 0x2cb   :  { %1125 = vmatprep.subr.mxu0 %v6059_v6  ;;  %1196 = vmatprep.subr.mxu1 %v6060_v15  ;;  %v4523_v6 = vld [vmem:[#allocation3 + $0x298] sm:$0xff]  ;;  %v6133_v15 = vld [vmem:[#allocation43_spill] sm:$0xff] }
 0x2cc   :  { %1126 = vmatpush1.msra.mxu0 %v6061_v17  ;;  %1197 = vmatpush1.msra.mxu1 %v6062_v44  ;;  %v4527_v17 = vld [vmem:[#allocation3 + $0x290] sm:$0xff] }
 0x2cd   :  { %1127 = vmatprep.subr.mxu0 %v6063_v8  ;;  %1198 = vmatprep.subr.mxu1 %v4085_v38  ;;  %v6132_v38 = vld [vmem:[#allocation96_spill] sm:$0xff]  ;;  %v4507_v8 = vld [vmem:[#allocation3 + $0x318] sm:$0xff] }
 0x2ce   :  { %1128 = vmatpush1.msra.mxu0 %v4082_v59  ;;  %1199 = vmatpush1.msra.mxu1 %v4091_v55  ;;  %v4483_v59 = vld [vmem:[#allocation3 + $0x3d8] sm:$0xff]  ;;  %v6134_v44 = vld [vmem:[#allocation44_spill] sm:$0xff] }
 0x2cf   :  { %1129 = vmatprep.subr.mxu0 %v4088_v53  ;;  %1200 = vmatprep.subr.mxu1 %v6129_v4  ;;  %v4495_v53 = vld [vmem:[#allocation3 + $0x390] sm:$0xff]  ;;  %v4499_v55 = vld [vmem:[#allocation3 + $0x358] sm:$0xff] }
 0x2d0   :  { %1130 = vmatpush1.msra.mxu0 %v4094_v57  ;;  %1201 = vmatpush1.msra.mxu1 %v4103_v0  ;;  %v4487_v0 = vld [vmem:[#allocation3 + $0x3d0] sm:$0xff] }
 0x2d1   :  { %1131 = vmatprep.subr.mxu0 %v6130_v5  ;;  %1202 = vmatprep.subr.mxu1 %v4109_v34  ;;  %v4491_v34 = vld [vmem:[#allocation3 + $0x398] sm:$0xff]  ;;  %v4503_v57 = vld [vmem:[#allocation3 + $0x350] sm:$0xff]  ;;  %v4612_v5 = vld [vmem:[#allocation3 + $0x88] sm:$0xff] }
 0x2d2   :  { %1132 = vmatpush1.msra.mxu0 %v6131_v7  ;;  %1165 = vmatprep.mubr.f32.mxu0 %v5965_v37  ;;  %v4609_v4 = vld [vmem:[#allocation3 + $0xd0] sm:$0xff]  ;;  %6158 = vst [vmem:[#allocation21_spill] sm:$0xff] %v4612_v5  ;;  %v4615_v7 = vld [vmem:[#allocation3 + $0x98] sm:$0xff] }
 0x2d3   :  { %1203 = vmatpush1.msra.mxu1 %v6132_v38  ;;  %1236 = vmatprep.mubr.f32.mxu1 %v5965_v37  ;;  %6157 = vst [vmem:[#allocation29_spill] sm:$0xff] %v4609_v4  ;;  %6159 = vst [vmem:[#allocation31_spill] sm:$0xff] %v4615_v7  ;;  %v4618_v38 = vld [vmem:[#allocation3 + $0x80] sm:$0xff] }
 0x2d4   :  { %1166 = vmatmul.mubr.f32.vlgmr.msra.gmra.mxu0 %v4412_v32  ;;  %1237 = vmatmul.mubr.f32.vlgmr.msra.gmra.mxu1 %v4412_v32  ;;  %v4531_v32 = vld [vmem:[#allocation3 + $0x258] sm:$0xff]  ;;  %6160 = vst [vmem:[#allocation22_spill] sm:$0xff] %v4618_v38 }
 0x2d5   :  { %1300 = vmatprep.subr.mxu0 %v4299_v48  ;;  %1371 = vmatprep.subr.mxu1 %v4483_v59 }
 0x2d6   :  { %1301 = vmatpush1.msra.mxu0 %v4303_v63  ;;  %1372 = vmatpush1.msra.mxu1 %v4487_v0 }
 0x2d7   :  { %1302 = vmatprep.subr.mxu0 %v4307_v52  ;;  %1373 = vmatprep.subr.mxu1 %v4491_v34 }
 0x2d8   :  { %1303 = vmatpush1.msra.mxu0 %v4311_v43  ;;  %1374 = vmatpush1.msra.mxu1 %v4495_v53 }
 0x2d9   :  { %1304 = vmatprep.subr.mxu0 %v4315_v10  ;;  %1375 = vmatprep.subr.mxu1 %v4499_v55 }
 0x2da   :  { %1305 = vmatpush1.msra.mxu0 %v4319_v9  ;;  %1376 = vmatpush1.msra.mxu1 %v4503_v57 }
 0x2db   :  { %1306 = vmatprep.subr.mxu0 %v4323_v11  ;;  %1377 = vmatprep.subr.mxu1 %v4507_v8 }
 0x2dc   :  { %1307 = vmatpush1.msra.mxu0 %v4327_v13  ;;  %1378 = vmatpush1.msra.mxu1 %v4511_v41 }
 0x2dd   :  { %1308 = vmatprep.subr.mxu0 %v4331_v14  ;;  %1379 = vmatprep.subr.mxu1 %v4515_v12 }
 0x2de   :  { %1309 = vmatpush1.msra.mxu0 %v4335_v16  ;;  %1380 = vmatpush1.msra.mxu1 %v4519_v61 }
 0x2df   :  { %1310 = vmatprep.subr.mxu0 %v4339_v18  ;;  %1381 = vmatprep.subr.mxu1 %v4523_v6 }
 0x2e0   :  { %1311 = vmatpush1.msra.mxu0 %v6133_v15  ;;  %1382 = vmatpush1.msra.mxu1 %v4527_v17 }
 0x2e1   :  { %1312 = vmatprep.subr.mxu0 %v6134_v44  ;;  %1383 = vmatprep.subr.mxu1 %v4531_v32 }
 0x2e2   :  { %1313 = vmatpush1.msra.mxu0 %v4534_v54  ;;  %1384 = vmatpush1.msra.mxu1 %v4537_v20 }
 0x2e3   :  { %1314 = vmatprep.subr.mxu0 %v4540_v3  ;;  %1385 = vmatprep.subr.mxu1 %v4543_v36 }
 0x2e4   :  { %1315 = vmatpush1.msra.mxu0 %v4546_v23  ;;  %1386 = vmatpush1.msra.mxu1 %v4549_v40 }
 0x2e5   :  { %1316 = vmatprep.subr.mxu0 %v4552_v42  ;;  %1387 = vmatprep.subr.mxu1 %v4555_v46 }
 0x2e6   :  { %1317 = vmatpush1.msra.mxu0 %v4558_v31  ;;  %1388 = vmatpush1.msra.mxu1 %v4561_v51 }
 0x2e7   :  { %1318 = vmatprep.subr.mxu0 %v4564_v24  ;;  %1389 = vmatprep.subr.mxu1 %v4567_v25 }
 0x2e8   :  { %1319 = vmatpush1.msra.mxu0 %v4570_v2  ;;  %1390 = vmatpush1.msra.mxu1 %v4573_v21 }
 0x2e9   :  { %1320 = vmatprep.subr.mxu0 %v4576_v22  ;;  %1391 = vmatprep.subr.mxu1 %v4579_v26 }
 0x2ea   :  { %1321 = vmatpush1.msra.mxu0 %v4582_v29  ;;  %1392 = vmatpush1.msra.mxu1 %v4585_v60 }
 0x2eb   :  { %1322 = vmatprep.subr.mxu0 %v4588_v35  ;;  %1393 = vmatprep.subr.mxu1 %v4591_v49 }
 0x2ec   :  { %1323 = vmatpush1.msra.mxu0 %v4594_v33  ;;  %1394 = vmatpush1.msra.mxu1 %v4597_v62  ;;  %v6173_v62 = vld [vmem:[#allocation97_spill] sm:$0xff] }
 0x2ed   :  { %1324 = vmatprep.subr.mxu0 %v4600_v58  ;;  %1395 = vmatprep.subr.mxu1 %v4603_v47  ;;  %v4621_v47 = vld [vmem:[#allocation3 + $0x90] sm:$0xff] }
 0x2ee   :  { %1325 = vmatpush1.msra.mxu0 %v4606_v56  ;;  %1396 = vmatpush1.msra.mxu1 %v4609_v4  ;;  %6161 = vst [vmem:[#allocation33_spill] sm:$0xff] %v4621_v47  ;;  %v4624_v56 = vld [vmem:[#allocation3 + $0x48] sm:$0xff]  ;;  %v4627_v4 = vld [vmem:[#allocation3 + $0x58] sm:$0xff]  ;;  %v6172_v58 = vld [vmem:[#allocation16_spill] sm:$0xff] }
 0x2ef   :  { %1326 = vmatprep.subr.mxu0 %v4612_v5  ;;  %1397 = vmatprep.subr.mxu1 %v4615_v7  ;;  %6162 = vst [vmem:[#allocation24_spill] sm:$0xff] %v4624_v56  ;;  %6163 = vst [vmem:[#allocation35_spill] sm:$0xff] %v4627_v4  ;;  %v4630_v5 = vld [vmem:[#allocation3 + $0x40] sm:$0xff]  ;;  %v4633_v7 = vld [vmem:[#allocation3 + $0x50] sm:$0xff] }
 0x2f0   :  { %1327 = vmatpush1.msra.mxu0 %v4618_v38  ;;  %1398 = vmatpush1.msra.mxu1 %v4621_v47  ;;  %6164 = vst [vmem:[#allocation26_spill] sm:$0xff] %v4630_v5  ;;  %6165 = vst [vmem:[#allocation37_spill] sm:$0xff] %v4633_v7  ;;  %v4636_v38 = vld [vmem:[#allocation3 + $0x8] sm:$0xff]  ;;  %v4639_v47 = vld [vmem:[#allocation3 + $0x18] sm:$0xff] }
 0x2f1   :  { %1328 = vmatprep.subr.mxu0 %v4624_v56  ;;  %1399 = vmatprep.subr.mxu1 %v4627_v4  ;;  %6166 = vst [vmem:[#allocation28_spill] sm:$0xff] %v4636_v38  ;;  %6167 = vst [vmem:[#allocation38_spill] sm:$0xff] %v4639_v47  ;;  %v4642_v56 = vld [vmem:[#allocation3] sm:$0xff]  ;;  %v4645_v4 = vld [vmem:[#allocation3 + $0x10] sm:$0xff] }
 0x2f2   :  { %1329 = vmatpush1.msra.mxu0 %v4630_v5  ;;  %1400 = vmatpush1.msra.mxu1 %v4633_v7  ;;  %6168 = vst [vmem:[#allocation30_spill] sm:$0xff] %v4642_v56  ;;  %6169 = vst [vmem:[#allocation39_spill] sm:$0xff] %v4645_v4  ;;  %v4650_v7 = vld [vmem:[#allocation3 + $0x3e8] sm:$0xff] }
 0x2f3   :  { %1330 = vmatprep.subr.mxu0 %v4636_v38  ;;  %1401 = vmatprep.subr.mxu1 %v4639_v47  ;;  %6170 = vst [vmem:[#allocation32_spill] sm:$0xff] %v4650_v7  ;;  %v4653_v38 = vld [vmem:[#allocation3 + $0x3f8] sm:$0xff] }
 0x2f4   :  { %1331 = vmatpush1.msra.mxu0 %v4642_v56  ;;  %1402 = vmatpush1.msra.mxu1 %v4645_v4  ;;  %6171 = vst [vmem:[#allocation40_spill] sm:$0xff] %v4653_v38 }
 0x2f5   :  { %1364 = vmatprep.mubr.f32.mxu0 %v5965_v37  ;;  %1435 = vmatprep.mubr.f32.mxu1 %v5965_v37 }
 0x2f6   :  { %1442 = vmatprep.subr.mxu0 %v4650_v7  ;;  %1513 = vmatprep.subr.mxu1 %v4653_v38  ;;  %v6174_v7 = vld [vmem:[#allocation98_spill] sm:$0xff] }
 0x373   :  { %v1025_v47 = vpop.f32.mrf.mxu0  ;;  %v1096_v29 = vpop.f32.mrf.mxu1 }
 0x374   :  { %v1271_v33 = vadd.f32 %v1025_v47, %v6173_v62 }
 0x375   :  { %v1027_v5 = vpop.f32.mrf.mxu0  ;;  %v1098_v22 = vpop.f32.mrf.mxu1 }
 0x376   :  { %v1272_v56 = vadd.f32 %v1027_v5, %v6172_v58  ;;  %v1275_v4 = vsub.f32 0.0, %v1271_v33  ;;  %v1273_v58 = vadd.f32 %v1096_v29, %v4213_v39 }
 0x378   :  { %v1281_v49 = vsub.f32 0.0, %v1272_v56  ;;  %v1276_v60 = vmul.f32 1.442695, %v1275_v4 }
 0x37a   :  { %v1282_v35 = vmul.f32 1.442695, %v1281_v49  ;;  %v1274_v49 = vadd.f32 %v1098_v22, %v4206_v1 }
 0x37c   :  { %3127 = vpow2.f32 %v1282_v35  ;;  %v1288_v4 = vsub.f32 0.0, %v1274_v49 }
 0x37d   :  { %3129 = vpow2.f32 %v1276_v60 }
 0x389   :  { %v3128_v33 = vpop.eup %3127 }
 0x38a   :  { %v3130_v35 = vpop.eup %3129  ;;  %v1284_v62 = vadd.f32 1.0, %v3128_v33 }
 0x394   :  { %v1167_v26 = vpop.f32.mrf.mxu0  ;;  %v1238_v38 = vpop.f32.mrf.mxu1 }
 0x395   :  { %v1243_v21 = vadd.f32 %v1167_v26, %v6174_v7  ;;  %v1278_v7 = vadd.f32 1.0, %v3130_v35 }
 0x396   :  { %v1169_v2 = vpop.f32.mrf.mxu0  ;;  %v1240_v56 = vpop.f32.mrf.mxu1 }
 0x397   :  { %v1247_v25 = vsub.f32 0.0, %v1243_v21  ;;  %v1244_v24 = vadd.f32 %v1169_v2, %v6095_v28  ;;  %v1246_v60 = vadd.f32 %v1240_v56, %v4208_v50  ;;  %v1289_v21 = vmul.f32 1.442695, %v1288_v4 }
 0x399   :  { %v1248_v51 = vmul.f32 1.442695, %v1247_v25  ;;  %v1253_v5 = vsub.f32 0.0, %v1244_v24  ;;  %v1260_v26 = vsub.f32 0.0, %v1246_v60  ;;  %v1245_v24 = vadd.f32 %v1238_v38, %v4215_v45 }
 0x39b   :  { %3131 = vpow2.f32 %v1248_v51  ;;  %v1254_v47 = vmul.f32 1.442695, %v1253_v5  ;;  %v1261_v25 = vmul.f32 1.442695, %v1260_v26 }
 0x39d   :  { %3133 = vpow2.f32 %v1254_v47 }
 0x39e   :  { %3135 = vrcp.f32 %v1284_v62 }
 0x39f   :  { %3137 = vrcp.f32 %v1278_v7 }
 0x3a0   :  { %3139 = vpow2.f32 %v1289_v21 }
 0x3a1   :  { %3141 = vtanh.f32 %v1273_v58 }
 0x3a2   :  { %3143 = vpow2.f32 %v1261_v25 }
 0x3a8   :  { %v3132_v51 = vpop.eup %3131 }
 0x3a9   :  { %v1250_v2 = vadd.f32 1.0, %v3132_v51 }
 0x3aa   :  { %v3134_v22 = vpop.eup %3133 }
 0x3ab   :  { %3145 = vrcp.f32 %v1250_v2  ;;  %v1256_v5 = vadd.f32 1.0, %v3134_v22  ;;  %v3136_v47 = vpop.eup %3135 }
 0x3ac   :  { %3147 = vtanh.f32 %v1245_v24  ;;  %v3138_v56 = vpop.eup %3137  ;;  %v1294_v29 = vmul.f32 %v3136_v47, %v4402_v27 }
 0x3ad   :  { %3149 = vrcp.f32 %v1256_v5  ;;  %v3140_v49 = vpop.eup %3139  ;;  %v2835_v5 = vrot.slane %v4409_v30, 7  ;;  %v4683_v30 = vld [vmem:[#allocation3 + $0x3f0] sm:$0xff] }
 0x3ae   :  { %v3142_v62 = vpop.eup %3141  ;;  %v1291_v35 = vadd.f32 1.0, %v3140_v49 }
 0x3af   :  { %v3144_v33 = vpop.eup %3143  ;;  %v1295_v7 = vmul.f32 %v3142_v62, %v3138_v56 }
 0x3b0   :  { %v1263_v26 = vadd.f32 1.0, %v3144_v33  ;;  %3151 = vrcp.f32 %v1291_v35  ;;  %v4689_v35 = vld [vmem:[#allocation3 + $0x3b8] sm:$0xff] }
 0x3b1   :  { %v4665_v38 = vadd.f32 %v1295_v7, %v1294_v29  ;;  %v6175_v29 = vld [vmem:[#allocation104_spill] sm:$0xff]  ;;  %v4680_v7 = vld [vmem:[#allocation3 + $0x3e0] sm:$0xff] }
 0x3b2   :  { %v2856_v62 = vsel %vm2855_vm0, %v6175_v29, %v2835_v5  ;;  %v4719_v5 = vld [vmem:[#allocation3 + $0x330] sm:$0xff] }
 0x3b3   :  { %3153 = vtanh.f32 %v4665_v38  ;;  %6176 = vst [vmem:[#allocation34_spill] sm:$0xff] %v4719_v5  ;;  %v4731_v29 = vld [vmem:[#allocation3 + $0x2f0] sm:$0xff] }
 0x3b4   :  { %3155 = vrcp.f32 %v1263_v26  ;;  %v4698_v26 = vld [vmem:[#allocation3 + $0x368] sm:$0xff]  ;;  %6180 = vst [vmem:[#allocation49_spill] sm:$0xff] %v4731_v29 }
 0x3b8   :  { %v3146_v60 = vpop.eup %3145 }
 0x3b9   :  { %v3148_v4 = vpop.eup %3147 }
 0x3ba   :  { %v3150_v58 = vpop.eup %3149  ;;  %v1267_v21 = vmul.f32 %v3148_v4, %v3146_v60  ;;  %v4686_v60 = vld [vmem:[#allocation3 + $0x3a8] sm:$0xff]  ;;  %v4692_v4 = vld [vmem:[#allocation3 + $0x3a0] sm:$0xff] }
 0x3bb   :  { %v1266_v25 = vmul.f32 %v3150_v58, %v4405_v19  ;;  %v4695_v58 = vld [vmem:[#allocation3 + $0x3b0] sm:$0xff] }
 0x3bd   :  { %v4668_v51 = vadd.f32 %v1267_v21, %v1266_v25  ;;  %v3152_v27 = vpop.eup %3151  ;;  %v4701_v21 = vld [vmem:[#allocation3 + $0x378] sm:$0xff]  ;;  %v4704_v25 = vld [vmem:[#allocation3 + $0x360] sm:$0xff] }
 0x3bf   :  { %3157 = vtanh.f32 %v4668_v51 }
 0x3c0   :  { %v3154_v24 = vpop.eup %3153 }
 0x3c1   :  { %v3156_v2 = vpop.eup %3155  ;;  %v1298_v56 = vmul.f32 %v3154_v24, %v3152_v27  ;;  %v4707_v27 = vld [vmem:[#allocation3 + $0x370] sm:$0xff]  ;;  %v4710_v24 = vld [vmem:[#allocation3 + $0x328] sm:$0xff] }
 0x3cc   :  { %v3158_v22 = vpop.eup %3157 }
 0x3cd   :  { %v1270_v47 = vmul.f32 %v3158_v22, %v3156_v2  ;;  %v4713_v2 = vld [vmem:[#allocation3 + $0x338] sm:$0xff]  ;;  %v4716_v22 = vld [vmem:[#allocation3 + $0x320] sm:$0xff] }
 0x3cf   :  { %v4673_v49 = vadd.f32 %v1298_v56, %v1270_v47  ;;  %v2838_v19 = vrot.slane %v1270_v47, 6  ;;  %v4722_v47 = vld [vmem:[#allocation3 + $0x2e8] sm:$0xff]  ;;  %v4725_v56 = vld [vmem:[#allocation3 + $0x2f8] sm:$0xff] }
 0x3d0   :  { %6177 = vst [vmem:[#allocation41_spill] sm:$0xff] %v4722_v47  ;;  %6178 = vst [vmem:[#allocation36_spill] sm:$0xff] %v4725_v56 }
 0x3d1   :  { %1365 = vmatmul.mubr.f32.vlgmr.msra.gmra.mxu0 %v4673_v49  ;;  %v4677_v33 = vsel %vm2857_vm1, %v2856_v62, %v2838_v19  ;;  %1436 = vmatmul.mubr.f32.vlgmr.msra.gmra.mxu1 %v4673_v49  ;;  %v4728_v19 = vld [vmem:[#allocation3 + $0x2e0] sm:$0xff]  ;;  %v4734_v62 = vld [vmem:[#allocation3 + $0x2a8] sm:$0xff] }
 0x3d2   :  { %1443 = vmatpush1.msra.mxu0 %v4680_v7  ;;  %1514 = vmatpush1.msra.mxu1 %v4683_v30  ;;  %6179 = vst [vmem:[#allocation42_spill] sm:$0xff] %v4728_v19  ;;  %6181 = vst [vmem:[#allocation50_spill] sm:$0xff] %v4734_v62 }
 0x3d3   :  { %1444 = vmatprep.subr.mxu0 %v4686_v60  ;;  %1515 = vmatprep.subr.mxu1 %v4689_v35 }
 0x3d4   :  { %1445 = vmatpush1.msra.mxu0 %v4692_v4  ;;  %1516 = vmatpush1.msra.mxu1 %v4695_v58 }
 0x3d5   :  { %1446 = vmatprep.subr.mxu0 %v4698_v26  ;;  %1517 = vmatprep.subr.mxu1 %v4701_v21 }
 0x3d6   :  { %1447 = vmatpush1.msra.mxu0 %v4704_v25  ;;  %1518 = vmatpush1.msra.mxu1 %v4707_v27 }
 0x3d7   :  { %1448 = vmatprep.subr.mxu0 %v4710_v24  ;;  %1519 = vmatprep.subr.mxu1 %v4713_v2 }
 0x3d8   :  { %1449 = vmatpush1.msra.mxu0 %v4716_v22  ;;  %1520 = vmatpush1.msra.mxu1 %v4719_v5  ;;  %v4737_v5 = vld [vmem:[#allocation3 + $0x2b8] sm:$0xff] }
 0x3d9   :  { %1450 = vmatprep.subr.mxu0 %v4722_v47  ;;  %1521 = vmatprep.subr.mxu1 %v4725_v56  ;;  %6182 = vst [vmem:[#allocation51_spill] sm:$0xff] %v4737_v5  ;;  %v4740_v47 = vld [vmem:[#allocation3 + $0x2a0] sm:$0xff]  ;;  %v4743_v56 = vld [vmem:[#allocation3 + $0x2b0] sm:$0xff] }
 0x3da   :  { %1451 = vmatpush1.msra.mxu0 %v4728_v19  ;;  %1522 = vmatpush1.msra.mxu1 %v4731_v29  ;;  %6183 = vst [vmem:[#allocation52_spill] sm:$0xff] %v4740_v47  ;;  %6184 = vst [vmem:[#allocation53_spill] sm:$0xff] %v4743_v56  ;;  %v4746_v19 = vld [vmem:[#allocation3 + $0x268] sm:$0xff]  ;;  %v4749_v29 = vld [vmem:[#allocation3 + $0x278] sm:$0xff] }
 0x3db   :  { %1452 = vmatprep.subr.mxu0 %v4734_v62  ;;  %1523 = vmatprep.subr.mxu1 %v4737_v5  ;;  %6185 = vst [vmem:[#allocation54_spill] sm:$0xff] %v4746_v19  ;;  %6186 = vst [vmem:[#allocation55_spill] sm:$0xff] %v4749_v29  ;;  %v4752_v62 = vld [vmem:[#allocation3 + $0x260] sm:$0xff]  ;;  %v4755_v5 = vld [vmem:[#allocation3 + $0x270] sm:$0xff] }
 0x3dc   :  { %1453 = vmatpush1.msra.mxu0 %v4740_v47  ;;  %1524 = vmatpush1.msra.mxu1 %v4743_v56  ;;  %6187 = vst [vmem:[#allocation56_spill] sm:$0xff] %v4752_v62  ;;  %6188 = vst [vmem:[#allocation57_spill] sm:$0xff] %v4755_v5  ;;  %v4758_v47 = vld [vmem:[#allocation3 + $0x228] sm:$0xff]  ;;  %v4761_v56 = vld [vmem:[#allocation3 + $0x238] sm:$0xff] }
 0x3dd   :  { %1454 = vmatprep.subr.mxu0 %v4746_v19  ;;  %1525 = vmatprep.subr.mxu1 %v4749_v29  ;;  %6189 = vst [vmem:[#allocation58_spill] sm:$0xff] %v4758_v47  ;;  %6190 = vst [vmem:[#allocation59_spill] sm:$0xff] %v4761_v56  ;;  %v4764_v19 = vld [vmem:[#allocation3 + $0x220] sm:$0xff]  ;;  %v4767_v29 = vld [vmem:[#allocation3 + $0x230] sm:$0xff] }
 0x3de   :  { %1455 = vmatpush1.msra.mxu0 %v4752_v62  ;;  %1526 = vmatpush1.msra.mxu1 %v4755_v5  ;;  %6191 = vst [vmem:[#allocation60_spill] sm:$0xff] %v4764_v19  ;;  %6192 = vst [vmem:[#allocation61_spill] sm:$0xff] %v4767_v29  ;;  %v4770_v62 = vld [vmem:[#allocation3 + $0x1e8] sm:$0xff]  ;;  %v4773_v5 = vld [vmem:[#allocation3 + $0x1f8] sm:$0xff] }
 0x3df   :  { %1456 = vmatprep.subr.mxu0 %v4758_v47  ;;  %1527 = vmatprep.subr.mxu1 %v4761_v56  ;;  %6193 = vst [vmem:[#allocation62_spill] sm:$0xff] %v4770_v62  ;;  %6194 = vst [vmem:[#allocation63_spill] sm:$0xff] %v4773_v5  ;;  %v4776_v47 = vld [vmem:[#allocation3 + $0x1e0] sm:$0xff]  ;;  %v4779_v56 = vld [vmem:[#allocation3 + $0x1f0] sm:$0xff] }
 0x3e0   :  { %1457 = vmatpush1.msra.mxu0 %v4764_v19  ;;  %1528 = vmatpush1.msra.mxu1 %v4767_v29  ;;  %6195 = vst [vmem:[#allocation64_spill] sm:$0xff] %v4776_v47  ;;  %6196 = vst [vmem:[#allocation65_spill] sm:$0xff] %v4779_v56  ;;  %v4782_v19 = vld [vmem:[#allocation3 + $0x1a8] sm:$0xff]  ;;  %v4785_v29 = vld [vmem:[#allocation3 + $0x1b8] sm:$0xff] }
 0x3e1   :  { %1458 = vmatprep.subr.mxu0 %v4770_v62  ;;  %1529 = vmatprep.subr.mxu1 %v4773_v5  ;;  %6197 = vst [vmem:[#allocation66_spill] sm:$0xff] %v4782_v19  ;;  %6198 = vst [vmem:[#allocation67_spill] sm:$0xff] %v4785_v29  ;;  %v4788_v62 = vld [vmem:[#allocation3 + $0x1a0] sm:$0xff]  ;;  %v4791_v5 = vld [vmem:[#allocation3 + $0x1b0] sm:$0xff] }
 0x3e2   :  { %1459 = vmatpush1.msra.mxu0 %v4776_v47  ;;  %1530 = vmatpush1.msra.mxu1 %v4779_v56  ;;  %6199 = vst [vmem:[#allocation68_spill] sm:$0xff] %v4788_v62  ;;  %6200 = vst [vmem:[#allocation69_spill] sm:$0xff] %v4791_v5  ;;  %v4794_v47 = vld [vmem:[#allocation3 + $0x168] sm:$0xff]  ;;  %v4797_v56 = vld [vmem:[#allocation3 + $0x178] sm:$0xff] }
 0x3e3   :  { %1460 = vmatprep.subr.mxu0 %v4782_v19  ;;  %1531 = vmatprep.subr.mxu1 %v4785_v29  ;;  %6201 = vst [vmem:[#allocation70_spill] sm:$0xff] %v4794_v47  ;;  %6202 = vst [vmem:[#allocation72_spill] sm:$0xff] %v4797_v56  ;;  %v4800_v19 = vld [vmem:[#allocation3 + $0x160] sm:$0xff]  ;;  %v4803_v29 = vld [vmem:[#allocation3 + $0x170] sm:$0xff] }
 0x3e4   :  { %1461 = vmatpush1.msra.mxu0 %v4788_v62  ;;  %1532 = vmatpush1.msra.mxu1 %v4791_v5  ;;  %6203 = vst [vmem:[#allocation71_spill] sm:$0xff] %v4800_v19  ;;  %6204 = vst [vmem:[#allocation74_spill] sm:$0xff] %v4803_v29  ;;  %v4806_v62 = vld [vmem:[#allocation3 + $0x128] sm:$0xff]  ;;  %v4809_v5 = vld [vmem:[#allocation3 + $0x138] sm:$0xff] }
 0x3e5   :  { %1462 = vmatprep.subr.mxu0 %v4794_v47  ;;  %1533 = vmatprep.subr.mxu1 %v4797_v56  ;;  %6205 = vst [vmem:[#allocation73_spill] sm:$0xff] %v4806_v62  ;;  %6206 = vst [vmem:[#allocation76_spill] sm:$0xff] %v4809_v5  ;;  %v4812_v47 = vld [vmem:[#allocation3 + $0x120] sm:$0xff]  ;;  %v4815_v56 = vld [vmem:[#allocation3 + $0x130] sm:$0xff] }
 0x3e6   :  { %1463 = vmatpush1.msra.mxu0 %v4800_v19  ;;  %1534 = vmatpush1.msra.mxu1 %v4803_v29  ;;  %6207 = vst [vmem:[#allocation75_spill] sm:$0xff] %v4812_v47  ;;  %6208 = vst [vmem:[#allocation78_spill] sm:$0xff] %v4815_v56  ;;  %v4818_v19 = vld [vmem:[#allocation3 + $0xe8] sm:$0xff]  ;;  %v4821_v29 = vld [vmem:[#allocation3 + $0xf8] sm:$0xff] }
 0x3e7   :  { %1464 = vmatprep.subr.mxu0 %v4806_v62  ;;  %1535 = vmatprep.subr.mxu1 %v4809_v5  ;;  %6209 = vst [vmem:[#allocation77_spill] sm:$0xff] %v4818_v19  ;;  %6210 = vst [vmem:[#allocation80_spill] sm:$0xff] %v4821_v29  ;;  %v4824_v62 = vld [vmem:[#allocation3 + $0xe0] sm:$0xff]  ;;  %v4827_v5 = vld [vmem:[#allocation3 + $0xf0] sm:$0xff] }
 0x3e8   :  { %1465 = vmatpush1.msra.mxu0 %v4812_v47  ;;  %1536 = vmatpush1.msra.mxu1 %v4815_v56  ;;  %6211 = vst [vmem:[#allocation79_spill] sm:$0xff] %v4824_v62  ;;  %6212 = vst [vmem:[#allocation82_spill] sm:$0xff] %v4827_v5  ;;  %v4830_v47 = vld [vmem:[#allocation3 + $0xa8] sm:$0xff]  ;;  %v4833_v56 = vld [vmem:[#allocation3 + $0xb8] sm:$0xff] }
 0x3e9   :  { %1466 = vmatprep.subr.mxu0 %v4818_v19  ;;  %1537 = vmatprep.subr.mxu1 %v4821_v29  ;;  %6213 = vst [vmem:[#allocation93_spill] sm:$0xff] %v4830_v47  ;;  %6214 = vst [vmem:[#allocation94_spill] sm:$0xff] %v4833_v56  ;;  %v4836_v19 = vld [vmem:[#allocation3 + $0xa0] sm:$0xff]  ;;  %v4839_v29 = vld [vmem:[#allocation3 + $0xb0] sm:$0xff] }
 0x3ea   :  { %1467 = vmatpush1.msra.mxu0 %v4824_v62  ;;  %1538 = vmatpush1.msra.mxu1 %v4827_v5  ;;  %6215 = vst [vmem:[#allocation95_spill] sm:$0xff] %v4836_v19  ;;  %6216 = vst [vmem:[#allocation96_spill] sm:$0xff] %v4839_v29  ;;  %v4842_v62 = vld [vmem:[#allocation3 + $0x68] sm:$0xff]  ;;  %v4845_v5 = vld [vmem:[#allocation3 + $0x78] sm:$0xff] }
 0x3eb   :  { %1468 = vmatprep.subr.mxu0 %v4830_v47  ;;  %1539 = vmatprep.subr.mxu1 %v4833_v56  ;;  %6217 = vst [vmem:[#allocation43_spill] sm:$0xff] %v4842_v62  ;;  %6218 = vst [vmem:[#allocation44_spill] sm:$0xff] %v4845_v5  ;;  %v4848_v47 = vld [vmem:[#allocation3 + $0x60] sm:$0xff]  ;;  %v4851_v56 = vld [vmem:[#allocation3 + $0x70] sm:$0xff] }
 0x3ec   :  { %1469 = vmatpush1.msra.mxu0 %v4836_v19  ;;  %1540 = vmatpush1.msra.mxu1 %v4839_v29  ;;  %v4854_v19 = vld [vmem:[#allocation3 + $0x28] sm:$0xff]  ;;  %v4857_v29 = vld [vmem:[#allocation3 + $0x38] sm:$0xff] }
 0x3ed   :  { %1470 = vmatprep.subr.mxu0 %v4842_v62  ;;  %1541 = vmatprep.subr.mxu1 %v4845_v5  ;;  %6219 = vst [vmem:[#allocation104_spill] sm:$0xff] %v4854_v19  ;;  %v4860_v62 = vld [vmem:[#allocation3 + $0x20] sm:$0xff]  ;;  %v4864_v5 = vld [vmem:[#allocation3 + $0x30] sm:$0xff] }
 0x3ee   :  { %1471 = vmatpush1.msra.mxu0 %v4848_v47  ;;  %1542 = vmatpush1.msra.mxu1 %v4851_v56  ;;  %6220 = vst [vmem:[#allocation105_spill] sm:$0xff] %v4860_v62  ;;  %6221 = vst [vmem:[#allocation106_spill] sm:$0xff] %v4864_v5 }
 0x3ef   :  { %1472 = vmatprep.subr.mxu0 %v4854_v19  ;;  %1543 = vmatprep.subr.mxu1 %v4857_v29 }
 0x3f0   :  { %1473 = vmatpush1.msra.mxu0 %v4860_v62  ;;  %1506 = vmatprep.mubr.f32.mxu0 %v5965_v37 }
 0x3f1   :  { %1544 = vmatpush1.msra.mxu1 %v4864_v5  ;;  %1577 = vmatprep.mubr.f32.mxu1 %v5965_v37 }
 0x3f2   :  { %1507 = vmatmul.mubr.f32.vlgmr.msra.gmra.mxu0 %v4673_v49  ;;  %1578 = vmatmul.mubr.f32.vlgmr.msra.gmra.mxu1 %v4673_v49  ;;  %v6235_v49 = vld [vmem:[#allocation19_spill] sm:$0xff] }
 0x3f3   :  { %1641 = vmatprep.subr.mxu0 %v4299_v48  ;;  %1712 = vmatprep.subr.mxu1 %v4483_v59  ;;  %v6224_v48 = vld [vmem:[#allocation85_spill] sm:$0xff] }
 0x3f4   :  { %1642 = vmatpush1.msra.mxu0 %v4303_v63  ;;  %1713 = vmatpush1.msra.mxu1 %v4487_v0  ;;  %v6222_v63 = vld [vmem:[#allocation83_spill] sm:$0xff] }
 0x3f5   :  { %1643 = vmatprep.subr.mxu0 %v4307_v52  ;;  %1714 = vmatprep.subr.mxu1 %v4491_v34  ;;  %v6225_v52 = vld [vmem:[#allocation88_spill] sm:$0xff] }
 0x3f6   :  { %1644 = vmatpush1.msra.mxu0 %v4311_v43  ;;  %1715 = vmatpush1.msra.mxu1 %v4495_v53  ;;  %v6223_v43 = vld [vmem:[#allocation86_spill] sm:$0xff] }
 0x3f7   :  { %1645 = vmatprep.subr.mxu0 %v4315_v10  ;;  %1716 = vmatprep.subr.mxu1 %v4499_v55  ;;  %v6226_v10 = vld [vmem:[#allocation87_spill] sm:$0xff] }
 0x3f8   :  { %1646 = vmatpush1.msra.mxu0 %v4319_v9  ;;  %1717 = vmatpush1.msra.mxu1 %v4503_v57  ;;  %v6227_v9 = vld [vmem:[#allocation90_spill] sm:$0xff] }
 0x3f9   :  { %1647 = vmatprep.subr.mxu0 %v4323_v11  ;;  %1718 = vmatprep.subr.mxu1 %v4507_v8  ;;  %v6228_v11 = vld [vmem:[#allocation89_spill] sm:$0xff] }
 0x3fa   :  { %1648 = vmatpush1.msra.mxu0 %v4327_v13  ;;  %1719 = vmatpush1.msra.mxu1 %v4511_v41  ;;  %v6229_v13 = vld [vmem:[#allocation92_spill] sm:$0xff] }
 0x3fb   :  { %1649 = vmatprep.subr.mxu0 %v4331_v14  ;;  %1720 = vmatprep.subr.mxu1 %v4515_v12  ;;  %v6230_v14 = vld [vmem:[#allocation91_spill] sm:$0xff] }
 0x3fc   :  { %1650 = vmatpush1.msra.mxu0 %v4335_v16  ;;  %1721 = vmatpush1.msra.mxu1 %v4519_v61  ;;  %v6231_v16 = vld [vmem:[#allocation17_spill] sm:$0xff] }
 0x3fd   :  { %1651 = vmatprep.subr.mxu0 %v4339_v18  ;;  %1722 = vmatprep.subr.mxu1 %v4523_v6  ;;  %v6232_v18 = vld [vmem:[#allocation23_spill] sm:$0xff] }
 0x3fe   :  { %1652 = vmatpush1.msra.mxu0 %v6133_v15  ;;  %1723 = vmatpush1.msra.mxu1 %v4527_v17  ;;  %v6233_v15 = vld [vmem:[#allocation18_spill] sm:$0xff] }
 0x3ff   :  { %1653 = vmatprep.subr.mxu0 %v6134_v44  ;;  %1724 = vmatprep.subr.mxu1 %v4531_v32  ;;  %v6234_v44 = vld [vmem:[#allocation25_spill] sm:$0xff] }
 0x400   :  { %1654 = vmatpush1.msra.mxu0 %v4534_v54  ;;  %1725 = vmatpush1.msra.mxu1 %v4537_v20 }
 0x401   :  { %1655 = vmatprep.subr.mxu0 %v4540_v3  ;;  %1726 = vmatprep.subr.mxu1 %v4543_v36 }
 0x402   :  { %1656 = vmatpush1.msra.mxu0 %v4546_v23  ;;  %1727 = vmatpush1.msra.mxu1 %v4549_v40 }
 0x403   :  { %1657 = vmatprep.subr.mxu0 %v4552_v42  ;;  %1728 = vmatprep.subr.mxu1 %v4555_v46  ;;  %v6255_v46 = vld [vmem:[#allocation98_spill] sm:$0xff] }
 0x404   :  { %1658 = vmatpush1.msra.mxu0 %v4558_v31  ;;  %1729 = vmatpush1.msra.mxu1 %v6222_v63 }
 0x405   :  { %1659 = vmatprep.subr.mxu0 %v6223_v43  ;;  %1730 = vmatprep.subr.mxu1 %v6224_v48 }
 0x406   :  { %1660 = vmatpush1.msra.mxu0 %v6225_v52  ;;  %1731 = vmatpush1.msra.mxu1 %v6226_v10  ;;  %v6236_v52 = vld [vmem:[#allocation27_spill] sm:$0xff]  ;;  %v6237_v10 = vld [vmem:[#allocation20_spill] sm:$0xff] }
 0x407   :  { %1661 = vmatprep.subr.mxu0 %v6227_v9  ;;  %1732 = vmatprep.subr.mxu1 %v6228_v11  ;;  %v6238_v9 = vld [vmem:[#allocation29_spill] sm:$0xff] }
 0x408   :  { %1662 = vmatpush1.msra.mxu0 %v6229_v13  ;;  %1733 = vmatpush1.msra.mxu1 %v6230_v14  ;;  %v6239_v11 = vld [vmem:[#allocation21_spill] sm:$0xff]  ;;  %v6240_v13 = vld [vmem:[#allocation31_spill] sm:$0xff]  ;;  %v6241_v14 = vld [vmem:[#allocation22_spill] sm:$0xff] }
 0x409   :  { %1663 = vmatprep.subr.mxu0 %v6231_v16  ;;  %1734 = vmatprep.subr.mxu1 %v6232_v18  ;;  %v6242_v16 = vld [vmem:[#allocation33_spill] sm:$0xff]  ;;  %v6243_v18 = vld [vmem:[#allocation24_spill] sm:$0xff] }
 0x40a   :  { %1664 = vmatpush1.msra.mxu0 %v6233_v15  ;;  %1735 = vmatpush1.msra.mxu1 %v6234_v44  ;;  %v6244_v15 = vld [vmem:[#allocation35_spill] sm:$0xff]  ;;  %v6245_v44 = vld [vmem:[#allocation26_spill] sm:$0xff] }
 0x40b   :  { %1665 = vmatprep.subr.mxu0 %v6235_v49  ;;  %1736 = vmatprep.subr.mxu1 %v6236_v52  ;;  %v6246_v49 = vld [vmem:[#allocation37_spill] sm:$0xff]  ;;  %v6247_v52 = vld [vmem:[#allocation28_spill] sm:$0xff] }
 0x40c   :  { %1666 = vmatpush1.msra.mxu0 %v6237_v10  ;;  %1737 = vmatpush1.msra.mxu1 %v6238_v9  ;;  %v6248_v10 = vld [vmem:[#allocation38_spill] sm:$0xff] }
 0x40d   :  { %1667 = vmatprep.subr.mxu0 %v6239_v11  ;;  %1738 = vmatprep.subr.mxu1 %v6240_v13  ;;  %v6249_v9 = vld [vmem:[#allocation30_spill] sm:$0xff]  ;;  %v6250_v11 = vld [vmem:[#allocation39_spill] sm:$0xff]  ;;  %v6254_v13 = vld [vmem:[#allocation97_spill] sm:$0xff] }
 0x40e   :  { %1668 = vmatpush1.msra.mxu0 %v6241_v14  ;;  %1739 = vmatpush1.msra.mxu1 %v6242_v16  ;;  %v6251_v16 = vld [vmem:[#allocation32_spill] sm:$0xff] }
 0x40f   :  { %1669 = vmatprep.subr.mxu0 %v6243_v18  ;;  %1740 = vmatprep.subr.mxu1 %v6244_v15  ;;  %v6252_v18 = vld [vmem:[#allocation40_spill] sm:$0xff] }
 0x410   :  { %1670 = vmatpush1.msra.mxu0 %v6245_v44  ;;  %1741 = vmatpush1.msra.mxu1 %v6246_v49  ;;  %v6253_v14 = vld [vmem:[#allocation16_spill] sm:$0xff] }
 0x411   :  { %1671 = vmatprep.subr.mxu0 %v6247_v52  ;;  %1742 = vmatprep.subr.mxu1 %v6248_v10 }
 0x412   :  { %1672 = vmatpush1.msra.mxu0 %v6249_v9  ;;  %1743 = vmatpush1.msra.mxu1 %v6250_v11 }
 0x413   :  { %1705 = vmatprep.mubr.f32.mxu0 %v5965_v37  ;;  %1776 = vmatprep.mubr.f32.mxu1 %v5965_v37 }
 0x414   :  { %1783 = vmatprep.subr.mxu0 %v6251_v16  ;;  %1854 = vmatprep.subr.mxu1 %v6252_v18 }
 0x491   :  { %v1366_v15 = vpop.f32.mrf.mxu0  ;;  %v1437_v63 = vpop.f32.mrf.mxu1 }
 0x492   :  { %v1612_v52 = vadd.f32 %v1366_v15, %v6254_v13 }
 0x493   :  { %v1368_v44 = vpop.f32.mrf.mxu0  ;;  %v1439_v31 = vpop.f32.mrf.mxu1 }
 0x494   :  { %v1613_v49 = vadd.f32 %v1368_v44, %v6253_v14  ;;  %v1616_v10 = vsub.f32 0.0, %v1612_v52  ;;  %v1614_v14 = vadd.f32 %v1437_v63, %v4213_v39 }
 0x496   :  { %v1622_v48 = vsub.f32 0.0, %v1613_v49  ;;  %v1617_v9 = vmul.f32 1.442695, %v1616_v10 }
 0x498   :  { %v1623_v43 = vmul.f32 1.442695, %v1622_v48  ;;  %v1615_v48 = vadd.f32 %v1439_v31, %v4206_v1 }
 0x49a   :  { %3159 = vpow2.f32 %v1623_v43 }
 0x49b   :  { %3161 = vpow2.f32 %v1617_v9  ;;  %v1629_v9 = vsub.f32 0.0, %v1615_v48 }
 0x4a7   :  { %v3160_v52 = vpop.eup %3159 }
 0x4a8   :  { %v3162_v10 = vpop.eup %3161  ;;  %v1625_v13 = vadd.f32 1.0, %v3160_v52 }
 0x4b2   :  { %v1508_v11 = vpop.f32.mrf.mxu0  ;;  %v1579_v18 = vpop.f32.mrf.mxu1 }
 0x4b3   :  { %v1584_v42 = vadd.f32 %v1508_v11, %v6255_v46  ;;  %v1619_v46 = vadd.f32 1.0, %v3162_v10 }
 0x4b4   :  { %v1510_v16 = vpop.f32.mrf.mxu0  ;;  %v1581_v49 = vpop.f32.mrf.mxu1 }
 0x4b5   :  { %v1588_v40 = vsub.f32 0.0, %v1584_v42  ;;  %v1585_v23 = vadd.f32 %v1510_v16, %v6095_v28  ;;  %v1587_v43 = vadd.f32 %v1581_v49, %v4208_v50  ;;  %v1630_v42 = vmul.f32 1.442695, %v1629_v9 }
 0x4b7   :  { %v1589_v36 = vmul.f32 1.442695, %v1588_v40  ;;  %v1594_v44 = vsub.f32 0.0, %v1585_v23  ;;  %v1601_v11 = vsub.f32 0.0, %v1587_v43  ;;  %v1586_v23 = vadd.f32 %v1579_v18, %v4215_v45 }
 0x4b9   :  { %3163 = vpow2.f32 %v1589_v36  ;;  %v1595_v15 = vmul.f32 1.442695, %v1594_v44  ;;  %v1602_v40 = vmul.f32 1.442695, %v1601_v11 }
 0x4bb   :  { %3165 = vpow2.f32 %v1595_v15 }
 0x4bc   :  { %3167 = vrcp.f32 %v1625_v13 }
 0x4bd   :  { %3169 = vrcp.f32 %v1619_v46 }
 0x4be   :  { %3171 = vpow2.f32 %v1630_v42 }
 0x4bf   :  { %3173 = vtanh.f32 %v1614_v14 }
 0x4c0   :  { %3175 = vpow2.f32 %v1602_v40 }
 0x4c6   :  { %v3164_v36 = vpop.eup %3163 }
 0x4c7   :  { %v1591_v31 = vadd.f32 1.0, %v3164_v36 }
 0x4c8   :  { %v3166_v16 = vpop.eup %3165 }
 0x4c9   :  { %3177 = vrcp.f32 %v1591_v31  ;;  %v1597_v44 = vadd.f32 1.0, %v3166_v16  ;;  %v3168_v15 = vpop.eup %3167 }
 0x4ca   :  { %3179 = vtanh.f32 %v1586_v23  ;;  %v3170_v49 = vpop.eup %3169  ;;  %v1635_v63 = vmul.f32 %v3168_v15, %v4665_v38 }
 0x4cb   :  { %3181 = vrcp.f32 %v1597_v44  ;;  %v3172_v48 = vpop.eup %3171 }
 0x4cc   :  { %v3174_v13 = vpop.eup %3173  ;;  %v1632_v10 = vadd.f32 1.0, %v3172_v48 }
 0x4cd   :  { %v3176_v52 = vpop.eup %3175  ;;  %v1636_v46 = vmul.f32 %v3174_v13, %v3170_v49  ;;  %v6258_v13 = vld [vmem:[#allocation36_spill] sm:$0xff] }
 0x4ce   :  { %v1604_v11 = vadd.f32 1.0, %v3176_v52  ;;  %3183 = vrcp.f32 %v1632_v10  ;;  %v6259_v52 = vld [vmem:[#allocation42_spill] sm:$0xff]  ;;  %v6262_v10 = vld [vmem:[#allocation51_spill] sm:$0xff] }
 0x4cf   :  { %v4947_v18 = vadd.f32 %v1636_v46, %v1635_v63  ;;  %v6257_v63 = vld [vmem:[#allocation41_spill] sm:$0xff] }
 0x4d0   :  { %v6260_v46 = vld [vmem:[#allocation49_spill] sm:$0xff] }
 0x4d1   :  { %3185 = vtanh.f32 %v4947_v18 }
 0x4d2   :  { %3187 = vrcp.f32 %v1604_v11  ;;  %v6265_v11 = vld [vmem:[#allocation54_spill] sm:$0xff] }
 0x4d6   :  { %v3178_v43 = vpop.eup %3177 }
 0x4d7   :  { %v3180_v9 = vpop.eup %3179 }
 0x4d8   :  { %v3182_v14 = vpop.eup %3181  ;;  %v1608_v42 = vmul.f32 %v3180_v9, %v3178_v43  ;;  %v6261_v43 = vld [vmem:[#allocation50_spill] sm:$0xff]  ;;  %v6263_v9 = vld [vmem:[#allocation52_spill] sm:$0xff] }
 0x4d9   :  { %v1607_v40 = vmul.f32 %v3182_v14, %v4668_v51  ;;  %v6264_v14 = vld [vmem:[#allocation53_spill] sm:$0xff] }
 0x4db   :  { %v4950_v36 = vadd.f32 %v1608_v42, %v1607_v40  ;;  %v3184_v38 = vpop.eup %3183  ;;  %v6266_v42 = vld [vmem:[#allocation55_spill] sm:$0xff]  ;;  %v6267_v40 = vld [vmem:[#allocation56_spill] sm:$0xff] }
 0x4dd   :  { %3189 = vtanh.f32 %v4950_v36 }
 0x4de   :  { %v3186_v23 = vpop.eup %3185 }
 0x4df   :  { %v3188_v31 = vpop.eup %3187  ;;  %v1639_v15 = vmul.f32 %v3186_v23, %v3184_v38  ;;  %v6268_v38 = vld [vmem:[#allocation57_spill] sm:$0xff]  ;;  %v6269_v23 = vld [vmem:[#allocation58_spill] sm:$0xff] }
 0x4ea   :  { %v3190_v16 = vpop.eup %3189 }
 0x4eb   :  { %v1611_v44 = vmul.f32 %v3190_v16, %v3188_v31  ;;  %v6270_v31 = vld [vmem:[#allocation59_spill] sm:$0xff]  ;;  %v6271_v16 = vld [vmem:[#allocation60_spill] sm:$0xff] }
 0x4ed   :  { %v4954_v49 = vadd.f32 %v1639_v15, %v1611_v44  ;;  %v2841_v48 = vrot.slane %v1611_v44, 5  ;;  %v6272_v44 = vld [vmem:[#allocation61_spill] sm:$0xff]  ;;  %v6273_v15 = vld [vmem:[#allocation62_spill] sm:$0xff] }
 0x4ef   :  { %1706 = vmatmul.mubr.f32.vlgmr.msra.gmra.mxu0 %v4954_v49  ;;  %v4958_v51 = vsel %vm2859_vm2, %v4677_v33, %v2841_v48  ;;  %1777 = vmatmul.mubr.f32.vlgmr.msra.gmra.mxu1 %v4954_v49  ;;  %v6256_v33 = vld [vmem:[#allocation34_spill] sm:$0xff]  ;;  %v6274_v48 = vld [vmem:[#allocation63_spill] sm:$0xff] }
 0x4f0   :  { %1784 = vmatpush1.msra.mxu0 %v4680_v7  ;;  %1855 = vmatpush1.msra.mxu1 %v4683_v30 }
 0x4f1   :  { %1785 = vmatprep.subr.mxu0 %v4686_v60  ;;  %1856 = vmatprep.subr.mxu1 %v4689_v35 }
 0x4f2   :  { %1786 = vmatpush1.msra.mxu0 %v4692_v4  ;;  %1857 = vmatpush1.msra.mxu1 %v4695_v58 }
 0x4f3   :  { %1787 = vmatprep.subr.mxu0 %v4698_v26  ;;  %1858 = vmatprep.subr.mxu1 %v4701_v21 }
 0x4f4   :  { %1788 = vmatpush1.msra.mxu0 %v4704_v25  ;;  %1859 = vmatpush1.msra.mxu1 %v4707_v27 }
 0x4f5   :  { %1789 = vmatprep.subr.mxu0 %v4710_v24  ;;  %1860 = vmatprep.subr.mxu1 %v4713_v2 }
 0x4f6   :  { %1790 = vmatpush1.msra.mxu0 %v4716_v22  ;;  %1861 = vmatpush1.msra.mxu1 %v6256_v33 }
 0x4f7   :  { %1791 = vmatprep.subr.mxu0 %v6257_v63  ;;  %1862 = vmatprep.subr.mxu1 %v6258_v13 }
 0x4f8   :  { %1792 = vmatpush1.msra.mxu0 %v6259_v52  ;;  %1863 = vmatpush1.msra.mxu1 %v6260_v46 }
 0x4f9   :  { %1793 = vmatprep.subr.mxu0 %v6261_v43  ;;  %1864 = vmatprep.subr.mxu1 %v6262_v10 }
 0x4fa   :  { %1794 = vmatpush1.msra.mxu0 %v6263_v9  ;;  %1865 = vmatpush1.msra.mxu1 %v6264_v14  ;;  %v6275_v14 = vld [vmem:[#allocation64_spill] sm:$0xff] }
 0x4fb   :  { %1795 = vmatprep.subr.mxu0 %v6265_v11  ;;  %1866 = vmatprep.subr.mxu1 %v6266_v42  ;;  %v6276_v11 = vld [vmem:[#allocation65_spill] sm:$0xff]  ;;  %v6277_v42 = vld [vmem:[#allocation66_spill] sm:$0xff] }
 0x4fc   :  { %1796 = vmatpush1.msra.mxu0 %v6267_v40  ;;  %1867 = vmatpush1.msra.mxu1 %v6268_v38  ;;  %v6278_v40 = vld [vmem:[#allocation67_spill] sm:$0xff]  ;;  %v6279_v38 = vld [vmem:[#allocation68_spill] sm:$0xff] }
 0x4fd   :  { %1797 = vmatprep.subr.mxu0 %v6269_v23  ;;  %1868 = vmatprep.subr.mxu1 %v6270_v31  ;;  %v6280_v23 = vld [vmem:[#allocation69_spill] sm:$0xff]  ;;  %v6281_v31 = vld [vmem:[#allocation70_spill] sm:$0xff] }
 0x4fe   :  { %1798 = vmatpush1.msra.mxu0 %v6271_v16  ;;  %1869 = vmatpush1.msra.mxu1 %v6272_v44  ;;  %v6282_v16 = vld [vmem:[#allocation72_spill] sm:$0xff]  ;;  %v6283_v44 = vld [vmem:[#allocation71_spill] sm:$0xff] }
 0x4ff   :  { %1799 = vmatprep.subr.mxu0 %v6273_v15  ;;  %1870 = vmatprep.subr.mxu1 %v6274_v48  ;;  %v6284_v15 = vld [vmem:[#allocation74_spill] sm:$0xff]  ;;  %v6285_v48 = vld [vmem:[#allocation73_spill] sm:$0xff] }
 0x500   :  { %1800 = vmatpush1.msra.mxu0 %v6275_v14  ;;  %1871 = vmatpush1.msra.mxu1 %v6276_v11  ;;  %v6286_v14 = vld [vmem:[#allocation76_spill] sm:$0xff]  ;;  %v6287_v11 = vld [vmem:[#allocation75_spill] sm:$0xff] }
 0x501   :  { %1801 = vmatprep.subr.mxu0 %v6277_v42  ;;  %1872 = vmatprep.subr.mxu1 %v6278_v40  ;;  %v6288_v42 = vld [vmem:[#allocation78_spill] sm:$0xff]  ;;  %v6289_v40 = vld [vmem:[#allocation77_spill] sm:$0xff] }
 0x502   :  { %1802 = vmatpush1.msra.mxu0 %v6279_v38  ;;  %1873 = vmatpush1.msra.mxu1 %v6280_v23  ;;  %v6290_v38 = vld [vmem:[#allocation80_spill] sm:$0xff]  ;;  %v6291_v23 = vld [vmem:[#allocation79_spill] sm:$0xff] }
 0x503   :  { %1803 = vmatprep.subr.mxu0 %v6281_v31  ;;  %1874 = vmatprep.subr.mxu1 %v6282_v16  ;;  %v6292_v31 = vld [vmem:[#allocation82_spill] sm:$0xff]  ;;  %v6293_v16 = vld [vmem:[#allocation93_spill] sm:$0xff] }
 0x504   :  { %1804 = vmatpush1.msra.mxu0 %v6283_v44  ;;  %1875 = vmatpush1.msra.mxu1 %v6284_v15  ;;  %v6294_v44 = vld [vmem:[#allocation94_spill] sm:$0xff]  ;;  %v6295_v15 = vld [vmem:[#allocation95_spill] sm:$0xff] }
 0x505   :  { %1805 = vmatprep.subr.mxu0 %v6285_v48  ;;  %1876 = vmatprep.subr.mxu1 %v6286_v14  ;;  %v6296_v48 = vld [vmem:[#allocation96_spill] sm:$0xff]  ;;  %v6297_v14 = vld [vmem:[#allocation43_spill] sm:$0xff] }
 0x506   :  { %1806 = vmatpush1.msra.mxu0 %v6287_v11  ;;  %1877 = vmatpush1.msra.mxu1 %v6288_v42  ;;  %v6298_v11 = vld [vmem:[#allocation44_spill] sm:$0xff] }
 0x507   :  { %1807 = vmatprep.subr.mxu0 %v6289_v40  ;;  %1878 = vmatprep.subr.mxu1 %v6290_v38 }
 0x508   :  { %1808 = vmatpush1.msra.mxu0 %v6291_v23  ;;  %1879 = vmatpush1.msra.mxu1 %v6292_v31 }
 0x509   :  { %1809 = vmatprep.subr.mxu0 %v6293_v16  ;;  %1880 = vmatprep.subr.mxu1 %v6294_v44 }
 0x50a   :  { %1810 = vmatpush1.msra.mxu0 %v6295_v15  ;;  %1881 = vmatpush1.msra.mxu1 %v6296_v48 }
 0x50b   :  { %1811 = vmatprep.subr.mxu0 %v6297_v14  ;;  %1882 = vmatprep.subr.mxu1 %v6298_v11  ;;  %v5027_v11 = vld [vmem:[#allocation3 + $0x3c8] sm:$0xff] }
 0x50c   :  { %1812 = vmatpush1.msra.mxu0 %v4848_v47  ;;  %1883 = vmatpush1.msra.mxu1 %v4851_v56 }
 0x50d   :  { %1813 = vmatprep.subr.mxu0 %v4854_v19  ;;  %1884 = vmatprep.subr.mxu1 %v4857_v29  ;;  %v5031_v19 = vld [vmem:[#allocation3 + $0x3c0] sm:$0xff] }
 0x50e   :  { %1814 = vmatpush1.msra.mxu0 %v4860_v62  ;;  %1847 = vmatprep.mubr.f32.mxu0 %v5965_v37  ;;  %6299 = vst [vmem:[#allocation34_spill] sm:$0xff] %v5031_v19  ;;  %v5035_v62 = vld [vmem:[#allocation3 + $0x388] sm:$0xff] }
 0x50f   :  { %1885 = vmatpush1.msra.mxu1 %v4864_v5  ;;  %1918 = vmatprep.mubr.f32.mxu1 %v5965_v37  ;;  %6300 = vst [vmem:[#allocation41_spill] sm:$0xff] %v5035_v62  ;;  %v5039_v5 = vld [vmem:[#allocation3 + $0x380] sm:$0xff] }
 0x510   :  { %1848 = vmatmul.mubr.f32.vlgmr.msra.gmra.mxu0 %v4954_v49  ;;  %1919 = vmatmul.mubr.f32.vlgmr.msra.gmra.mxu1 %v4954_v49  ;;  %6301 = vst [vmem:[#allocation36_spill] sm:$0xff] %v5039_v5  ;;  %v5043_v49 = vld [vmem:[#allocation3 + $0x348] sm:$0xff] }
 0x511   :  { %1982 = vmatprep.subr.mxu0 %v5027_v11  ;;  %2053 = vmatprep.subr.mxu1 %v4483_v59  ;;  %6302 = vst [vmem:[#allocation42_spill] sm:$0xff] %v5043_v49  ;;  %v5047_v59 = vld [vmem:[#allocation3 + $0x340] sm:$0xff] }
 0x512   :  { %1983 = vmatpush1.msra.mxu0 %v5031_v19  ;;  %2054 = vmatpush1.msra.mxu1 %v4487_v0  ;;  %6303 = vst [vmem:[#allocation49_spill] sm:$0xff] %v5047_v59  ;;  %v5051_v0 = vld [vmem:[#allocation3 + $0x308] sm:$0xff] }
 0x513   :  { %1984 = vmatprep.subr.mxu0 %v5035_v62  ;;  %2055 = vmatprep.subr.mxu1 %v4491_v34  ;;  %6304 = vst [vmem:[#allocation50_spill] sm:$0xff] %v5051_v0  ;;  %v5055_v34 = vld [vmem:[#allocation3 + $0x300] sm:$0xff] }
 0x514   :  { %1985 = vmatpush1.msra.mxu0 %v5039_v5  ;;  %2056 = vmatpush1.msra.mxu1 %v4495_v53  ;;  %6305 = vst [vmem:[#allocation51_spill] sm:$0xff] %v5055_v34  ;;  %v5059_v53 = vld [vmem:[#allocation3 + $0x2c8] sm:$0xff] }
 0x515   :  { %1986 = vmatprep.subr.mxu0 %v5043_v49  ;;  %2057 = vmatprep.subr.mxu1 %v4499_v55  ;;  %6306 = vst [vmem:[#allocation52_spill] sm:$0xff] %v5059_v53  ;;  %v5063_v55 = vld [vmem:[#allocation3 + $0x2c0] sm:$0xff] }
 0x516   :  { %1987 = vmatpush1.msra.mxu0 %v5047_v59  ;;  %2058 = vmatpush1.msra.mxu1 %v4503_v57  ;;  %6307 = vst [vmem:[#allocation78_spill] sm:$0xff] %v5063_v55  ;;  %v5067_v57 = vld [vmem:[#allocation3 + $0x288] sm:$0xff]  ;;  %v6350_v59 = vld [vmem:[#allocation98_spill] sm:$0xff] }
 0x517   :  { %1988 = vmatprep.subr.mxu0 %v5051_v0  ;;  %2059 = vmatprep.subr.mxu1 %v4507_v8  ;;  %6308 = vst [vmem:[#allocation77_spill] sm:$0xff] %v5067_v57  ;;  %v5071_v8 = vld [vmem:[#allocation3 + $0x280] sm:$0xff] }
 0x518   :  { %1989 = vmatpush1.msra.mxu0 %v5055_v34  ;;  %2060 = vmatpush1.msra.mxu1 %v4511_v41  ;;  %6309 = vst [vmem:[#allocation80_spill] sm:$0xff] %v5071_v8  ;;  %v5075_v41 = vld [vmem:[#allocation3 + $0x248] sm:$0xff] }
 0x519   :  { %1990 = vmatprep.subr.mxu0 %v5059_v53  ;;  %2061 = vmatprep.subr.mxu1 %v4515_v12  ;;  %6310 = vst [vmem:[#allocation79_spill] sm:$0xff] %v5075_v41  ;;  %v6311_v12 = vld [vmem:[#allocation45_spill] sm:$0xff] }
 0x51a   :  { %1991 = vmatpush1.msra.mxu0 %v5063_v55  ;;  %2062 = vmatpush1.msra.mxu1 %v4519_v61  ;;  %v6312_v61 = vld [vmem:[#allocation46_spill] sm:$0xff] }
 0x51b   :  { %1992 = vmatprep.subr.mxu0 %v5067_v57  ;;  %2063 = vmatprep.subr.mxu1 %v4523_v6  ;;  %v6313_v6 = vld [vmem:[#allocation47_spill] sm:$0xff]  ;;  %v6316_v57 = vld [vmem:[#allocation84_spill] sm:$0xff] }
 0x51c   :  { %1993 = vmatpush1.msra.mxu0 %v5071_v8  ;;  %2064 = vmatpush1.msra.mxu1 %v4527_v17  ;;  %v6314_v8 = vld [vmem:[#allocation48_spill] sm:$0xff]  ;;  %v6315_v17 = vld [vmem:[#allocation81_spill] sm:$0xff] }
 0x51d   :  { %1994 = vmatprep.subr.mxu0 %v5075_v41  ;;  %2065 = vmatprep.subr.mxu1 %v4531_v32  ;;  %v6317_v41 = vld [vmem:[#allocation83_spill] sm:$0xff]  ;;  %v6318_v32 = vld [vmem:[#allocation86_spill] sm:$0xff] }
 0x51e   :  { %1995 = vmatpush1.msra.mxu0 %v4534_v54  ;;  %2066 = vmatpush1.msra.mxu1 %v4537_v20  ;;  %v6319_v54 = vld [vmem:[#allocation85_spill] sm:$0xff]  ;;  %v6320_v20 = vld [vmem:[#allocation88_spill] sm:$0xff] }
 0x51f   :  { %1996 = vmatprep.subr.mxu0 %v4540_v3  ;;  %2067 = vmatprep.subr.mxu1 %v6311_v12  ;;  %v6321_v3 = vld [vmem:[#allocation87_spill] sm:$0xff]  ;;  %v6322_v12 = vld [vmem:[#allocation90_spill] sm:$0xff] }
 0x520   :  { %1997 = vmatpush1.msra.mxu0 %v6312_v61  ;;  %2068 = vmatpush1.msra.mxu1 %v6313_v6  ;;  %v6323_v61 = vld [vmem:[#allocation89_spill] sm:$0xff]  ;;  %v6324_v6 = vld [vmem:[#allocation92_spill] sm:$0xff] }
 0x521   :  { %1998 = vmatprep.subr.mxu0 %v6314_v8  ;;  %2069 = vmatprep.subr.mxu1 %v6315_v17  ;;  %v6325_v8 = vld [vmem:[#allocation91_spill] sm:$0xff]  ;;  %v6326_v17 = vld [vmem:[#allocation17_spill] sm:$0xff] }
 0x522   :  { %1999 = vmatpush1.msra.mxu0 %v6316_v57  ;;  %2070 = vmatpush1.msra.mxu1 %v6317_v41  ;;  %v6327_v57 = vld [vmem:[#allocation23_spill] sm:$0xff]  ;;  %v6328_v41 = vld [vmem:[#allocation18_spill] sm:$0xff] }
 0x523   :  { %2000 = vmatprep.subr.mxu0 %v6318_v32  ;;  %2071 = vmatprep.subr.mxu1 %v6319_v54  ;;  %v6329_v32 = vld [vmem:[#allocation25_spill] sm:$0xff]  ;;  %v6330_v54 = vld [vmem:[#allocation19_spill] sm:$0xff] }
 0x524   :  { %2001 = vmatpush1.msra.mxu0 %v6320_v20  ;;  %2072 = vmatpush1.msra.mxu1 %v6321_v3  ;;  %v6331_v20 = vld [vmem:[#allocation27_spill] sm:$0xff]  ;;  %v6332_v3 = vld [vmem:[#allocation20_spill] sm:$0xff] }
 0x525   :  { %2002 = vmatprep.subr.mxu0 %v6322_v12  ;;  %2073 = vmatprep.subr.mxu1 %v6323_v61  ;;  %v6333_v12 = vld [vmem:[#allocation29_spill] sm:$0xff] }
 0x526   :  { %2003 = vmatpush1.msra.mxu0 %v6324_v6  ;;  %2074 = vmatpush1.msra.mxu1 %v6325_v8  ;;  %v6334_v61 = vld [vmem:[#allocation21_spill] sm:$0xff]  ;;  %v6335_v6 = vld [vmem:[#allocation31_spill] sm:$0xff]  ;;  %v6336_v8 = vld [vmem:[#allocation22_spill] sm:$0xff] }
 0x527   :  { %2004 = vmatprep.subr.mxu0 %v6326_v17  ;;  %2075 = vmatprep.subr.mxu1 %v6327_v57  ;;  %v6337_v17 = vld [vmem:[#allocation33_spill] sm:$0xff]  ;;  %v6338_v57 = vld [vmem:[#allocation24_spill] sm:$0xff] }
 0x528   :  { %2005 = vmatpush1.msra.mxu0 %v6328_v41  ;;  %2076 = vmatpush1.msra.mxu1 %v6329_v32  ;;  %v6339_v41 = vld [vmem:[#allocation35_spill] sm:$0xff]  ;;  %v6340_v32 = vld [vmem:[#allocation26_spill] sm:$0xff] }
 0x529   :  { %2006 = vmatprep.subr.mxu0 %v6330_v54  ;;  %2077 = vmatprep.subr.mxu1 %v6331_v20  ;;  %v6341_v54 = vld [vmem:[#allocation37_spill] sm:$0xff]  ;;  %v6342_v20 = vld [vmem:[#allocation28_spill] sm:$0xff] }
 0x52a   :  { %2007 = vmatpush1.msra.mxu0 %v6332_v3  ;;  %2078 = vmatpush1.msra.mxu1 %v6333_v12  ;;  %v6343_v3 = vld [vmem:[#allocation38_spill] sm:$0xff] }
 0x52b   :  { %2008 = vmatprep.subr.mxu0 %v6334_v61  ;;  %2079 = vmatprep.subr.mxu1 %v6335_v6  ;;  %v6344_v12 = vld [vmem:[#allocation30_spill] sm:$0xff]  ;;  %v6345_v61 = vld [vmem:[#allocation39_spill] sm:$0xff]  ;;  %v6346_v6 = vld [vmem:[#allocation32_spill] sm:$0xff] }
 0x52c   :  { %2009 = vmatpush1.msra.mxu0 %v6336_v8  ;;  %2080 = vmatpush1.msra.mxu1 %v6337_v17  ;;  %v6347_v8 = vld [vmem:[#allocation40_spill] sm:$0xff] }
 0x52d   :  { %2010 = vmatprep.subr.mxu0 %v6338_v57  ;;  %2081 = vmatprep.subr.mxu1 %v6339_v41  ;;  %v6348_v41 = vld [vmem:[#allocation16_spill] sm:$0xff] }
 0x52e   :  { %2011 = vmatpush1.msra.mxu0 %v6340_v32  ;;  %2082 = vmatpush1.msra.mxu1 %v6341_v54  ;;  %v6349_v54 = vld [vmem:[#allocation97_spill] sm:$0xff] }
 0x52f   :  { %2012 = vmatprep.subr.mxu0 %v6342_v20  ;;  %2083 = vmatprep.subr.mxu1 %v6343_v3 }
 0x530   :  { %2013 = vmatpush1.msra.mxu0 %v6344_v12  ;;  %2084 = vmatpush1.msra.mxu1 %v6345_v61 }
 0x531   :  { %2046 = vmatprep.mubr.f32.mxu0 %v5965_v37  ;;  %2117 = vmatprep.mubr.f32.mxu1 %v5965_v37 }
 0x532   :  { %2124 = vmatprep.subr.mxu0 %v6346_v6  ;;  %2195 = vmatprep.subr.mxu1 %v6347_v8 }
 0x5af   :  { %v1707_v17 = vpop.f32.mrf.mxu0  ;;  %v1778_v34 = vpop.f32.mrf.mxu1 }
 0x5b0   :  { %v1953_v20 = vadd.f32 %v1707_v17, %v6349_v54 }
 0x5b1   :  { %v1709_v57 = vpop.f32.mrf.mxu0  ;;  %v1780_v0 = vpop.f32.mrf.mxu1 }
 0x5b2   :  { %v1954_v32 = vadd.f32 %v1709_v57, %v6348_v41  ;;  %v1957_v3 = vsub.f32 0.0, %v1953_v20  ;;  %v1955_v41 = vadd.f32 %v1778_v34, %v4213_v39 }
 0x5b4   :  { %v1963_v55 = vsub.f32 0.0, %v1954_v32  ;;  %v1958_v12 = vmul.f32 1.442695, %v1957_v3 }
 0x5b6   :  { %v1964_v53 = vmul.f32 1.442695, %v1963_v55  ;;  %v1956_v55 = vadd.f32 %v1780_v0, %v4206_v1 }
 0x5b8   :  { %3191 = vpow2.f32 %v1964_v53 }
 0x5b9   :  { %3193 = vpow2.f32 %v1958_v12  ;;  %v1970_v12 = vsub.f32 0.0, %v1956_v55 }
 0x5c5   :  { %v3192_v20 = vpop.eup %3191 }
 0x5c6   :  { %v3194_v3 = vpop.eup %3193  ;;  %v1966_v54 = vadd.f32 1.0, %v3192_v20 }
 0x5d0   :  { %v1849_v61 = vpop.f32.mrf.mxu0  ;;  %v1920_v8 = vpop.f32.mrf.mxu1 }
 0x5d1   :  { %v1925_v49 = vadd.f32 %v1849_v61, %v6350_v59  ;;  %v1960_v59 = vadd.f32 1.0, %v3194_v3 }
 0x5d2   :  { %v1851_v6 = vpop.f32.mrf.mxu0  ;;  %v1922_v32 = vpop.f32.mrf.mxu1 }
 0x5d3   :  { %v1929_v5 = vsub.f32 0.0, %v1925_v49  ;;  %v1926_v62 = vadd.f32 %v1851_v6, %v6095_v28  ;;  %v1928_v53 = vadd.f32 %v1922_v32, %v4208_v50  ;;  %v1971_v49 = vmul.f32 1.442695, %v1970_v12 }
 0x5d5   :  { %v1930_v19 = vmul.f32 1.442695, %v1929_v5  ;;  %v1935_v57 = vsub.f32 0.0, %v1926_v62  ;;  %v1942_v61 = vsub.f32 0.0, %v1928_v53  ;;  %v1927_v62 = vadd.f32 %v1920_v8, %v4215_v45 }
 0x5d7   :  { %3195 = vpow2.f32 %v1930_v19  ;;  %v1936_v17 = vmul.f32 1.442695, %v1935_v57  ;;  %v1943_v5 = vmul.f32 1.442695, %v1942_v61 }
 0x5d9   :  { %3197 = vpow2.f32 %v1936_v17 }
 0x5da   :  { %3199 = vrcp.f32 %v1966_v54 }
 0x5db   :  { %3201 = vrcp.f32 %v1960_v59 }
 0x5dc   :  { %3203 = vpow2.f32 %v1971_v49 }
 0x5dd   :  { %3205 = vtanh.f32 %v1955_v41 }
 0x5de   :  { %3207 = vpow2.f32 %v1943_v5 }
 0x5e4   :  { %v3196_v19 = vpop.eup %3195 }
 0x5e5   :  { %v1932_v0 = vadd.f32 1.0, %v3196_v19 }
 0x5e6   :  { %v3198_v6 = vpop.eup %3197 }
 0x5e7   :  { %3209 = vrcp.f32 %v1932_v0  ;;  %v1938_v57 = vadd.f32 1.0, %v3198_v6  ;;  %v3200_v17 = vpop.eup %3199 }
 0x5e8   :  { %3211 = vtanh.f32 %v1927_v62  ;;  %v3202_v32 = vpop.eup %3201  ;;  %v1976_v34 = vmul.f32 %v3200_v17, %v4947_v18 }
 0x5e9   :  { %3213 = vrcp.f32 %v1938_v57  ;;  %v3204_v55 = vpop.eup %3203 }
 0x5ea   :  { %v3206_v54 = vpop.eup %3205  ;;  %v1973_v3 = vadd.f32 1.0, %v3204_v55 }
 0x5eb   :  { %v3208_v20 = vpop.eup %3207  ;;  %v1977_v59 = vmul.f32 %v3206_v54, %v3202_v32  ;;  %v6374_v54 = vld [vmem:[#allocation75_spill] sm:$0xff] }
 0x5ec   :  { %v1945_v61 = vadd.f32 1.0, %v3208_v20  ;;  %3215 = vrcp.f32 %v1973_v3  ;;  %v6375_v20 = vld [vmem:[#allocation44_spill] sm:$0xff]  ;;  %v6385_v3 = vld [vmem:[#allocation51_spill] sm:$0xff] }
 0x5ed   :  { %v5130_v8 = vadd.f32 %v1977_v59, %v1976_v34  ;;  %v6373_v34 = vld [vmem:[#allocation76_spill] sm:$0xff]  ;;  %v6384_v59 = vld [vmem:[#allocation50_spill] sm:$0xff] }
 0x5ef   :  { %3217 = vtanh.f32 %v5130_v8 }
 0x5f0   :  { %3219 = vrcp.f32 %v1945_v61  ;;  %v3452_v61 = vld [vmem:[#allocation3 + $0x2d8] sm:$0xff] }
 0x5f4   :  { %v3210_v53 = vpop.eup %3209 }
 0x5f5   :  { %v3212_v12 = vpop.eup %3211 }
 0x5f6   :  { %v3214_v41 = vpop.eup %3213  ;;  %v1949_v49 = vmul.f32 %v3212_v12, %v3210_v53  ;;  %v3450_v53 = vld [vmem:[#allocation3 + $0x318] sm:$0xff]  ;;  %v3451_v12 = vld [vmem:[#allocation3 + $0x310] sm:$0xff] }
 0x5f7   :  { %v1948_v5 = vmul.f32 %v3214_v41, %v4950_v36  ;;  %v6386_v41 = vld [vmem:[#allocation52_spill] sm:$0xff] }
 0x5f9   :  { %v5133_v19 = vadd.f32 %v1949_v49, %v1948_v5  ;;  %v3216_v18 = vpop.eup %3215  ;;  %v6387_v49 = vld [vmem:[#allocation78_spill] sm:$0xff]  ;;  %v3453_v5 = vld [vmem:[#allocation3 + $0x2d0] sm:$0xff] }
 0x5fb   :  { %3221 = vtanh.f32 %v5133_v19 }
 0x5fc   :  { %v3218_v62 = vpop.eup %3217 }
 0x5fd   :  { %v3220_v0 = vpop.eup %3219  ;;  %v1980_v17 = vmul.f32 %v3218_v62, %v3216_v18  ;;  %v6388_v18 = vld [vmem:[#allocation77_spill] sm:$0xff] }
 0x5fe   :  { %v3454_v62 = vld [vmem:[#allocation3 + $0x298] sm:$0xff] }
 0x608   :  { %v3222_v6 = vpop.eup %3221 }
 0x609   :  { %v1952_v57 = vmul.f32 %v3222_v6, %v3220_v0  ;;  %v6389_v0 = vld [vmem:[#allocation80_spill] sm:$0xff] }
 0x60a   :  { %v3455_v6 = vld [vmem:[#allocation3 + $0x290] sm:$0xff] }
 0x60b   :  { %v5137_v32 = vadd.f32 %v1980_v17, %v1952_v57  ;;  %v2844_v55 = vrot.slane %v1952_v57, 4  ;;  %v6390_v57 = vld [vmem:[#allocation79_spill] sm:$0xff]  ;;  %v3456_v17 = vld [vmem:[#allocation3 + $0x258] sm:$0xff] }
 0x60d   :  { %2047 = vmatmul.mubr.f32.vlgmr.msra.gmra.mxu0 %v5137_v32  ;;  %2118 = vmatmul.mubr.f32.vlgmr.msra.gmra.mxu1 %v5137_v32  ;;  %v5142_v36 = vsel %vm2861_vm3, %v4958_v51, %v2844_v55  ;;  %v6364_v51 = vld [vmem:[#allocation66_spill] sm:$0xff]  ;;  %v3458_v55 = vld [vmem:[#allocation3 + $0x250] sm:$0xff] }
 0x60e   :  { %2125 = vmatpush1.msra.mxu0 %v4680_v7  ;;  %2196 = vmatpush1.msra.mxu1 %v4683_v30  ;;  %v6351_v7 = vld [vmem:[#allocation53_spill] sm:$0xff]  ;;  %v6352_v30 = vld [vmem:[#allocation54_spill] sm:$0xff] }
 0x60f   :  { %2126 = vmatprep.subr.mxu0 %v4686_v60  ;;  %2197 = vmatprep.subr.mxu1 %v4689_v35  ;;  %v6353_v60 = vld [vmem:[#allocation55_spill] sm:$0xff]  ;;  %v6354_v35 = vld [vmem:[#allocation56_spill] sm:$0xff] }
 0x610   :  { %2127 = vmatpush1.msra.mxu0 %v4692_v4  ;;  %2198 = vmatpush1.msra.mxu1 %v4695_v58  ;;  %v6355_v4 = vld [vmem:[#allocation57_spill] sm:$0xff]  ;;  %v6356_v58 = vld [vmem:[#allocation58_spill] sm:$0xff] }
 0x611   :  { %2128 = vmatprep.subr.mxu0 %v4698_v26  ;;  %2199 = vmatprep.subr.mxu1 %v4701_v21  ;;  %v6357_v26 = vld [vmem:[#allocation59_spill] sm:$0xff]  ;;  %v6358_v21 = vld [vmem:[#allocation60_spill] sm:$0xff] }
 0x612   :  { %2129 = vmatpush1.msra.mxu0 %v4704_v25  ;;  %2200 = vmatpush1.msra.mxu1 %v4707_v27  ;;  %v6359_v25 = vld [vmem:[#allocation61_spill] sm:$0xff]  ;;  %v6360_v27 = vld [vmem:[#allocation62_spill] sm:$0xff] }
 0x613   :  { %2130 = vmatprep.subr.mxu0 %v4710_v24  ;;  %2201 = vmatprep.subr.mxu1 %v4713_v2  ;;  %v6361_v24 = vld [vmem:[#allocation63_spill] sm:$0xff]  ;;  %v6362_v2 = vld [vmem:[#allocation64_spill] sm:$0xff] }
 0x614   :  { %2131 = vmatpush1.msra.mxu0 %v4716_v22  ;;  %2202 = vmatpush1.msra.mxu1 %v6256_v33  ;;  %v6363_v22 = vld [vmem:[#allocation65_spill] sm:$0xff]  ;;  %v6365_v33 = vld [vmem:[#allocation67_spill] sm:$0xff] }
 0x615   :  { %2132 = vmatprep.subr.mxu0 %v6257_v63  ;;  %2203 = vmatprep.subr.mxu1 %v6258_v13  ;;  %v6366_v63 = vld [vmem:[#allocation68_spill] sm:$0xff]  ;;  %v6367_v13 = vld [vmem:[#allocation69_spill] sm:$0xff] }
 0x616   :  { %2133 = vmatpush1.msra.mxu0 %v6259_v52  ;;  %2204 = vmatpush1.msra.mxu1 %v6260_v46  ;;  %v6368_v52 = vld [vmem:[#allocation70_spill] sm:$0xff]  ;;  %v6369_v46 = vld [vmem:[#allocation72_spill] sm:$0xff] }
 0x617   :  { %2134 = vmatprep.subr.mxu0 %v6261_v43  ;;  %2205 = vmatprep.subr.mxu1 %v6262_v10  ;;  %v6370_v43 = vld [vmem:[#allocation71_spill] sm:$0xff]  ;;  %v6371_v10 = vld [vmem:[#allocation74_spill] sm:$0xff] }
 0x618   :  { %2135 = vmatpush1.msra.mxu0 %v6263_v9  ;;  %2206 = vmatpush1.msra.mxu1 %v6351_v7  ;;  %v6372_v9 = vld [vmem:[#allocation73_spill] sm:$0xff]  ;;  %v3459_v7 = vld [vmem:[#allocation3 + $0x208] sm:$0xff] }
 0x619   :  { %2136 = vmatprep.subr.mxu0 %v6352_v30  ;;  %2207 = vmatprep.subr.mxu1 %v6353_v60  ;;  %v3460_v30 = vld [vmem:[#allocation3 + $0x218] sm:$0xff]  ;;  %v3461_v60 = vld [vmem:[#allocation3 + $0x200] sm:$0xff] }
 0x61a   :  { %2137 = vmatpush1.msra.mxu0 %v6354_v35  ;;  %2208 = vmatpush1.msra.mxu1 %v6355_v4  ;;  %v3462_v35 = vld [vmem:[#allocation3 + $0x210] sm:$0xff]  ;;  %v3463_v4 = vld [vmem:[#allocation3 + $0x1c8] sm:$0xff] }
 0x61b   :  { %2138 = vmatprep.subr.mxu0 %v6356_v58  ;;  %2209 = vmatprep.subr.mxu1 %v6357_v26  ;;  %v3464_v58 = vld [vmem:[#allocation3 + $0x1d8] sm:$0xff]  ;;  %v3465_v26 = vld [vmem:[#allocation3 + $0x1c0] sm:$0xff] }
 0x61c   :  { %2139 = vmatpush1.msra.mxu0 %v6358_v21  ;;  %2210 = vmatpush1.msra.mxu1 %v6359_v25  ;;  %v3466_v21 = vld [vmem:[#allocation3 + $0x1d0] sm:$0xff]  ;;  %v3467_v25 = vld [vmem:[#allocation3 + $0x188] sm:$0xff] }
 0x61d   :  { %2140 = vmatprep.subr.mxu0 %v6360_v27  ;;  %2211 = vmatprep.subr.mxu1 %v6361_v24  ;;  %v3468_v27 = vld [vmem:[#allocation3 + $0x198] sm:$0xff]  ;;  %v3469_v24 = vld [vmem:[#allocation3 + $0x180] sm:$0xff] }
 0x61e   :  { %2141 = vmatpush1.msra.mxu0 %v6362_v2  ;;  %2212 = vmatpush1.msra.mxu1 %v6363_v22  ;;  %v3470_v2 = vld [vmem:[#allocation3 + $0x190] sm:$0xff]  ;;  %v3471_v22 = vld [vmem:[#allocation3 + $0x148] sm:$0xff] }
 0x61f   :  { %2142 = vmatprep.subr.mxu0 %v6364_v51  ;;  %2213 = vmatprep.subr.mxu1 %v6365_v33  ;;  %v3472_v51 = vld [vmem:[#allocation3 + $0x158] sm:$0xff]  ;;  %v3473_v33 = vld [vmem:[#allocation3 + $0x140] sm:$0xff] }
 0x620   :  { %2143 = vmatpush1.msra.mxu0 %v6366_v63  ;;  %2214 = vmatpush1.msra.mxu1 %v6367_v13  ;;  %v3474_v63 = vld [vmem:[#allocation3 + $0x150] sm:$0xff]  ;;  %v3475_v13 = vld [vmem:[#allocation3 + $0x108] sm:$0xff] }
 0x621   :  { %2144 = vmatprep.subr.mxu0 %v6368_v52  ;;  %2215 = vmatprep.subr.mxu1 %v6369_v46  ;;  %v3476_v52 = vld [vmem:[#allocation3 + $0x118] sm:$0xff]  ;;  %v3477_v46 = vld [vmem:[#allocation3 + $0x100] sm:$0xff] }
 0x622   :  { %2145 = vmatpush1.msra.mxu0 %v6370_v43  ;;  %2216 = vmatpush1.msra.mxu1 %v6371_v10  ;;  %v3478_v43 = vld [vmem:[#allocation3 + $0x110] sm:$0xff]  ;;  %v3479_v10 = vld [vmem:[#allocation3 + $0xc8] sm:$0xff] }
 0x623   :  { %2146 = vmatprep.subr.mxu0 %v6372_v9  ;;  %2217 = vmatprep.subr.mxu1 %v6373_v34  ;;  %v3480_v9 = vld [vmem:[#allocation3 + $0xd8] sm:$0xff]  ;;  %v3481_v34 = vld [vmem:[#allocation3 + $0xc0] sm:$0xff] }
 0x624   :  { %2147 = vmatpush1.msra.mxu0 %v6374_v54  ;;  %2218 = vmatpush1.msra.mxu1 %v6288_v42  ;;  %v6376_v42 = vld [vmem:[#allocation104_spill] sm:$0xff] }
 0x625   :  { %2148 = vmatprep.subr.mxu0 %v6289_v40  ;;  %2219 = vmatprep.subr.mxu1 %v6290_v38  ;;  %v6377_v40 = vld [vmem:[#allocation105_spill] sm:$0xff]  ;;  %v6378_v38 = vld [vmem:[#allocation106_spill] sm:$0xff]  ;;  %v3482_v54 = vld [vmem:[#allocation3 + $0xd0] sm:$0xff] }
 0x626   :  { %2149 = vmatpush1.msra.mxu0 %v6291_v23  ;;  %2220 = vmatpush1.msra.mxu1 %v6292_v31  ;;  %v3446_v23 = vld [vmem:[#allocation3 + $0x398] sm:$0xff]  ;;  %v6381_v31 = vld [vmem:[#allocation36_spill] sm:$0xff] }
 0x627   :  { %2150 = vmatprep.subr.mxu0 %v6293_v16  ;;  %2221 = vmatprep.subr.mxu1 %v6294_v44  ;;  %v3447_v16 = vld [vmem:[#allocation3 + $0x390] sm:$0xff]  ;;  %v6382_v44 = vld [vmem:[#allocation42_spill] sm:$0xff] }
 0x628   :  { %2151 = vmatpush1.msra.mxu0 %v6295_v15  ;;  %2222 = vmatpush1.msra.mxu1 %v6296_v48  ;;  %v3448_v15 = vld [vmem:[#allocation3 + $0x358] sm:$0xff] }
 0x629   :  { %2152 = vmatprep.subr.mxu0 %v6297_v14  ;;  %2223 = vmatprep.subr.mxu1 %v6375_v20  ;;  %v3445_v14 = vld [vmem:[#allocation3 + $0x3d0] sm:$0xff]  ;;  %v6383_v48 = vld [vmem:[#allocation49_spill] sm:$0xff]  ;;  %v3483_v20 = vld [vmem:[#allocation3 + $0x88] sm:$0xff] }
 0x62a   :  { %2153 = vmatpush1.msra.mxu0 %v4848_v47  ;;  %2224 = vmatpush1.msra.mxu1 %v4851_v56  ;;  %v3444_v47 = vld [vmem:[#allocation3 + $0x3d8] sm:$0xff]  ;;  %v6379_v56 = vld [vmem:[#allocation34_spill] sm:$0xff] }
 0x62b   :  { %2154 = vmatprep.subr.mxu0 %v6376_v42  ;;  %2225 = vmatprep.subr.mxu1 %v4857_v29  ;;  %v6380_v29 = vld [vmem:[#allocation41_spill] sm:$0xff] }
 0x62c   :  { %2155 = vmatpush1.msra.mxu0 %v6377_v40  ;;  %2188 = vmatprep.mubr.f32.mxu0 %v5965_v37  ;;  %v3484_v42 = vld [vmem:[#allocation3 + $0x98] sm:$0xff]  ;;  %v3485_v40 = vld [vmem:[#allocation3 + $0x80] sm:$0xff] }
 0x62d   :  { %2226 = vmatpush1.msra.mxu1 %v6378_v38  ;;  %2259 = vmatprep.mubr.f32.mxu1 %v5965_v37  ;;  %v3486_v38 = vld [vmem:[#allocation3 + $0x90] sm:$0xff] }
 0x62e   :  { %2189 = vmatmul.mubr.f32.vlgmr.msra.gmra.mxu0 %v5137_v32  ;;  %2260 = vmatmul.mubr.f32.vlgmr.msra.gmra.mxu1 %v5137_v32  ;;  %v3457_v32 = vld [vmem:[#allocation3 + $0x240] sm:$0xff] }
 0x62f   :  { %2323 = vmatprep.subr.mxu0 %v5027_v11  ;;  %2394 = vmatprep.subr.mxu1 %v3444_v47  ;;  %v3449_v11 = vld [vmem:[#allocation3 + $0x350] sm:$0xff]  ;;  %v3487_v47 = vld [vmem:[#allocation3 + $0x48] sm:$0xff] }
 0x630   :  { %2324 = vmatpush1.msra.mxu0 %v6379_v56  ;;  %2395 = vmatpush1.msra.mxu1 %v3445_v14  ;;  %v3488_v56 = vld [vmem:[#allocation3 + $0x58] sm:$0xff]  ;;  %v3489_v14 = vld [vmem:[#allocation3 + $0x40] sm:$0xff] }
 0x631   :  { %2325 = vmatprep.subr.mxu0 %v6380_v29  ;;  %2396 = vmatprep.subr.mxu1 %v3446_v23  ;;  %v3490_v29 = vld [vmem:[#allocation3 + $0x50] sm:$0xff]  ;;  %v3491_v23 = vld [vmem:[#allocation3 + $0x8] sm:$0xff] }
 0x632   :  { %2326 = vmatpush1.msra.mxu0 %v6381_v31  ;;  %2397 = vmatpush1.msra.mxu1 %v3447_v16  ;;  %v3492_v31 = vld [vmem:[#allocation3 + $0x18] sm:$0xff]  ;;  %v3493_v16 = vld [vmem:[#allocation3] sm:$0xff] }
 0x633   :  { %2327 = vmatprep.subr.mxu0 %v6382_v44  ;;  %2398 = vmatprep.subr.mxu1 %v3448_v15  ;;  %v3494_v44 = vld [vmem:[#allocation3 + $0x10] sm:$0xff]  ;;  %v5225_v15 = vld [vmem:[#allocation3 + $0x3e8] sm:$0xff] }
 0x634   :  { %2328 = vmatpush1.msra.mxu0 %v6383_v48  ;;  %2399 = vmatpush1.msra.mxu1 %v3449_v11  ;;  %v5228_v48 = vld [vmem:[#allocation3 + $0x3f8] sm:$0xff] }
 0x635   :  { %2329 = vmatprep.subr.mxu0 %v6384_v59  ;;  %2400 = vmatprep.subr.mxu1 %v3450_v53  ;;  %v6391_v53 = vld [vmem:[#allocation16_spill] sm:$0xff] }
 0x636   :  { %2330 = vmatpush1.msra.mxu0 %v6385_v3  ;;  %2401 = vmatpush1.msra.mxu1 %v3451_v12  ;;  %v6392_v12 = vld [vmem:[#allocation97_spill] sm:$0xff] }
 0x637   :  { %2331 = vmatprep.subr.mxu0 %v6386_v41  ;;  %2402 = vmatprep.subr.mxu1 %v3452_v61 }
 0x638   :  { %2332 = vmatpush1.msra.mxu0 %v6387_v49  ;;  %2403 = vmatpush1.msra.mxu1 %v3453_v5 }
 0x639   :  { %2333 = vmatprep.subr.mxu0 %v6388_v18  ;;  %2404 = vmatprep.subr.mxu1 %v3454_v62 }
 0x63a   :  { %2334 = vmatpush1.msra.mxu0 %v6389_v0  ;;  %2405 = vmatpush1.msra.mxu1 %v3455_v6 }
 0x63b   :  { %2335 = vmatprep.subr.mxu0 %v6390_v57  ;;  %2406 = vmatprep.subr.mxu1 %v3456_v17  ;;  %v6393_v57 = vld [vmem:[#allocation98_spill] sm:$0xff] }
 0x63c   :  { %2336 = vmatpush1.msra.mxu0 %v3457_v32  ;;  %2407 = vmatpush1.msra.mxu1 %v3458_v55 }
 0x63d   :  { %2337 = vmatprep.subr.mxu0 %v3459_v7  ;;  %2408 = vmatprep.subr.mxu1 %v3460_v30 }
 0x63e   :  { %2338 = vmatpush1.msra.mxu0 %v3461_v60  ;;  %2409 = vmatpush1.msra.mxu1 %v3462_v35 }
 0x63f   :  { %2339 = vmatprep.subr.mxu0 %v3463_v4  ;;  %2410 = vmatprep.subr.mxu1 %v3464_v58 }
 0x640   :  { %2340 = vmatpush1.msra.mxu0 %v3465_v26  ;;  %2411 = vmatpush1.msra.mxu1 %v3466_v21 }
 0x641   :  { %2341 = vmatprep.subr.mxu0 %v3467_v25  ;;  %2412 = vmatprep.subr.mxu1 %v3468_v27 }
 0x642   :  { %2342 = vmatpush1.msra.mxu0 %v3469_v24  ;;  %2413 = vmatpush1.msra.mxu1 %v3470_v2 }
 0x643   :  { %2343 = vmatprep.subr.mxu0 %v3471_v22  ;;  %2414 = vmatprep.subr.mxu1 %v3472_v51 }
 0x644   :  { %2344 = vmatpush1.msra.mxu0 %v3473_v33  ;;  %2415 = vmatpush1.msra.mxu1 %v3474_v63 }
 0x645   :  { %2345 = vmatprep.subr.mxu0 %v3475_v13  ;;  %2416 = vmatprep.subr.mxu1 %v3476_v52 }
 0x646   :  { %2346 = vmatpush1.msra.mxu0 %v3477_v46  ;;  %2417 = vmatpush1.msra.mxu1 %v3478_v43 }
 0x647   :  { %2347 = vmatprep.subr.mxu0 %v3479_v10  ;;  %2418 = vmatprep.subr.mxu1 %v3480_v9 }
 0x648   :  { %2348 = vmatpush1.msra.mxu0 %v3481_v34  ;;  %2419 = vmatpush1.msra.mxu1 %v3482_v54 }
 0x649   :  { %2349 = vmatprep.subr.mxu0 %v3483_v20  ;;  %2420 = vmatprep.subr.mxu1 %v3484_v42 }
 0x64a   :  { %2350 = vmatpush1.msra.mxu0 %v3485_v40  ;;  %2421 = vmatpush1.msra.mxu1 %v3486_v38 }
 0x64b   :  { %2351 = vmatprep.subr.mxu0 %v3487_v47  ;;  %2422 = vmatprep.subr.mxu1 %v3488_v56 }
 0x64c   :  { %2352 = vmatpush1.msra.mxu0 %v3489_v14  ;;  %2423 = vmatpush1.msra.mxu1 %v3490_v29 }
 0x64d   :  { %2353 = vmatprep.subr.mxu0 %v3491_v23  ;;  %2424 = vmatprep.subr.mxu1 %v3492_v31 }
 0x64e   :  { %2354 = vmatpush1.msra.mxu0 %v3493_v16  ;;  %2425 = vmatpush1.msra.mxu1 %v3494_v44 }
 0x64f   :  { %2387 = vmatprep.mubr.f32.mxu0 %v5965_v37  ;;  %2458 = vmatprep.mubr.f32.mxu1 %v5965_v37 }
 0x650   :  { %2465 = vmatprep.subr.mxu0 %v5225_v15  ;;  %2536 = vmatprep.subr.mxu1 %v5228_v48 }
 0x6cd   :  { %v2048_v11 = vpop.f32.mrf.mxu0  ;;  %v2119_v62 = vpop.f32.mrf.mxu1 }
 0x6ce   :  { %v2294_v41 = vadd.f32 %v2048_v11, %v6392_v12  ;;  %v2296_v63 = vadd.f32 %v2119_v62, %v4213_v39  ;;  %v5413_v39 = vld [vmem:[#allocation3 + $0xb0] sm:$0xff]  ;;  %v5428_v12 = vld [vmem:[#allocation3 + $0x28] sm:$0xff] }
 0x6cf   :  { %v2050_v59 = vpop.f32.mrf.mxu0  ;;  %v2121_v6 = vpop.f32.mrf.mxu1 }
 0x6d0   :  { %v2295_v3 = vadd.f32 %v2050_v59, %v6391_v53  ;;  %v2298_v49 = vsub.f32 0.0, %v2294_v41  ;;  %v2297_v26 = vadd.f32 %v2121_v6, %v4206_v1  ;;  %v5257_v6 = vld [vmem:[#allocation3 + $0x3f0] sm:$0xff]  ;;  %v5419_v1 = vld [vmem:[#allocation3 + $0x78] sm:$0xff] }
 0x6d1   :  { %6398 = vst [vmem:[#allocation96_spill] sm:$0xff] %v5419_v1  ;;  %v5431_v53 = vld [vmem:[#allocation3 + $0x38] sm:$0xff] }
 0x6d2   :  { %v2304_v61 = vsub.f32 0.0, %v2295_v3  ;;  %v2299_v18 = vmul.f32 1.442695, %v2298_v49  ;;  %v2311_v24 = vsub.f32 0.0, %v2297_v26  ;;  %v5290_v26 = vld [vmem:[#allocation3 + $0x320] sm:$0xff] }
 0x6d4   :  { %v2305_v5 = vmul.f32 1.442695, %v2304_v61  ;;  %v2312_v33 = vmul.f32 1.442695, %v2311_v24  ;;  %v5302_v24 = vld [vmem:[#allocation3 + $0x2e0] sm:$0xff] }
 0x6d6   :  { %3223 = vpow2.f32 %v2305_v5 }
 0x6d7   :  { %3225 = vpow2.f32 %v2299_v18 }
 0x6e3   :  { %v3224_v21 = vpop.eup %3223 }
 0x6e4   :  { %v3226_v27 = vpop.eup %3225  ;;  %v2307_v2 = vadd.f32 1.0, %v3224_v21  ;;  %v5293_v21 = vld [vmem:[#allocation3 + $0x330] sm:$0xff] }
 0x6e5   :  { %v2301_v51 = vadd.f32 1.0, %v3226_v27  ;;  %v5299_v27 = vld [vmem:[#allocation3 + $0x2f8] sm:$0xff] }
 0x6ee   :  { %v2190_v0 = vpop.f32.mrf.mxu0  ;;  %v2261_v7 = vpop.f32.mrf.mxu1 }
 0x6ef   :  { %v2266_v17 = vadd.f32 %v2190_v0, %v6393_v57  ;;  %v2268_v46 = vadd.f32 %v2261_v7, %v4215_v45  ;;  %v5254_v0 = vld [vmem:[#allocation3 + $0x3e0] sm:$0xff]  ;;  %v5272_v7 = vld [vmem:[#allocation3 + $0x368] sm:$0xff]  ;;  %v5425_v57 = vld [vmem:[#allocation3 + $0x70] sm:$0xff] }
 0x6f0   :  { %v2192_v32 = vpop.f32.mrf.mxu0  ;;  %v2263_v58 = vpop.f32.mrf.mxu1  ;;  %v5410_v45 = vld [vmem:[#allocation3 + $0xa0] sm:$0xff] }
 0x6f1   :  { %v2270_v55 = vsub.f32 0.0, %v2266_v17  ;;  %v2267_v30 = vadd.f32 %v2192_v32, %v6095_v28  ;;  %v2269_v25 = vadd.f32 %v2263_v58, %v4208_v50  ;;  %v5260_v17 = vld [vmem:[#allocation3 + $0x3a8] sm:$0xff]  ;;  %v5263_v32 = vld [vmem:[#allocation3 + $0x3b8] sm:$0xff]  ;;  %v5422_v28 = vld [vmem:[#allocation3 + $0x60] sm:$0xff] }
 0x6f2   :  { %v5287_v58 = vld [vmem:[#allocation3 + $0x338] sm:$0xff]  ;;  %v5416_v50 = vld [vmem:[#allocation3 + $0x68] sm:$0xff] }
 0x6f3   :  { %v2271_v60 = vmul.f32 1.442695, %v2270_v55  ;;  %v2276_v35 = vsub.f32 0.0, %v2267_v30  ;;  %v2283_v22 = vsub.f32 0.0, %v2269_v25  ;;  %v5266_v55 = vld [vmem:[#allocation3 + $0x3a0] sm:$0xff]  ;;  %v5275_v30 = vld [vmem:[#allocation3 + $0x378] sm:$0xff] }
 0x6f4   :  { %v5296_v25 = vld [vmem:[#allocation3 + $0x2e8] sm:$0xff]  ;;  %6397 = vst [vmem:[#allocation95_spill] sm:$0xff] %v5416_v50 }
 0x6f5   :  { %3227 = vpow2.f32 %v2271_v60  ;;  %v2277_v4 = vmul.f32 1.442695, %v2276_v35  ;;  %v2284_v13 = vmul.f32 1.442695, %v2283_v22  ;;  %v5278_v60 = vld [vmem:[#allocation3 + $0x360] sm:$0xff]  ;;  %v5281_v35 = vld [vmem:[#allocation3 + $0x370] sm:$0xff] }
 0x6f6   :  { %v5308_v22 = vld [vmem:[#allocation3 + $0x2a8] sm:$0xff] }
 0x6f7   :  { %3229 = vpow2.f32 %v2277_v4  ;;  %v5284_v4 = vld [vmem:[#allocation3 + $0x328] sm:$0xff] }
 0x6f8   :  { %3231 = vrcp.f32 %v2307_v2  ;;  %v5305_v2 = vld [vmem:[#allocation3 + $0x2f0] sm:$0xff] }
 0x6f9   :  { %3233 = vrcp.f32 %v2301_v51  ;;  %v5311_v51 = vld [vmem:[#allocation3 + $0x2b8] sm:$0xff] }
 0x6fa   :  { %3235 = vpow2.f32 %v2312_v33  ;;  %v5314_v33 = vld [vmem:[#allocation3 + $0x2a0] sm:$0xff] }
 0x6fb   :  { %3237 = vtanh.f32 %v2296_v63  ;;  %v5317_v63 = vld [vmem:[#allocation3 + $0x2b0] sm:$0xff] }
 0x6fc   :  { %3239 = vpow2.f32 %v2284_v13  ;;  %v5320_v13 = vld [vmem:[#allocation3 + $0x268] sm:$0xff] }
 0x702   :  { %v3228_v52 = vpop.eup %3227 }
 0x703   :  { %v2273_v43 = vadd.f32 1.0, %v3228_v52  ;;  %v5323_v52 = vld [vmem:[#allocation3 + $0x278] sm:$0xff] }
 0x704   :  { %v3230_v10 = vpop.eup %3229 }
 0x705   :  { %3241 = vrcp.f32 %v2273_v43  ;;  %v2279_v9 = vadd.f32 1.0, %v3230_v10  ;;  %v3232_v34 = vpop.eup %3231  ;;  %v5329_v43 = vld [vmem:[#allocation3 + $0x270] sm:$0xff]  ;;  %v5332_v10 = vld [vmem:[#allocation3 + $0x228] sm:$0xff] }
 0x706   :  { %3243 = vtanh.f32 %v2268_v46  ;;  %v3234_v54 = vpop.eup %3233  ;;  %v2317_v42 = vmul.f32 %v3232_v34, %v5130_v8  ;;  %v5326_v46 = vld [vmem:[#allocation3 + $0x260] sm:$0xff] }
 0x707   :  { %3245 = vrcp.f32 %v2279_v9  ;;  %v3236_v20 = vpop.eup %3235  ;;  %v5335_v9 = vld [vmem:[#allocation3 + $0x238] sm:$0xff]  ;;  %v5338_v34 = vld [vmem:[#allocation3 + $0x220] sm:$0xff] }
 0x708   :  { %v3238_v40 = vpop.eup %3237  ;;  %v2314_v14 = vadd.f32 1.0, %v3236_v20  ;;  %v5344_v20 = vld [vmem:[#allocation3 + $0x1e8] sm:$0xff] }
 0x709   :  { %v3240_v38 = vpop.eup %3239  ;;  %v2318_v47 = vmul.f32 %v3238_v40, %v3234_v54  ;;  %v5341_v54 = vld [vmem:[#allocation3 + $0x230] sm:$0xff]  ;;  %v5350_v40 = vld [vmem:[#allocation3 + $0x1e0] sm:$0xff] }
 0x70a   :  { %v2286_v16 = vadd.f32 1.0, %v3240_v38  ;;  %3247 = vrcp.f32 %v2314_v14  ;;  %v5353_v38 = vld [vmem:[#allocation3 + $0x1f0] sm:$0xff]  ;;  %v5362_v14 = vld [vmem:[#allocation3 + $0x1a0] sm:$0xff] }
 0x70b   :  { %v5240_v23 = vadd.f32 %v2318_v47, %v2317_v42  ;;  %v5347_v42 = vld [vmem:[#allocation3 + $0x1f8] sm:$0xff]  ;;  %v5356_v47 = vld [vmem:[#allocation3 + $0x1a8] sm:$0xff] }
 0x70d   :  { %6394 = vst [vmem:[#allocation82_spill] sm:$0xff] %v5240_v23  ;;  %3249 = vtanh.f32 %v5240_v23  ;;  %v5407_v23 = vld [vmem:[#allocation3 + $0xb8] sm:$0xff] }
 0x70e   :  { %3251 = vrcp.f32 %v2286_v16  ;;  %v5371_v16 = vld [vmem:[#allocation3 + $0x178] sm:$0xff] }
 0x712   :  { %v3242_v56 = vpop.eup %3241 }
 0x713   :  { %v3244_v29 = vpop.eup %3243 }
 0x714   :  { %v3246_v31 = vpop.eup %3245  ;;  %v2290_v44 = vmul.f32 %v3244_v29, %v3242_v56  ;;  %v5359_v56 = vld [vmem:[#allocation3 + $0x1b8] sm:$0xff]  ;;  %v5365_v29 = vld [vmem:[#allocation3 + $0x1b0] sm:$0xff] }
 0x715   :  { %v2289_v11 = vmul.f32 %v3246_v31, %v5133_v19  ;;  %v5368_v31 = vld [vmem:[#allocation3 + $0x168] sm:$0xff] }
 0x717   :  { %v5243_v59 = vadd.f32 %v2290_v44, %v2289_v11  ;;  %v3248_v8 = vpop.eup %3247  ;;  %v5374_v44 = vld [vmem:[#allocation3 + $0x160] sm:$0xff]  ;;  %v5377_v11 = vld [vmem:[#allocation3 + $0x170] sm:$0xff] }
 0x719   :  { %6395 = vst [vmem:[#allocation93_spill] sm:$0xff] %v5243_v59  ;;  %3253 = vtanh.f32 %v5243_v59  ;;  %v5404_v59 = vld [vmem:[#allocation3 + $0xa8] sm:$0xff] }
 0x71a   :  { %v3250_v3 = vpop.eup %3249 }
 0x71b   :  { %v3252_v41 = vpop.eup %3251  ;;  %v2321_v5 = vmul.f32 %v3250_v3, %v3248_v8  ;;  %v5380_v8 = vld [vmem:[#allocation3 + $0x128] sm:$0xff]  ;;  %v5383_v3 = vld [vmem:[#allocation3 + $0x138] sm:$0xff] }
 0x726   :  { %v3254_v61 = vpop.eup %3253 }
 0x727   :  { %v2293_v49 = vmul.f32 %v3254_v61, %v3252_v41  ;;  %v5386_v41 = vld [vmem:[#allocation3 + $0x120] sm:$0xff]  ;;  %v5389_v61 = vld [vmem:[#allocation3 + $0x130] sm:$0xff] }
 0x729   :  { %v5247_v18 = vadd.f32 %v2321_v5, %v2293_v49  ;;  %v2847_v62 = vrot.slane %v2293_v49, 3  ;;  %v5392_v49 = vld [vmem:[#allocation3 + $0xe8] sm:$0xff]  ;;  %v5395_v5 = vld [vmem:[#allocation3 + $0xf8] sm:$0xff] }
 0x72b   :  { %2388 = vmatmul.mubr.f32.vlgmr.msra.gmra.mxu0 %v5247_v18  ;;  %2459 = vmatmul.mubr.f32.vlgmr.msra.gmra.mxu1 %v5247_v18  ;;  %v5252_v19 = vsel %vm2863_vm4, %v5142_v36, %v2847_v62  ;;  %v5269_v36 = vld [vmem:[#allocation3 + $0x3b0] sm:$0xff]  ;;  %v5398_v62 = vld [vmem:[#allocation3 + $0xe0] sm:$0xff] }
 0x72c   :  { %6396 = vst [vmem:[#allocation94_spill] sm:$0xff] %v5252_v19  ;;  %2466 = vmatpush1.msra.mxu0 %v5254_v0  ;;  %2537 = vmatpush1.msra.mxu1 %v5257_v6  ;;  %v5401_v19 = vld [vmem:[#allocation3 + $0xf0] sm:$0xff] }
 0x72d   :  { %2467 = vmatprep.subr.mxu0 %v5260_v17  ;;  %2538 = vmatprep.subr.mxu1 %v5263_v32 }
 0x72e   :  { %2468 = vmatpush1.msra.mxu0 %v5266_v55  ;;  %2539 = vmatpush1.msra.mxu1 %v5269_v36 }
 0x72f   :  { %2469 = vmatprep.subr.mxu0 %v5272_v7  ;;  %2540 = vmatprep.subr.mxu1 %v5275_v30 }
 0x730   :  { %2470 = vmatpush1.msra.mxu0 %v5278_v60  ;;  %2541 = vmatpush1.msra.mxu1 %v5281_v35 }
 0x731   :  { %2471 = vmatprep.subr.mxu0 %v5284_v4  ;;  %2542 = vmatprep.subr.mxu1 %v5287_v58 }
 0x732   :  { %2472 = vmatpush1.msra.mxu0 %v5290_v26  ;;  %2543 = vmatpush1.msra.mxu1 %v5293_v21 }
 0x733   :  { %2473 = vmatprep.subr.mxu0 %v5296_v25  ;;  %2544 = vmatprep.subr.mxu1 %v5299_v27 }
 0x734   :  { %2474 = vmatpush1.msra.mxu0 %v5302_v24  ;;  %2545 = vmatpush1.msra.mxu1 %v5305_v2 }
 0x735   :  { %2475 = vmatprep.subr.mxu0 %v5308_v22  ;;  %2546 = vmatprep.subr.mxu1 %v5311_v51 }
 0x736   :  { %2476 = vmatpush1.msra.mxu0 %v5314_v33  ;;  %2547 = vmatpush1.msra.mxu1 %v5317_v63 }
 0x737   :  { %2477 = vmatprep.subr.mxu0 %v5320_v13  ;;  %2548 = vmatprep.subr.mxu1 %v5323_v52 }
 0x738   :  { %2478 = vmatpush1.msra.mxu0 %v5326_v46  ;;  %2549 = vmatpush1.msra.mxu1 %v5329_v43 }
 0x739   :  { %2479 = vmatprep.subr.mxu0 %v5332_v10  ;;  %2550 = vmatprep.subr.mxu1 %v5335_v9 }
 0x73a   :  { %2480 = vmatpush1.msra.mxu0 %v5338_v34  ;;  %2551 = vmatpush1.msra.mxu1 %v5341_v54 }
 0x73b   :  { %2481 = vmatprep.subr.mxu0 %v5344_v20  ;;  %2552 = vmatprep.subr.mxu1 %v5347_v42 }
 0x73c   :  { %2482 = vmatpush1.msra.mxu0 %v5350_v40  ;;  %2553 = vmatpush1.msra.mxu1 %v5353_v38 }
 0x73d   :  { %2483 = vmatprep.subr.mxu0 %v5356_v47  ;;  %2554 = vmatprep.subr.mxu1 %v5359_v56 }
 0x73e   :  { %2484 = vmatpush1.msra.mxu0 %v5362_v14  ;;  %2555 = vmatpush1.msra.mxu1 %v5365_v29 }
 0x73f   :  { %2485 = vmatprep.subr.mxu0 %v5368_v31  ;;  %2556 = vmatprep.subr.mxu1 %v5371_v16 }
 0x740   :  { %2486 = vmatpush1.msra.mxu0 %v5374_v44  ;;  %2557 = vmatpush1.msra.mxu1 %v5377_v11 }
 0x741   :  { %2487 = vmatprep.subr.mxu0 %v5380_v8  ;;  %2558 = vmatprep.subr.mxu1 %v5383_v3 }
 0x742   :  { %2488 = vmatpush1.msra.mxu0 %v5386_v41  ;;  %2559 = vmatpush1.msra.mxu1 %v5389_v61 }
 0x743   :  { %2489 = vmatprep.subr.mxu0 %v5392_v49  ;;  %2560 = vmatprep.subr.mxu1 %v5395_v5 }
 0x744   :  { %2490 = vmatpush1.msra.mxu0 %v5398_v62  ;;  %2561 = vmatpush1.msra.mxu1 %v5401_v19 }
 0x745   :  { %2491 = vmatprep.subr.mxu0 %v5404_v59  ;;  %2562 = vmatprep.subr.mxu1 %v5407_v23 }
 0x746   :  { %2492 = vmatpush1.msra.mxu0 %v5410_v45  ;;  %2563 = vmatpush1.msra.mxu1 %v5413_v39 }
 0x747   :  { %2493 = vmatprep.subr.mxu0 %v5416_v50  ;;  %2564 = vmatprep.subr.mxu1 %v5419_v1  ;;  %v5434_v50 = vld [vmem:[#allocation3 + $0x20] sm:$0xff]  ;;  %v5438_v1 = vld [vmem:[#allocation3 + $0x30] sm:$0xff] }
 0x748   :  { %2494 = vmatpush1.msra.mxu0 %v5422_v28  ;;  %2565 = vmatpush1.msra.mxu1 %v5425_v57 }
 0x749   :  { %2495 = vmatprep.subr.mxu0 %v5428_v12  ;;  %2566 = vmatprep.subr.mxu1 %v5431_v53 }
 0x74a   :  { %2496 = vmatpush1.msra.mxu0 %v5434_v50  ;;  %2529 = vmatprep.mubr.f32.mxu0 %v5965_v37 }
 0x74b   :  { %2567 = vmatpush1.msra.mxu1 %v5438_v1  ;;  %2600 = vmatprep.mubr.f32.mxu1 %v5965_v37 }
 0x74c   :  { %2530 = vmatmul.mubr.f32.vlgmr.msra.gmra.mxu0 %v5247_v18  ;;  %2601 = vmatmul.mubr.f32.vlgmr.msra.gmra.mxu1 %v5247_v18 }
 0x74d   :  { %2664 = vmatprep.subr.mxu0 %v5225_v15  ;;  %2735 = vmatprep.subr.mxu1 %v5228_v48  ;;  %v6399_v15 = vld [vmem:[#allocation95_spill] sm:$0xff]  ;;  %v6400_v48 = vld [vmem:[#allocation96_spill] sm:$0xff] }
 0x74e   :  { %2665 = vmatpush1.msra.mxu0 %v5254_v0  ;;  %2736 = vmatpush1.msra.mxu1 %v5257_v6 }
 0x74f   :  { %2666 = vmatprep.subr.mxu0 %v5260_v17  ;;  %2737 = vmatprep.subr.mxu1 %v5263_v32 }
 0x750   :  { %2667 = vmatpush1.msra.mxu0 %v5266_v55  ;;  %2738 = vmatpush1.msra.mxu1 %v5269_v36 }
 0x751   :  { %2668 = vmatprep.subr.mxu0 %v5272_v7  ;;  %2739 = vmatprep.subr.mxu1 %v5275_v30  ;;  %v6404_v7 = vld [vmem:[#allocation99_spill] sm:$0xff] }
 0x752   :  { %2669 = vmatpush1.msra.mxu0 %v5278_v60  ;;  %2740 = vmatpush1.msra.mxu1 %v5281_v35 }
 0x753   :  { %2670 = vmatprep.subr.mxu0 %v5284_v4  ;;  %2741 = vmatprep.subr.mxu1 %v5287_v58 }
 0x754   :  { %2671 = vmatpush1.msra.mxu0 %v5290_v26  ;;  %2742 = vmatpush1.msra.mxu1 %v5293_v21  ;;  %v6405_v26 = vld [vmem:[#allocation100_spill] sm:$0xff] }
 0x755   :  { %2672 = vmatprep.subr.mxu0 %v5296_v25  ;;  %2743 = vmatprep.subr.mxu1 %v5299_v27  ;;  %v6406_v27 = vld [vmem:[#allocation101_spill] sm:$0xff] }
 0x756   :  { %2673 = vmatpush1.msra.mxu0 %v5302_v24  ;;  %2744 = vmatpush1.msra.mxu1 %v5305_v2 }
 0x757   :  { %2674 = vmatprep.subr.mxu0 %v5308_v22  ;;  %2745 = vmatprep.subr.mxu1 %v5311_v51 }
 0x758   :  { %2675 = vmatpush1.msra.mxu0 %v5314_v33  ;;  %2746 = vmatpush1.msra.mxu1 %v5317_v63 }
 0x759   :  { %2676 = vmatprep.subr.mxu0 %v5320_v13  ;;  %2747 = vmatprep.subr.mxu1 %v5323_v52  ;;  %v6407_v52 = vld [vmem:[#allocation102_spill] sm:$0xff] }
 0x75a   :  { %2677 = vmatpush1.msra.mxu0 %v5326_v46  ;;  %2748 = vmatpush1.msra.mxu1 %v5329_v43 }
 0x75b   :  { %2678 = vmatprep.subr.mxu0 %v5332_v10  ;;  %2749 = vmatprep.subr.mxu1 %v5335_v9  ;;  %v6408_v9 = vld [vmem:[#allocation103_spill] sm:$0xff] }
 0x75c   :  { %2679 = vmatpush1.msra.mxu0 %v5338_v34  ;;  %2750 = vmatpush1.msra.mxu1 %v5341_v54 }
 0x75d   :  { %2680 = vmatprep.subr.mxu0 %v5344_v20  ;;  %2751 = vmatprep.subr.mxu1 %v5347_v42 }
 0x75e   :  { %2681 = vmatpush1.msra.mxu0 %v5350_v40  ;;  %2752 = vmatpush1.msra.mxu1 %v5353_v38 }
 0x75f   :  { %2682 = vmatprep.subr.mxu0 %v5356_v47  ;;  %2753 = vmatprep.subr.mxu1 %v5359_v56  ;;  %v6409_v56 = vld [vmem:[#allocation82_spill] sm:$0xff] }
 0x760   :  { %2683 = vmatpush1.msra.mxu0 %v5362_v14  ;;  %2754 = vmatpush1.msra.mxu1 %v5365_v29 }
 0x761   :  { %2684 = vmatprep.subr.mxu0 %v5368_v31  ;;  %2755 = vmatprep.subr.mxu1 %v5371_v16 }
 0x762   :  { %2685 = vmatpush1.msra.mxu0 %v5374_v44  ;;  %2756 = vmatpush1.msra.mxu1 %v5377_v11 }
 0x763   :  { %2686 = vmatprep.subr.mxu0 %v5380_v8  ;;  %2757 = vmatprep.subr.mxu1 %v5383_v3 }
 0x764   :  { %2687 = vmatpush1.msra.mxu0 %v5386_v41  ;;  %2758 = vmatpush1.msra.mxu1 %v5389_v61 }
 0x765   :  { %2688 = vmatprep.subr.mxu0 %v5392_v49  ;;  %2759 = vmatprep.subr.mxu1 %v5395_v5  ;;  %v6410_v5 = vld [vmem:[#allocation93_spill] sm:$0xff] }
 0x766   :  { %2689 = vmatpush1.msra.mxu0 %v5398_v62  ;;  %2760 = vmatpush1.msra.mxu1 %v5401_v19 }
 0x767   :  { %2690 = vmatprep.subr.mxu0 %v5404_v59  ;;  %2761 = vmatprep.subr.mxu1 %v5407_v23  ;;  %v6401_v23 = vld [vmem:[#allocation16_spill] sm:$0xff]  ;;  %v6402_v59 = vld [vmem:[#allocation97_spill] sm:$0xff] }
 0x768   :  { %2691 = vmatpush1.msra.mxu0 %v5410_v45  ;;  %2762 = vmatpush1.msra.mxu1 %v5413_v39 }
 0x769   :  { %2692 = vmatprep.subr.mxu0 %v6399_v15  ;;  %2763 = vmatprep.subr.mxu1 %v6400_v48 }
 0x76a   :  { %2693 = vmatpush1.msra.mxu0 %v5422_v28  ;;  %2764 = vmatpush1.msra.mxu1 %v5425_v57 }
 0x76b   :  { %2694 = vmatprep.subr.mxu0 %v5428_v12  ;;  %2765 = vmatprep.subr.mxu1 %v5431_v53 }
 0x76c   :  { %2695 = vmatpush1.msra.mxu0 %v5434_v50  ;;  %2728 = vmatprep.mubr.f32.mxu0 %v5965_v37 }
 0x76d   :  { %2766 = vmatpush1.msra.mxu1 %v5438_v1  ;;  %2799 = vmatprep.mubr.f32.mxu1 %v5965_v37  ;;  %v6403_v1 = vld [vmem:[#allocation98_spill] sm:$0xff] }
 0x76e   :  { %3001 = vmatprep.subr.mxu0 %v5965_v37 }
 0x7eb   :  { %v2389_v39 = vpop.f32.mrf.mxu0  ;;  %v2460_v0 = vpop.f32.mrf.mxu1 }
 0x7ec   :  { %v2635_v57 = vadd.f32 %v2389_v39, %v6402_v59  ;;  %v2637_v46 = vadd.f32 %v2460_v0, %v6407_v52  ;;  %v2886_v0 = vld [vmem:[#allocation9 + $0x70] sm:$0xff] }
 0x7ed   :  { %v2391_v45 = vpop.f32.mrf.mxu0  ;;  %v2462_v6 = vpop.f32.mrf.mxu1 }
 0x7ee   :  { %v2636_v28 = vadd.f32 %v2391_v45, %v6401_v23  ;;  %v2639_v12 = vsub.f32 0.0, %v2635_v57  ;;  %v2638_v21 = vadd.f32 %v2462_v6, %v6405_v26  ;;  %v2884_v6 = vld [vmem:[#allocation9 + $0x60] sm:$0xff]  ;;  %v2874_v26 = vld [vmem:[#allocation9 + $0x10] sm:$0xff] }
 0x7f0   :  { %v2645_v18 = vsub.f32 0.0, %v2636_v28  ;;  %v2640_v53 = vmul.f32 1.442695, %v2639_v12  ;;  %v2652_v22 = vsub.f32 0.0, %v2638_v21  ;;  %v6411_v12 = vld [vmem:[#allocation94_spill] sm:$0xff]  ;;  %v2873_v21 = vld [vmem:[#allocation9 + $0x8] sm:$0xff] }
 0x7f2   :  { %v2646_v19 = vmul.f32 1.442695, %v2645_v18  ;;  %v2653_v13 = vmul.f32 1.442695, %v2652_v22 }
 0x7f4   :  { %3255 = vpow2.f32 %v2646_v19 }
 0x7f5   :  { %3257 = vpow2.f32 %v2640_v53  ;;  %v2887_v53 = vld [vmem:[#allocation9 + $0x78] sm:$0xff] }
 0x801   :  { %v3256_v25 = vpop.eup %3255 }
 0x802   :  { %v3258_v2 = vpop.eup %3257  ;;  %v2648_v51 = vadd.f32 1.0, %v3256_v25  ;;  %v2872_v25 = vld [vmem:[#allocation9] sm:$0xff] }
 0x803   :  { %v2642_v63 = vadd.f32 1.0, %v3258_v2 }
 0x80c   :  { %v2531_v50 = vpop.f32.mrf.mxu0  ;;  %v2602_v36 = vpop.f32.mrf.mxu1 }
 0x80d   :  { %v2607_v17 = vadd.f32 %v2531_v50, %v6403_v1  ;;  %v2609_v34 = vadd.f32 %v2602_v36, %v6408_v9  ;;  %v2885_v50 = vld [vmem:[#allocation9 + $0x68] sm:$0xff]  ;;  %v2880_v36 = vld [vmem:[#allocation9 + $0x40] sm:$0xff] }
 0x80e   :  { %v2533_v32 = vpop.f32.mrf.mxu0  ;;  %v2604_v58 = vpop.f32.mrf.mxu1 }
 0x80f   :  { %v2611_v55 = vsub.f32 0.0, %v2607_v17  ;;  %v2608_v30 = vadd.f32 %v2533_v32, %v6404_v7  ;;  %v2610_v24 = vadd.f32 %v2604_v58, %v6406_v27  ;;  %v2883_v17 = vld [vmem:[#allocation9 + $0x58] sm:$0xff]  ;;  %v2882_v32 = vld [vmem:[#allocation9 + $0x50] sm:$0xff] }
 0x810   :  { %v2875_v58 = vld [vmem:[#allocation9 + $0x18] sm:$0xff] }
 0x811   :  { %v2612_v60 = vmul.f32 1.442695, %v2611_v55  ;;  %v2617_v35 = vsub.f32 0.0, %v2608_v30  ;;  %v2624_v33 = vsub.f32 0.0, %v2610_v24  ;;  %v2881_v55 = vld [vmem:[#allocation9 + $0x48] sm:$0xff]  ;;  %v2879_v30 = vld [vmem:[#allocation9 + $0x38] sm:$0xff] }
 0x813   :  { %3259 = vpow2.f32 %v2612_v60  ;;  %v2618_v4 = vmul.f32 1.442695, %v2617_v35  ;;  %v2625_v43 = vmul.f32 1.442695, %v2624_v33  ;;  %v2878_v60 = vld [vmem:[#allocation9 + $0x30] sm:$0xff]  ;;  %v2877_v35 = vld [vmem:[#allocation9 + $0x28] sm:$0xff] }
 0x815   :  { %3261 = vpow2.f32 %v2618_v4  ;;  %v2876_v4 = vld [vmem:[#allocation9 + $0x20] sm:$0xff] }
 0x816   :  { %3263 = vrcp.f32 %v2648_v51 }
 0x817   :  { %3265 = vrcp.f32 %v2642_v63 }
 0x818   :  { %3267 = vpow2.f32 %v2653_v13 }
 0x819   :  { %3269 = vtanh.f32 %v2637_v46 }
 0x81a   :  { %3271 = vpow2.f32 %v2625_v43 }
 0x820   :  { %v3260_v10 = vpop.eup %3259 }
 0x821   :  { %v2614_v54 = vadd.f32 1.0, %v3260_v10 }
 0x822   :  { %v3262_v20 = vpop.eup %3261 }
 0x823   :  { %3273 = vrcp.f32 %v2614_v54  ;;  %v2620_v42 = vadd.f32 1.0, %v3262_v20  ;;  %v3264_v40 = vpop.eup %3263 }
 0x824   :  { %3275 = vtanh.f32 %v2609_v34  ;;  %v3266_v38 = vpop.eup %3265  ;;  %v2658_v14 = vmul.f32 %v3264_v40, %v6409_v56 }
 0x825   :  { %3277 = vrcp.f32 %v2620_v42  ;;  %v3268_v47 = vpop.eup %3267 }
 0x826   :  { %v3270_v29 = vpop.eup %3269  ;;  %v2655_v11 = vadd.f32 1.0, %v3268_v47 }
 0x827   :  { %v3272_v31 = vpop.eup %3271  ;;  %v2659_v16 = vmul.f32 %v3270_v29, %v3266_v38 }
 0x828   :  { %v2627_v61 = vadd.f32 1.0, %v3272_v31  ;;  %3279 = vrcp.f32 %v2655_v11 }
 0x829   :  { %v2660_v3 = vadd.f32 %v2659_v16, %v2658_v14 }
 0x82b   :  { %3281 = vtanh.f32 %v2660_v3 }
 0x82c   :  { %3283 = vrcp.f32 %v2627_v61 }
 0x830   :  { %v3274_v44 = vpop.eup %3273 }
 0x831   :  { %v3276_v8 = vpop.eup %3275 }
 0x832   :  { %v3278_v41 = vpop.eup %3277  ;;  %v2631_v49 = vmul.f32 %v3276_v8, %v3274_v44 }
 0x833   :  { %v2630_v62 = vmul.f32 %v3278_v41, %v6410_v5  ;;  %v2983_v41 = vld [vmem:[%s5559_s4] ss:$0 sm:$0xff] }
 0x835   :  { %v5521_v15 = vadd.f32 %v2631_v49, %v2630_v62  ;;  %v3280_v48 = vpop.eup %3279 }
 0x837   :  { %3285 = vtanh.f32 %v5521_v15 }
 0x838   :  { %v3282_v39 = vpop.eup %3281 }
 0x839   :  { %v3284_v45 = vpop.eup %3283  ;;  %v2662_v59 = vmul.f32 %v3282_v39, %v3280_v48 }
 0x844   :  { %v3286_v23 = vpop.eup %3285 }
 0x845   :  { %v2634_v28 = vmul.f32 %v3286_v23, %v3284_v45 }
 0x847   :  { %v2663_v57 = vadd.f32 %v2662_v59, %v2634_v28  ;;  %v2850_v18 = vrot.slane %v2634_v28, 2 }
 0x849   :  { %2729 = vmatmul.mubr.f32.vlgmr.msra.gmra.mxu0 %v2663_v57  ;;  %2800 = vmatmul.mubr.f32.vlgmr.msra.gmra.mxu1 %v2663_v57  ;;  %v5525_v19 = vsel %vm2865_vm5, %v6411_v12, %v2850_v18 }
 0x84a   :  { %3002 = vmatpush3.msra.mxu0 %v2887_v53  ;;  %3033 = vmatprep.mubr.msk.f32.mxu0 %vm3676_vm6, %v5965_v37 }
 0x84b   :  { %3003 = vmatprep.subr.mxu0 %v5965_v37 }
 0x84c   :  { %3004 = vmatpush3.msra.mxu0 %v2886_v0 }
 0x84d   :  { %3005 = vmatprep.subr.mxu0 %v5965_v37 }
 0x84e   :  { %3006 = vmatpush3.msra.mxu0 %v2885_v50 }
 0x84f   :  { %3007 = vmatprep.subr.mxu0 %v5965_v37 }
 0x850   :  { %3008 = vmatpush3.msra.mxu0 %v2884_v6 }
 0x851   :  { %3009 = vmatprep.subr.mxu0 %v5965_v37 }
 0x852   :  { %3010 = vmatpush3.msra.mxu0 %v2883_v17 }
 0x853   :  { %3011 = vmatprep.subr.mxu0 %v5965_v37 }
 0x854   :  { %3012 = vmatpush3.msra.mxu0 %v2882_v32 }
 0x855   :  { %3013 = vmatprep.subr.mxu0 %v5965_v37 }
 0x856   :  { %3014 = vmatpush3.msra.mxu0 %v2881_v55 }
 0x857   :  { %3015 = vmatprep.subr.mxu0 %v5965_v37 }
 0x858   :  { %3016 = vmatpush3.msra.mxu0 %v2880_v36 }
 0x859   :  { %3017 = vmatprep.subr.mxu0 %v5965_v37 }
 0x85a   :  { %3018 = vmatpush3.msra.mxu0 %v2879_v30 }
 0x85b   :  { %3019 = vmatprep.subr.mxu0 %v5965_v37 }
 0x85c   :  { %3020 = vmatpush3.msra.mxu0 %v2878_v60 }
 0x85d   :  { %3021 = vmatprep.subr.mxu0 %v5965_v37 }
 0x85e   :  { %3022 = vmatpush3.msra.mxu0 %v2877_v35 }
 0x85f   :  { %3023 = vmatprep.subr.mxu0 %v5965_v37 }
 0x860   :  { %3024 = vmatpush3.msra.mxu0 %v2876_v4 }
 0x861   :  { %3025 = vmatprep.subr.mxu0 %v5965_v37 }
 0x862   :  { %3026 = vmatpush3.msra.mxu0 %v2875_v58 }
 0x863   :  { %3027 = vmatprep.subr.mxu0 %v5965_v37 }
 0x864   :  { %3028 = vmatpush3.msra.mxu0 %v2874_v26 }
 0x865   :  { %3029 = vmatprep.subr.mxu0 %v5965_v37 }
 0x866   :  { %3030 = vmatpush3.msra.mxu0 %v2873_v21 }
 0x867   :  { %3031 = vmatprep.subr.mxu0 %v5965_v37 }
 0x868   :  { %3032 = vmatpush3.msra.mxu0 %v2872_v25 }
 0x909   :  { %v2730_v24 = vpop.f32.mrf.mxu0  ;;  %v2801_v33 = vpop.f32.mrf.mxu1 }
 0x90a   :  { %v2806_v2 = vadd.f32 %v2730_v24, %v6403_v1  ;;  %v2808_v20 = vadd.f32 %v2801_v33, %v6408_v9 }
 0x90b   :  { %v2732_v22 = vpop.f32.mrf.mxu0  ;;  %v2803_v43 = vpop.f32.mrf.mxu1 }
 0x90c   :  { %v2810_v51 = vsub.f32 0.0, %v2806_v2  ;;  %v2807_v63 = vadd.f32 %v2732_v22, %v6404_v7  ;;  %v2809_v10 = vadd.f32 %v2803_v43, %v6406_v27 }
 0x90e   :  { %v2811_v13 = vmul.f32 1.442695, %v2810_v51  ;;  %v2816_v52 = vsub.f32 0.0, %v2807_v63  ;;  %v2823_v34 = vsub.f32 0.0, %v2809_v10 }
 0x910   :  { %3287 = vpow2.f32 %v2811_v13  ;;  %v2817_v46 = vmul.f32 1.442695, %v2816_v52  ;;  %v2824_v54 = vmul.f32 1.442695, %v2823_v34 }
 0x912   :  { %3289 = vpow2.f32 %v2817_v46 }
 0x913   :  { %3291 = vpow2.f32 %v2824_v54 }
 0x91d   :  { %v3288_v37 = vpop.eup %3287 }
 0x91e   :  { %v2813_v42 = vadd.f32 1.0, %v3288_v37 }
 0x91f   :  { %v3290_v1 = vpop.eup %3289 }
 0x920   :  { %3293 = vrcp.f32 %v2813_v42  ;;  %v2819_v40 = vadd.f32 1.0, %v3290_v1  ;;  %v3292_v7 = vpop.eup %3291 }
 0x921   :  { %3295 = vtanh.f32 %v2808_v20  ;;  %v2826_v14 = vadd.f32 1.0, %v3292_v7 }
 0x922   :  { %3297 = vrcp.f32 %v2819_v40 }
 0x923   :  { %3299 = vrcp.f32 %v2826_v14 }
 0x92d   :  { %v3294_v38 = vpop.eup %3293 }
 0x92e   :  { %v3296_v47 = vpop.eup %3295 }
 0x92f   :  { %v3298_v56 = vpop.eup %3297  ;;  %v2830_v29 = vmul.f32 %v3296_v47, %v3294_v38 }
 0x930   :  { %v2829_v27 = vmul.f32 %v3298_v56, %v5521_v15  ;;  %v3300_v16 = vpop.eup %3299 }
 0x932   :  { %v2831_v31 = vadd.f32 %v2830_v29, %v2829_v27 }
 0x934   :  { %3301 = vtanh.f32 %v2831_v31 }
 0x941   :  { %v3302_v9 = vpop.eup %3301 }
 0x942   :  { %v2833_v44 = vmul.f32 %v3302_v9, %v3300_v16 }
 0x944   :  { %v2853_v11 = vrot.slane %v2833_v44, 1 }
 0x946   :  { %v2868_v8 = vsel %vm2867_vm7, %v5525_v19, %v2853_v11 }
 0x947   :  { %v2871_v3 = vmax.f32 %v2868_v8, 0.0 }
 0x949   :  { %3034 = vmatmul.mubr.f32.vlgmr.msra.gmra.mxu0 %v2871_v3 }
 0xa09   :  { %v2961_v61 = vpop.f32.mrf.mxu0 }
 0xa0a   :  { %v2962_v49 = vadd.f32 %v2983_v41, %v2961_v61 }
 0xa0b   :  { %v3035_v5 = vpop.f32.mrf.mxu0 }
 0xa0c   :  { %2965 = vst [vmem:[#allocation11] sm:$0xff] %v2962_v49 }
 0xa0d   :  { %3650 = shalt.err (!%p3647_p10)
}
 0xa0e   :  { %2975 = dma.vmem_to_hbm [thread:$0]  %s2973_s16, 128, %s5560_s5, [#allocation5]  }
 0xa0f   :  { %3665 = dma.done.wait [#allocation5], 128  }
 0xa10   :  { %3666 = vsyncadd [#allocation5], 4294967168 }
 0xa11   :  { %2979 = vsyncpa [#allocation4], 1 }
 0xa12   :  { %2980 = vsyncpa [#allocation7], 1 }
 0xa13   :  { %2981 = vsyncpa [#allocation10], 1 }
 0xa14   :  { %2982 = vsyncpa [#allocation5], 1 }

</bundles_post_ra>
